<compile_context>
chip_gen: v6e
topology: v6e:2x2x1
jax: 0.10.0
libtpu: 0.0.40
codegen_flags: <defaults>
</compile_context>

<pallas_src>
import functools

import jax
import jax.numpy as jnp
from jax.experimental import pallas as pl
from jax.experimental.pallas import tpu as pltpu

LANE = 128
SUBLANE = 8


def _round_up(n, m):
    return ((n + m - 1) // m) * m


def _pad_axis(arr, axis, target):
    pad = target - arr.shape[axis]
    if pad <= 0:
        return arr
    widths = [(0, 0)] * arr.ndim
    widths[axis] = (0, pad)
    return jnp.pad(arr, widths)


def classify_kernel(a_ref, p_ref, x_ref,
                    w1_ref, b1_ref,
                    w2_ref, b2_ref,
                    wfc_ref, bfc_ref,
                    out_ref):
    a = a_ref[0]                                      # (N, N)   f32 row-normalized adjacency
    x = x_ref[0].astype(jnp.bfloat16)                 # (N, Fin) bf16 for the MXU

    # ---- SAGEConv 1 + BN1 (pre-folded) + ReLU ----
    # One MXU push: [u1 | v1] = x @ [W1l*s1 | W1r*s1]
    uv1 = jnp.dot(x, w1_ref[...], preferred_element_type=jnp.float32)   # (N, 2*H1p)
    h1 = w1_ref.shape[1] // 2                          # lane-aligned split point
    u1 = uv1[:, :h1]
    v1 = uv1[:, h1:]
    # (A @ X) @ W == A @ (X @ W): tiny (N,N)@(N,H1p) aggregation matmul
    h = jnp.dot(a, u1, preferred_element_type=jnp.float32) + v1 + b1_ref[...]
    h = jnp.maximum(h, 0.0)
    # F.dropout(p=0.8, training=False) -> identity in eval mode.
    # TODO(synk): training-mode dropout (random mask) not implemented.

    # ---- SAGEConv 2 + BN2 (pre-folded) + ReLU ----
    hb = h.astype(jnp.bfloat16)
    uv2 = jnp.dot(hb, w2_ref[...], preferred_element_type=jnp.float32)  # (N, 2*H2)
    h2d = w2_ref.shape[1] // 2
    u2 = uv2[:, :h2d]
    v2 = uv2[:, h2d:]
    h2 = jnp.dot(a, u2, preferred_element_type=jnp.float32) + v2 + b2_ref[...]
    h2 = jnp.maximum(h2, 0.0)

    # ---- global_mean_pool: P @ h2 ----
    pooled = jnp.dot(p_ref[0], h2, preferred_element_type=jnp.float32)  # (Gpad, H2)

    # ---- fc + log_softmax (classes padded to 128; pad bias = -1e9 -> exp ~ 0) ----
    logits = jnp.dot(pooled.astype(jnp.bfloat16), wfc_ref[...],
                     preferred_element_type=jnp.float32) + bfc_ref[...]
    m = jnp.max(logits, axis=-1, keepdims=True)
    z = logits - m
    lse = jnp.log(jnp.sum(jnp.exp(z), axis=-1, keepdims=True))
    out_ref[0] = z - lse


def prepare_params(params):
    """Fold eval-mode BatchNorm into the SAGE weights, zero-pad hidden dims to
    lane multiples, concat lin_l|lin_r and cast big weights to bf16.

    Call ONCE (outside the inference loop) and reuse the result: this avoids
    re-reading ~6.5 MB of f32 params / re-writing ~3.6 MB of bf16 per call."""
    (w1l, b1l, w1r, s1, t1,
     w2l, b2l, w2r, s2, t2,
     wfc, bfc) = params

    hid1 = w1l.shape[1]
    hid2 = w2l.shape[1]
    n_classes = wfc.shape[1]
    hid1_p = _round_up(hid1, LANE)        # 1550 -> 1664
    hid2_p = _round_up(hid2, LANE)        # 512  -> 512
    ncls_p = _round_up(n_classes, LANE)   # 50   -> 128

    # fold BN (eval): y = (xW + b) * s + t  ==  x(W*s) + (b*s + t)
    w1l_f = _pad_axis(w1l * s1, 1, hid1_p)
    w1r_f = _pad_axis(w1r * s1, 1, hid1_p)
    b1_f = _pad_axis(b1l * s1 + t1, 1, hid1_p)
    w2l_f = _pad_axis(_pad_axis(w2l * s2, 0, hid1_p), 1, hid2_p)
    w2r_f = _pad_axis(_pad_axis(w2r * s2, 0, hid1_p), 1, hid2_p)
    b2_f = _pad_axis(b2l * s2 + t2, 1, hid2_p)

    # concat lin_l / lin_r -> one big MXU push per layer; stream as bf16
    w1 = jnp.concatenate([w1l_f, w1r_f], axis=1).astype(jnp.bfloat16)  # (Fin,  2*H1p)
    w2 = jnp.concatenate([w2l_f, w2r_f], axis=1).astype(jnp.bfloat16)  # (H1p,  2*H2p)

    # lane-dense classifier: pad classes; padded biases = -1e9 (softmax-neutral)
    wfc_p = _pad_axis(wfc, 1, ncls_p).astype(jnp.bfloat16)             # (H2, 128) bf16
    bfc_p = jnp.concatenate(
        [bfc, jnp.full((1, ncls_p - n_classes), -1e9, jnp.float32)], axis=1)

    return (w1, b1_f, w2, b2_f, wfc_p, bfc_p)


@functools.partial(jax.jit, static_argnames=("n_classes",))
def classify_net_pallas(a_b, p_b, x_b, prepared, n_classes):
    """Batched inference.  a_b: (B,N,N), p_b: (B,G,N), x_b: (B,N,Fin).
    Weights stay VMEM-resident across the B grid steps (constant index_map)."""
    w1, b1_f, w2, b2_f, wfc_p, bfc_p = prepared

    B, N, _ = a_b.shape
    fin = x_b.shape[2]
    n_graphs = p_b.shape[1]
    ncls_p = wfc_p.shape[1]
    hid1_p = w1.shape[1] // 2
    hid2_p = w2.shape[1] // 2
    ngr_p = _round_up(n_graphs, SUBLANE)  # 2 -> 8 (lane/sublane-dense output tile)

    # pad pooling-matrix rows (extra graph rows pool nothing, sliced off)
    p_b = _pad_axis(p_b, 1, ngr_p)

    # cost hint so XLA can overlap this call with adjacency / pool construction
    flops = 2 * B * (N * fin * 2 * hid1_p          # x @ [W1l|W1r]
                     + N * N * hid1_p              # A @ u1
                     + N * hid1_p * 2 * hid2_p     # h @ [W2l|W2r]
                     + N * N * hid2_p              # A @ u2
                     + ngr_p * N * hid2_p          # P @ h2
                     + ngr_p * hid2_p * ncls_p)    # pooled @ Wfc
    bytes_w = sum(int(w.size) * w.dtype.itemsize
                  for w in (w1, b1_f, w2, b2_f, wfc_p, bfc_p))
    bytes_io = 4 * (int(a_b.size) + int(p_b.size) + int(x_b.size) + B * ngr_p * ncls_p)
    cost = pl.CostEstimate(flops=int(flops),
                           transcendentals=int(B * ngr_p * ncls_p),
                           bytes_accessed=int(bytes_w + bytes_io))

    def act_spec(shape):           # per-batch activations: new block every step
        return pl.BlockSpec((1,) + shape, lambda b: (b, 0, 0))

    def wt_spec(shape):            # weights: constant block -> VMEM-resident
        return pl.BlockSpec(shape, lambda b: (0, 0))

    out = pl.pallas_call(
        classify_kernel,
        out_shape=jax.ShapeDtypeStruct((B, ngr_p, ncls_p), jnp.float32),
        grid=(B,),
        in_specs=[
            act_spec((N, N)),          # a
            act_spec((ngr_p, N)),      # p
            act_spec((N, fin)),        # x
            wt_spec(w1.shape), wt_spec(b1_f.shape),
            wt_spec(w2.shape), wt_spec(b2_f.shape),
            wt_spec(wfc_p.shape), wt_spec(bfc_p.shape),
        ],
        out_specs=pl.BlockSpec((1, ngr_p, ncls_p), lambda b: (b, 0, 0)),
        compiler_params=pltpu.CompilerParams(
            dimension_semantics=("parallel",),     # shards across TCs on v7x
            vmem_limit_bytes=32 << 20),
        cost_estimate=cost,
    )(a_b, p_b, x_b, w1, b1_f, w2, b2_f, wfc_p, bfc_p)

    return out[:, :n_graphs, :n_classes]


def classify_net_ref(a, p, x, params):
    """Pure-JAX f32 reference (original unfolded math) for correctness check."""
    (w1l, b1l, w1r, s1, t1,
     w2l, b2l, w2r, s2, t2,
     wfc, bfc) = params
    h = (a @ x) @ w1l + b1l + x @ w1r
    h = jnp.maximum(h * s1 + t1, 0.0)
    h2 = (a @ h) @ w2l + b2l + h @ w2r
    h2 = jnp.maximum(h2 * s2 + t2, 0.0)
    pooled = p @ h2
    logits = pooled @ wfc + bfc
    return jax.nn.log_softmax(logits, axis=1)


def build_dense_adjacency(edge_index, num_nodes):
    """Row-normalized (mean aggregation) dense adjacency: A[t, s]."""
    src = edge_index[0]
    dst = edge_index[1]
    a = jnp.zeros((num_nodes, num_nodes), jnp.float32)
    a = a.at[dst, src].add(1.0)
    deg = jnp.clip(a.sum(axis=1, keepdims=True), 1.0, None)
    return a / deg


def build_pool_matrix(batch, num_graphs, num_nodes):
    """P[g, n] = 1/count[g] if batch[n] == g (global_mean_pool)."""
    one_hot = (batch[None, :] == jnp.arange(num_graphs)[:, None]).astype(jnp.float32)
    counts = jnp.clip(one_hot.sum(axis=1, keepdims=True), 1.0, None)
    return one_hot / counts


if __name__ == "__main__":
    # Small synthetic graph batches consistent with the module:
    #   N = 16 nodes, input_dim = 32, 2 graphs per batch, hidden 1550 / 512, 50 classes.
    input_dim, hid1, hid2, n_classes = 32, 1550, 512, 50
    num_nodes, num_graphs, n_batches = 16, 2, 2

    key = jax.random.PRNGKey(0)
    keys = jax.random.split(key, 16)

    # Deterministic synthetic parameters (stored as (F_in, F_out)).
    w1l = jax.random.normal(keys[1], (input_dim, hid1), jnp.float32) * 0.05
    b1l = jax.random.normal(keys[2], (1, hid1), jnp.float32) * 0.05
    w1r = jax.random.normal(keys[3], (input_dim, hid1), jnp.float32) * 0.05
    w2l = jax.random.normal(keys[4], (hid1, hid2), jnp.float32) * 0.02
    b2l = jax.random.normal(keys[5], (1, hid2), jnp.float32) * 0.02
    w2r = jax.random.normal(keys[6], (hid1, hid2), jnp.float32) * 0.02
    wfc = jax.random.normal(keys[7], (hid2, n_classes), jnp.float32) * 0.05
    bfc = jax.random.normal(keys[8], (1, n_classes), jnp.float32) * 0.05

    # BatchNorm1d (eval) as per-feature scale/shift: y = x * s + t
    eps = 1e-5
    g1 = 1.0 + 0.1 * jax.random.normal(keys[9], (1, hid1), jnp.float32)
    m1 = 0.1 * jax.random.normal(keys[10], (1, hid1), jnp.float32)
    v1 = jnp.ones((1, hid1), jnp.float32)
    s1 = g1 / jnp.sqrt(v1 + eps)
    t1 = -m1 * s1  # beta = 0
    g2 = 1.0 + 0.1 * jax.random.normal(keys[11], (1, hid2), jnp.float32)
    m2 = jnp.zeros((1, hid2), jnp.float32)
    v2 = jnp.ones((1, hid2), jnp.float32)
    s2 = g2 / jnp.sqrt(v2 + eps)
    t2 = -m2 * s2

    params = (w1l, b1l, w1r, s1, t1, w2l, b2l, w2r, s2, t2, wfc, bfc)

    # One-time weight prep (cached across all subsequent inferences).
    prepared = jax.block_until_ready(prepare_params(params))

    # Build n_batches graph batches: 2 graphs of 8 nodes each, bidirectional
    # rings with a per-batch stride; batch = first 8 nodes -> g0, rest -> g1.
    batch_vec = jnp.concatenate([jnp.zeros(8, jnp.int32), jnp.ones(8, jnp.int32)])
    p_single = build_pool_matrix(batch_vec, num_graphs, num_nodes)

    a_list, x_list = [], []
    for bi in range(n_batches):
        stride = bi + 1
        src_list, dst_list = [], []
        for g in range(num_graphs):
            base = g * 8
            for i in range(8):
                s, d = base + i, base + (i + stride) % 8
                src_list += [s, d]
                dst_list += [d, s]
        edge_index = jnp.array([src_list, dst_list], jnp.int32)
        a_list.append(build_dense_adjacency(edge_index, num_nodes))
        x_list.append(jax.random.normal(keys[12 + bi], (num_nodes, input_dim),
                                        jnp.float32))
    a_b = jnp.stack(a_list)                         # (B, N, N)
    x_b = jnp.stack(x_list)                         # (B, N, Fin)
    p_b = jnp.stack([p_single] * n_batches)         # (B, G, N)

    out = classify_net_pallas(a_b, p_b, x_b, prepared, n_classes)
    out = jax.block_until_ready(out)

    assert out.shape == (n_batches, num_graphs, n_classes)
    for bi in range(n_batches):
        ref = classify_net_ref(a_b[bi], p_b[bi], x_b[bi], params)
        # bf16 weight/activation streaming -> loosened tolerance vs f32 reference
        assert jnp.allclose(out[bi], ref, atol=5e-2, rtol=5e-2), \
            f"mismatch vs JAX reference (batch {bi})"
    assert jnp.allclose(jnp.exp(out).sum(axis=-1), 1.0, atol=1e-3)

    print("KERNEL_OK")
</pallas_src>

<mosaic_0001>
module attributes {stable_mosaic.version = 11 : i64} {
  func.func @classify_kernel(%arg0: i32, %arg1: memref<1x16x16xf32, #tpu.memory_space<vmem>>, %arg2: memref<1x8x16xf32, #tpu.memory_space<vmem>>, %arg3: memref<1x16x32xf32, #tpu.memory_space<vmem>>, %arg4: memref<32x3328xbf16, #tpu.memory_space<vmem>>, %arg5: memref<1x1664xf32, #tpu.memory_space<vmem>>, %arg6: memref<1664x1024xbf16, #tpu.memory_space<vmem>>, %arg7: memref<1x512xf32, #tpu.memory_space<vmem>>, %arg8: memref<512x128xbf16, #tpu.memory_space<vmem>>, %arg9: memref<1x128xf32, #tpu.memory_space<vmem>>, %arg10: memref<1x8x128xf32, #tpu.memory_space<vmem>>) attributes {dimension_semantics = [#tpu.dimension_semantics<parallel>], iteration_bounds = array<i64: 2>, scalar_prefetch = 0 : i64, scratch_operands = 0 : i64, tpu.core_type = #tpu.core_type<tc>, window_params = [{transform_indices = @transform_0, window_bounds = array<i64: 1, 16, 16>}, {transform_indices = @transform_1, window_bounds = array<i64: 1, 8, 16>}, {transform_indices = @transform_2, window_bounds = array<i64: 1, 16, 32>}, {pipeline_mode = #tpu.pipeline_mode<synchronous>, transform_indices = @transform_3, window_bounds = array<i64: 32, 3328>}, {pipeline_mode = #tpu.pipeline_mode<synchronous>, transform_indices = @transform_4, window_bounds = array<i64: 1, 1664>}, {pipeline_mode = #tpu.pipeline_mode<synchronous>, transform_indices = @transform_5, window_bounds = array<i64: 1664, 1024>}, {pipeline_mode = #tpu.pipeline_mode<synchronous>, transform_indices = @transform_6, window_bounds = array<i64: 1, 512>}, {pipeline_mode = #tpu.pipeline_mode<synchronous>, transform_indices = @transform_7, window_bounds = array<i64: 512, 128>}, {pipeline_mode = #tpu.pipeline_mode<synchronous>, transform_indices = @transform_8, window_bounds = array<i64: 1, 128>}, {transform_indices = @transform_9, window_bounds = array<i64: 1, 8, 128>}]} {
    %c0 = arith.constant 0 : index
    %c0_0 = arith.constant 0 : index
    %c0_1 = arith.constant 0 : index
    %0 = vector.load %arg1[%c0, %c0_0, %c0_1] : memref<1x16x16xf32, #tpu.memory_space<vmem>>, vector<1x16x16xf32>
    %1 = vector.shape_cast %0 : vector<1x16x16xf32> to vector<16x16xf32>
    %c0_2 = arith.constant 0 : index
    %c0_3 = arith.constant 0 : index
    %c0_4 = arith.constant 0 : index
    %2 = vector.load %arg3[%c0_2, %c0_3, %c0_4] : memref<1x16x32xf32, #tpu.memory_space<vmem>>, vector<1x16x32xf32>
    %3 = vector.shape_cast %2 : vector<1x16x32xf32> to vector<16x32xf32>
    %4 = arith.truncf %3 : vector<16x32xf32> to vector<16x32xbf16>
    %c0_5 = arith.constant 0 : index
    %c0_6 = arith.constant 0 : index
    %5 = vector.load %arg4[%c0_5, %c0_6] : memref<32x3328xbf16, #tpu.memory_space<vmem>>, vector<32x3328xbf16>
    %cst = arith.constant dense<0.000000e+00> : vector<16x3328xf32>
    %6 = tpu.matmul %4, %5, %cst {dimension_numbers = #tpu.dot_dimension_numbers<[1], [0], [0], [1], [0, 0, 1, 1], [], []>} : vector<16x32xbf16>, vector<32x3328xbf16>, vector<16x3328xf32> -> vector<16x3328xf32>
    %7 = vector.extract_strided_slice %6 {offsets = [0, 0], sizes = [16, 1664], strides = [1, 1]} : vector<16x3328xf32> to vector<16x1664xf32>
    %8 = vector.extract_strided_slice %6 {offsets = [0, 1664], sizes = [16, 1664], strides = [1, 1]} : vector<16x3328xf32> to vector<16x1664xf32>
    %cst_7 = arith.constant dense<0.000000e+00> : vector<16x1664xf32>
    %9 = tpu.matmul %1, %7, %cst_7 {dimension_numbers = #tpu.dot_dimension_numbers<[1], [0], [0], [1], [0, 0, 1, 1], [], []>} : vector<16x16xf32>, vector<16x1664xf32>, vector<16x1664xf32> -> vector<16x1664xf32>
    %10 = arith.addf %9, %8 : vector<16x1664xf32>
    %c0_8 = arith.constant 0 : index
    %c0_9 = arith.constant 0 : index
    %11 = vector.load %arg5[%c0_8, %c0_9] : memref<1x1664xf32, #tpu.memory_space<vmem>>, vector<1x1664xf32>
    %12 = vector.broadcast %11 : vector<1x1664xf32> to vector<16x1664xf32>
    %13 = arith.addf %10, %12 : vector<16x1664xf32>
    %cst_10 = arith.constant 0.000000e+00 : f32
    %14 = vector.broadcast %cst_10 : f32 to vector<16x1664xf32>
    %15 = arith.maximumf %13, %14 : vector<16x1664xf32>
    %16 = arith.truncf %15 : vector<16x1664xf32> to vector<16x1664xbf16>
    %c0_11 = arith.constant 0 : index
    %c0_12 = arith.constant 0 : index
    %17 = vector.load %arg6[%c0_11, %c0_12] : memref<1664x1024xbf16, #tpu.memory_space<vmem>>, vector<1664x1024xbf16>
    %cst_13 = arith.constant dense<0.000000e+00> : vector<16x1024xf32>
    %18 = tpu.matmul %16, %17, %cst_13 {dimension_numbers = #tpu.dot_dimension_numbers<[1], [0], [0], [1], [0, 0, 1, 1], [], []>} : vector<16x1664xbf16>, vector<1664x1024xbf16>, vector<16x1024xf32> -> vector<16x1024xf32>
    %19 = vector.extract_strided_slice %18 {offsets = [0, 0], sizes = [16, 512], strides = [1, 1]} : vector<16x1024xf32> to vector<16x512xf32>
    %20 = vector.extract_strided_slice %18 {offsets = [0, 512], sizes = [16, 512], strides = [1, 1]} : vector<16x1024xf32> to vector<16x512xf32>
    %cst_14 = arith.constant dense<0.000000e+00> : vector<16x512xf32>
    %21 = tpu.matmul %1, %19, %cst_14 {dimension_numbers = #tpu.dot_dimension_numbers<[1], [0], [0], [1], [0, 0, 1, 1], [], []>} : vector<16x16xf32>, vector<16x512xf32>, vector<16x512xf32> -> vector<16x512xf32>
    %22 = arith.addf %21, %20 : vector<16x512xf32>
    %c0_15 = arith.constant 0 : index
    %c0_16 = arith.constant 0 : index
    %23 = vector.load %arg7[%c0_15, %c0_16] : memref<1x512xf32, #tpu.memory_space<vmem>>, vector<1x512xf32>
    %24 = vector.broadcast %23 : vector<1x512xf32> to vector<16x512xf32>
    %25 = arith.addf %22, %24 : vector<16x512xf32>
    %cst_17 = arith.constant 0.000000e+00 : f32
    %26 = vector.broadcast %cst_17 : f32 to vector<16x512xf32>
    %27 = arith.maximumf %25, %26 : vector<16x512xf32>
    %c0_18 = arith.constant 0 : index
    %c0_19 = arith.constant 0 : index
    %c0_20 = arith.constant 0 : index
    %28 = vector.load %arg2[%c0_18, %c0_19, %c0_20] : memref<1x8x16xf32, #tpu.memory_space<vmem>>, vector<1x8x16xf32>
    %29 = vector.shape_cast %28 : vector<1x8x16xf32> to vector<8x16xf32>
    %cst_21 = arith.constant dense<0.000000e+00> : vector<8x512xf32>
    %30 = tpu.matmul %29, %27, %cst_21 {dimension_numbers = #tpu.dot_dimension_numbers<[1], [0], [0], [1], [0, 0, 1, 1], [], []>} : vector<8x16xf32>, vector<16x512xf32>, vector<8x512xf32> -> vector<8x512xf32>
    %31 = arith.truncf %30 : vector<8x512xf32> to vector<8x512xbf16>
    %c0_22 = arith.constant 0 : index
    %c0_23 = arith.constant 0 : index
    %32 = vector.load %arg8[%c0_22, %c0_23] : memref<512x128xbf16, #tpu.memory_space<vmem>>, vector<512x128xbf16>
    %cst_24 = arith.constant dense<0.000000e+00> : vector<8x128xf32>
    %33 = tpu.matmul %31, %32, %cst_24 {dimension_numbers = #tpu.dot_dimension_numbers<[1], [0], [0], [1], [0, 0, 1, 1], [], []>} : vector<8x512xbf16>, vector<512x128xbf16>, vector<8x128xf32> -> vector<8x128xf32>
    %c0_25 = arith.constant 0 : index
    %c0_26 = arith.constant 0 : index
    %34 = vector.load %arg9[%c0_25, %c0_26] : memref<1x128xf32, #tpu.memory_space<vmem>>, vector<1x128xf32>
    %35 = vector.broadcast %34 : vector<1x128xf32> to vector<8x128xf32>
    %36 = arith.addf %33, %35 : vector<8x128xf32>
    %cst_27 = arith.constant dense<0xFF800000> : vector<8xf32>
    %37 = vector.multi_reduction <maximumf>, %36, %cst_27 [1] : vector<8x128xf32> to vector<8xf32>
    %38 = vector.shape_cast %37 : vector<8xf32> to vector<8x1xf32>
    %39 = vector.broadcast %38 : vector<8x1xf32> to vector<8x128xf32>
    %40 = arith.subf %36, %39 : vector<8x128xf32>
    %41 = math.exp %40 : vector<8x128xf32>
    %cst_28 = arith.constant dense<0.000000e+00> : vector<8xf32>
    %42 = vector.multi_reduction <add>, %41, %cst_28 [1] : vector<8x128xf32> to vector<8xf32>
    %43 = vector.shape_cast %42 : vector<8xf32> to vector<8x1xf32>
    %44 = math.log %43 : vector<8x1xf32>
    %45 = vector.broadcast %44 : vector<8x1xf32> to vector<8x128xf32>
    %46 = arith.subf %40, %45 : vector<8x128xf32>
    %c0_29 = arith.constant 0 : index
    %c0_30 = arith.constant 0 : index
    %c0_31 = arith.constant 0 : index
    %47 = vector.load %arg10[%c0_29, %c0_30, %c0_31] : memref<1x8x128xf32, #tpu.memory_space<vmem>>, vector<1x8x128xf32>
    %48 = vector.shape_cast %47 : vector<1x8x128xf32> to vector<8x128xf32>
    %49 = vector.shape_cast %46 : vector<8x128xf32> to vector<1x8x128xf32>
    tpu.vector_store %arg10[%c0_29, %c0_30, %c0_31], %49 {strides = array<i32>} : memref<1x8x128xf32, #tpu.memory_space<vmem>>, vector<1x8x128xf32>,
    return
  }
  func.func @transform_0(%arg0: i32) -> (i32, i32, i32) {
    %c0_i32 = arith.constant 0 : i32
    %c0_i32_0 = arith.constant 0 : i32
    %c0_i32_1 = arith.constant 0 : i32
    return %arg0, %c0_i32, %c0_i32_0 : i32, i32, i32
  }
  func.func @transform_1(%arg0: i32) -> (i32, i32, i32) {
    %c0_i32 = arith.constant 0 : i32
    %c0_i32_0 = arith.constant 0 : i32
    %c0_i32_1 = arith.constant 0 : i32
    return %arg0, %c0_i32, %c0_i32_0 : i32, i32, i32
  }
  func.func @transform_2(%arg0: i32) -> (i32, i32, i32) {
    %c0_i32 = arith.constant 0 : i32
    %c0_i32_0 = arith.constant 0 : i32
    %c0_i32_1 = arith.constant 0 : i32
    return %arg0, %c0_i32, %c0_i32_0 : i32, i32, i32
  }
  func.func @transform_3(%arg0: i32) -> (i32, i32) {
    %c0_i32 = arith.constant 0 : i32
    %c0_i32_0 = arith.constant 0 : i32
    %c0_i32_1 = arith.constant 0 : i32
    return %c0_i32, %c0_i32_0 : i32, i32
  }
  func.func @transform_4(%arg0: i32) -> (i32, i32) {
    %c0_i32 = arith.constant 0 : i32
    %c0_i32_0 = arith.constant 0 : i32
    %c0_i32_1 = arith.constant 0 : i32
    return %c0_i32, %c0_i32_0 : i32, i32
  }
  func.func @transform_5(%arg0: i32) -> (i32, i32) {
    %c0_i32 = arith.constant 0 : i32
    %c0_i32_0 = arith.constant 0 : i32
    %c0_i32_1 = arith.constant 0 : i32
    return %c0_i32, %c0_i32_0 : i32, i32
  }
  func.func @transform_6(%arg0: i32) -> (i32, i32) {
    %c0_i32 = arith.constant 0 : i32
    %c0_i32_0 = arith.constant 0 : i32
    %c0_i32_1 = arith.constant 0 : i32
    return %c0_i32, %c0_i32_0 : i32, i32
  }
  func.func @transform_7(%arg0: i32) -> (i32, i32) {
    %c0_i32 = arith.constant 0 : i32
    %c0_i32_0 = arith.constant 0 : i32
    %c0_i32_1 = arith.constant 0 : i32
    return %c0_i32, %c0_i32_0 : i32, i32
  }
  func.func @transform_8(%arg0: i32) -> (i32, i32) {
    %c0_i32 = arith.constant 0 : i32
    %c0_i32_0 = arith.constant 0 : i32
    %c0_i32_1 = arith.constant 0 : i32
    return %c0_i32, %c0_i32_0 : i32, i32
  }
  func.func @transform_9(%arg0: i32) -> (i32, i32, i32) {
    %c0_i32 = arith.constant 0 : i32
    %c0_i32_0 = arith.constant 0 : i32
    %c0_i32_1 = arith.constant 0 : i32
    return %arg0, %c0_i32, %c0_i32_0 : i32, i32, i32
  }
}

</mosaic_0001>

<bundles_post_ra>
// kernel: classify_net_pallas.1
= control target key start
LH: loop header
LB: loop body
LE: loop exit
PB: predicated region body
PF: predicated region fallthrough
CT: control target
= control target key end

     0   :  { %s11481_s0 = inlined_call_operand.hbm [shape: f32[2,16,16], index: 0, kind: input, shape index: {}]   ;;  %s11482_s1 = inlined_call_operand.vmem [shape: f32[2,8,16], index: 1, kind: input, shape index: {}]   ;;  %s11483_s2 = inlined_call_operand.hbm [shape: f32[2,16,32], index: 2, kind: input, shape index: {}]   ;;  %s11484_s3 = inlined_call_operand.hbm [shape: bf16[32,3328], index: 3, kind: input, shape index: {}]   ;;  %s11485_s4 = inlined_call_operand.hbm [shape: f32[1,1664], index: 4, kind: input, shape index: {}]   ;;  %s11486_s5 = inlined_call_operand.hbm [shape: bf16[1664,1024], index: 5, kind: input, shape index: {}]   ;;  %s11487_s6 = inlined_call_operand.hbm [shape: f32[1,512], index: 6, kind: input, shape index: {}]   ;;  %s11488_s7 = inlined_call_operand.hbm [shape: bf16[512,128], index: 7, kind: input, shape index: {}]   ;;  %s11489_s8 = inlined_call_operand.hbm [shape: f32[1,128], index: 8, kind: input, shape index: {}]   ;;  %s11490_s9 = inlined_call_operand.vmem [shape: f32[2,8,128], index: 9, kind: output, shape index: {}]  }
   0x1   :  { %11504 = sst [smem:[#allocation33_spill]] %s11481_s0 }
   0x2   :  { %11505 = sst [smem:[#allocation34_spill]] %s11484_s3 }
   0x3   :  { %11506 = sst [smem:[#allocation35_spill]] %s11485_s4 }
   0x4   :  { %14 = vsyncpa [#allocation3], 0 }
   0x5   :  { %16 = vsyncpa [#allocation3 + $0x1], 0 }
   0x6   :  { %17 = vsyncpa [#allocation5], 0 }
   0x7   :  { %19 = vsyncpa [#allocation5 + $0x1], 0 }
   0x8   :  { %20 = vsyncpa [#allocation8], 0 }
   0x9   :  { %21 = vsyncpa [#allocation11], 0 }
   0xa   :  { %22 = vsyncpa [#allocation14], 0  ;;  %s10699_s30 = smov 0   ;;  %s10701_s10 = smov 0  }
   0xb   :  { %s10703_s11 = smov 0   ;;  %s10705_s12 = smov 0  }
   0xc LB: > { %s10631_s13 = smov [#allocation6]   ;;  %s10720_s15 = sadd.s32 4294967295, %s10629_s12   ;;  %s10629_s12 = sphi %s10705_s12, %s11560_s12   ;;  %s10625_s11 = sphi %s10703_s11, %s11559_s11   ;;  %s10621_s10 = sphi %s10701_s10, %s11558_s10   ;;  %s10617_s30 = sphi %s10699_s30, %s11557_s30  }
   0xd   : > { %s275_s14 = sshll.u32 %s10631_s13, 4  ;;  %p9098_p0 = scmp.ge.s32.totalorder %s10629_s12, 1  ;;  %s276_s14 = int_to_ptr.vmem [resolvable:$true] %s275_s14 }
   0xe   : > { %p11492_p1 = scmp.eq.s32.totalorder %s10720_s15, 0  ;;  %p263_p2 = scmp.lt.s32.totalorder %s10629_s12, 3 }
   0xf   : > { %s10632_s17 = smov [#allocation7]   ;;  %s10633_s20 = smov [#allocation10]  }
  0x10   : > { %p10725_p3 = pnand %p9098_p0, %p263_p2  ;;  %s289_s18 = sshll.u32 %s10632_s17, 4  ;;  %s290_s18 = int_to_ptr.vmem [resolvable:$true] %s289_s18 }
  0x11   : > { %s313_s21 = sshll.u32 %s10633_s20, 4  ;;  %s10374_s23 = scalar_lea.vmem %s276_s14, 6656  ;;  %s10737_s21 = int_to_ptr.vmem [resolvable:$true] %s313_s21 }
  0x12   : > { %p10160_p4 = pneg %p10725_p3  ;;  %p10375_p7 = scmp.ne.s32.totalorder %s276_s14, %s10374_s23 }
  0x13   : > { %p10382_p10 = scmp.lt.s32.totalorder %s276_s14, %s276_s14  ;;  %p10383_p11 = scmp.lt.s32.totalorder %s10374_s23, %s10374_s23 }
  0x14   : > { %p10733_p5 = pnand %p10160_p4, %p11492_p1 }
  0x15   : > { %p10384_p12 = por %p10383_p11, %p10382_p10 }
  0x16   : > { %p10741_p6 = pneg %p10733_p5 }
  0x18   : > { %p10377_p8 = pnand %p10375_p7, %p10741_p6 }
  0x1a   : > { %p10378_p9 = pneg %p10377_p8 }
  0x1c   : > { %p10385_p13 = pnand %p10384_p12, %p10378_p9 }
  0x1e   : > { %10388 = shalt.err (!%p10385_p13)
}
  0x1f   : > { %s10634_s24 = smov 1664   ;;  %s10635_s25 = smov 104  }
  0x20   : > { %s11510_s3 = sld [smem:[#allocation34_spill]]  ;;  %s10400_s28 = scalar_lea.vmem %s290_s18, 208 }
  0x21   : > { %p10401_p0 = scmp.ne.s32.totalorder %s290_s18, %s10400_s28  ;;  %s10407_s29 = scalar_lea.vmem %s290_s18, 224 }
  0x22   : > { %p10408_p7 = scmp.lt.s32.totalorder %s290_s18, %s290_s18  ;;  %p10409_p8 = scmp.lt.s32.totalorder %s10407_s29, %s10400_s28 }
  0x23   : > { %p10403_p2 = pnand %p10401_p0, %p10741_p6 }
  0x24   : > { %p10410_p10 = por %p10409_p8, %p10408_p7 }
  0x25   : > { %p10404_p4 = pneg %p10403_p2 }
  0x26   : > { %10163 = dma.hbm_to_vmem [thread:$0]  (!%p10733_p5), %s11510_s3, 6656, %s276_s14, [#allocation5], %s10634_s24, %s10634_s24, %s10635_s25  }
  0x27   : > { %p10411_p9 = pnand %p10410_p10, %p10404_p4 }
  0x29   : > { %10414 = shalt.err (!%p10411_p9)
}
  0x2a   : > { %s11511_s4 = sld [smem:[#allocation35_spill]]  ;;  %s10426_s14 = scalar_lea.vmem %s10737_s21, 64 }
  0x2b   : > { %p10427_p11 = scmp.ne.s32.totalorder %s10737_s21, %s10426_s14  ;;  %p10434_p0 = scmp.lt.s32.totalorder %s10737_s21, %s10737_s21 }
  0x2c   : > { %p10435_p2 = scmp.lt.s32.totalorder %s10426_s14, %s10426_s14 }
  0x2d   : > { %p10429_p12 = pnand %p10427_p11, %p10741_p6 }
  0x2e   : > { %p10436_p4 = por %p10435_p2, %p10434_p0 }
  0x2f   : > { %p10430_p13 = pneg %p10429_p12 }
  0x30   : > { %10166 = dma.hbm_to_vmem [thread:$0]  (!%p10733_p5), %s11511_s4, 208, %s290_s18, [#allocation8]  }
  0x31   : > { %p10437_p7 = pnand %p10436_p4, %p10430_p13 }
  0x33   : > { %10440 = shalt.err (!%p10437_p7)
}
  0x34   : > { %10172 = dma.hbm_to_vmem [thread:$0]  (!%p10733_p5), %s11487_s6, 64, %s10737_s21, [#allocation11]  }
  0x35   : > { %s10636_s18 = smov [#allocation9]  }
  0x36   : > { %s299_s24 = sshll.u32 %s10636_s18, 4  ;;  %s300_s24 = int_to_ptr.vmem [resolvable:$true] %s299_s24 }
  0x37   : > { %s10452_s25 = scalar_lea.vmem %s300_s24, 106496  ;;  %p10460_p11 = scmp.lt.s32.totalorder %s300_s24, %s300_s24 }
  0x38   : > { %p10453_p8 = scmp.ne.s32.totalorder %s300_s24, %s10452_s25  ;;  %p10461_p12 = scmp.lt.s32.totalorder %s10452_s25, %s10452_s25 }
  0x3a   : > { %p10455_p10 = pnand %p10453_p8, %p10741_p6  ;;  %p10462_p13 = por %p10461_p12, %p10460_p11 }
  0x3c   : > { %p10456_p9 = pneg %p10455_p10 }
  0x3e   : > { %p10463_p0 = pnand %p10462_p13, %p10456_p9 }
  0x40   : > { %10466 = shalt.err (!%p10463_p0)
}
  0x41   : > { %s10637_s26 = smov 512   ;;  %s10638_s27 = smov 32  }
  0x42   : > { %10169 = dma.hbm_to_vmem [thread:$0]  (!%p10733_p5), %s11486_s5, 106496, %s300_s24, [#allocation8], %s10637_s26, %s10637_s26, %s10638_s27  }
  0x43   : > { %s10639_s29 = smov [#allocation12]  }
  0x44   : > { %s323_s13 = sshll.u32 %s10639_s29, 4  ;;  %s324_s13 = int_to_ptr.vmem [resolvable:$true] %s323_s13 }
  0x45   : > { %s10478_s17 = scalar_lea.vmem %s324_s13, 4096  ;;  %p10486_p8 = scmp.lt.s32.totalorder %s324_s13, %s324_s13 }
  0x46   : > { %p10479_p2 = scmp.ne.s32.totalorder %s324_s13, %s10478_s17  ;;  %p10487_p10 = scmp.lt.s32.totalorder %s10478_s17, %s10478_s17 }
  0x48   : > { %p10481_p4 = pnand %p10479_p2, %p10741_p6  ;;  %p10488_p9 = por %p10487_p10, %p10486_p8 }
  0x4a   : > { %p10482_p7 = pneg %p10481_p4 }
  0x4c   : > { %p10489_p11 = pnand %p10488_p9, %p10482_p7 }
  0x4e   : > { %10492 = shalt.err (!%p10489_p11)
}
  0x4f   : > { %s10640_s14 = smov 64   ;;  %s10641_s20 = smov 4  }
  0x50   : > { %10175 = dma.hbm_to_vmem [thread:$0]  (!%p10733_p5), %s11488_s7, 4096, %s324_s13, [#allocation11], %s10640_s14, %s10640_s14, %s10641_s20  }
  0x51   : > { %s10642_s24 = smov [#allocation13]  }
  0x52   : > { %s337_s25 = sshll.u32 %s10642_s24, 4  ;;  %s338_s25 = int_to_ptr.vmem [resolvable:$true] %s337_s25 }
  0x53   : > { %s10504_s26 = scalar_lea.vmem %s338_s25, 16  ;;  %s10511_s27 = scalar_lea.vmem %s338_s25, 32 }
  0x54   : > { %p10505_p12 = scmp.ne.s32.totalorder %s338_s25, %s10504_s26  ;;  %p10512_p2 = scmp.lt.s32.totalorder %s338_s25, %s338_s25 }
  0x55   : > { %p10513_p4 = scmp.lt.s32.totalorder %s10511_s27, %s10504_s26 }
  0x56   : > { %p10507_p13 = pnand %p10505_p12, %p10741_p6 }
  0x57   : > { %p10514_p7 = por %p10513_p4, %p10512_p2 }
  0x58   : > { %p10508_p0 = pneg %p10507_p13 }
  0x5a   : > { %p10515_p8 = pnand %p10514_p7, %p10508_p0 }
  0x5c   : > { %10518 = shalt.err (!%p10515_p8)
}
  0x5d   : > { %10178 = dma.hbm_to_vmem [thread:$0]  (!%p10733_p5), %s11489_s8, 16, %s338_s25, [#allocation14]  }
  0x5e   : > { %s10793_s22 = sadd.s32 1, %s10629_s12   ;;  %s35_s19 = sadd.s32 1, %s10625_s11 }
  0x5f   : > { %s32_s29 = ssub.s32 %s10629_s12, %s10793_s22  ;;  %p42_p6 = scmp.ne.s32.totalorder %s10625_s11, %s10621_s10 }
  0x60   : > { %p33_p10 = scmp.eq.s32.totalorder %s32_s29, 0  ;;  %p43_p9 = scmp.eq.s32.totalorder %s10629_s12, 0 }
  0x61   : > { %p48_p11 = scmp.ne.s32.totalorder %s10621_s10, %s10617_s30  ;;  %p10192_p12 = scmp.lt.s32.totalorder %s10629_s12, 2 }
  0x62   : > { %s10805_s13 = scalar_select %p33_p10, %s10625_s11, %s35_s19  }
  0x63   : > { %p44_p13 = por %p43_p9, %p42_p6  ;;  %p10809_p0 = por %p11492_p1, %p48_p11 }
  0x64   : > { %s348_s14 = sand.u32 1, %s10625_s11   ;;  %s11491_s20 = sshll.u32 %s10629_s12, 8 }
  0x65   : > { %s11512_s17 = scalar_select %p10809_p0, 1, 0 }
  0x66   : > { %s10815_s23 = sshll.u32 %s348_s14, 4  ;;  %s11513_s0 = sld [smem:[#allocation33_spill]] }
  0x67   : > { %s352_s30 = scalar_lea.vmem [#allocation2], %s10815_s23  ;;  %p10825_p5 = pnand %p10192_p12, %p44_p13 }
  0x68   : > { %s359_s26 = sshll.u32 %s352_s30, 4  ;;  %s10831_s28 = scalar_lea.sflag [#allocation3], %s348_s14  ;;  %s10829_s26 = int_to_ptr.vmem [resolvable:$true] %s359_s26 }
  0x69   : > { %p10521_p4 = pneg %p10825_p5 }
  0x6c   : > { %s10822_s25 = scalar_lea.hbm %s11513_s0, %s11491_s20  ;;  %s10524_s18 = scalar_lea.hbm %s11513_s0, 512 }
  0x6d   : > { %s10519_s21 = scalar_lea.hbm %s10822_s25, 256  ;;  %p10525_p6 = scmp.lt.s32.totalorder %s10822_s25, %s11513_s0 }
  0x6e   : > { %p10520_p2 = scmp.ne.s32.totalorder %s10822_s25, %s10519_s21  ;;  %p10526_p10 = scmp.lt.s32.totalorder %s10524_s18, %s10519_s21 }
  0x70   : > { %p10522_p7 = pnand %p10521_p4, %p10520_p2  ;;  %p10527_p9 = por %p10526_p10, %p10525_p6 }
  0x72   : > { %p10523_p8 = pneg %p10522_p7 }
  0x74   : > { %p10528_p11 = pnand %p10527_p9, %p10523_p8 }
  0x76   : > { %10531 = shalt.err (!%p10528_p11)
}
  0x77   : > { %s10532_s14 = scalar_lea.vmem %s10829_s26, 256  ;;  %s10643_s19 = smov [#allocation2]  }
  0x78   : > { %p10533_p12 = scmp.ne.s32.totalorder %s10829_s26, %s10532_s14  ;;  %s10537_s29 = sshll.u32 %s10643_s19, 4  ;;  %s10538_s29 = int_to_ptr.vmem [resolvable:$false] %s10537_s29 }
  0x79   : > { %s10539_s20 = scalar_lea.vmem %s10538_s29, 512  ;;  %p10540_p7 = scmp.lt.s32.totalorder %s10829_s26, %s10538_s29 }
  0x7a   : > { %p10535_p13 = pnand %p10533_p12, %p10521_p4  ;;  %p10541_p1 = scmp.lt.s32.totalorder %s10539_s20, %s10532_s14 }
  0x7c   : > { %p10536_p2 = pneg %p10535_p13  ;;  %p10542_p0 = por %p10541_p1, %p10540_p7 }
  0x7e   : > { %p10543_p6 = pnand %p10542_p0, %p10536_p2 }
  0x80   : > { %10546 = shalt.err (!%p10543_p6)
}
  0x81   : > { %s10644_s21 = smov 128   ;;  %s10645_s18 = smov 8  }
  0x82   : > { %10182 = dma.hbm_to_vmem [thread:$0]  (!%p10825_p5), %s10822_s25, 256, %s10829_s26, %s10831_s28, %s10644_s21, %s10644_s21, %s10645_s18  }
  0x83   : > { %s11515_s24 = sshll.u32 %s10629_s12, 8  ;;  %s380_s19 = scalar_lea.vmem [#allocation4], %s10815_s23 }
  0x84   : > { %s10866_s14 = scalar_lea.hbm %s11483_s2, %s11515_s24  ;;  %s387_s29 = sshll.u32 %s380_s19, 4  ;;  %s10870_s29 = int_to_ptr.vmem [resolvable:$true] %s387_s29 }
  0x85   : > { %s376_s0 = sand.u32 1, %s10629_s12   ;;  %s10547_s4 = scalar_lea.hbm %s10866_s14, 256 }
  0x86   : > { %s377_s3 = scalar_lea.sflag [#allocation5], %s376_s0  ;;  %p10548_p1 = scmp.ne.s32.totalorder %s10866_s14, %s10547_s4 }
  0x87   : > { %s10552_s28 = scalar_lea.hbm %s11483_s2, 512  ;;  %p10553_p10 = scmp.lt.s32.totalorder %s10866_s14, %s11483_s2 }
  0x88   : > { %p10550_p0 = pnand %p10548_p1, %p10521_p4  ;;  %p10554_p9 = scmp.lt.s32.totalorder %s10552_s28, %s10547_s4 }
  0x8a   : > { %p10551_p8 = pneg %p10550_p0  ;;  %p10555_p11 = por %p10554_p9, %p10553_p10 }
  0x8c   : > { %p10556_p12 = pnand %p10555_p11, %p10551_p8 }
  0x8e   : > { %10559 = shalt.err (!%p10556_p12)
}
  0x8f   : > { %s10560_s0 = scalar_lea.vmem %s10870_s29, 256  ;;  %s10646_s12 = smov [#allocation4]  }
  0x90   : > { %p10561_p13 = scmp.ne.s32.totalorder %s10870_s29, %s10560_s0  ;;  %s10565_s23 = sshll.u32 %s10646_s12, 4  ;;  %s10566_s23 = int_to_ptr.vmem [resolvable:$false] %s10565_s23 }
  0x91   : > { %s10567_s30 = scalar_lea.vmem %s10566_s23, 512  ;;  %p10568_p6 = scmp.lt.s32.totalorder %s10870_s29, %s10566_s23 }
  0x92   : > { %p10563_p2 = pnand %p10561_p13, %p10521_p4  ;;  %p10569_p1 = scmp.lt.s32.totalorder %s10567_s30, %s10560_s0 }
  0x94   : > { %p10564_p7 = pneg %p10563_p2  ;;  %p10570_p0 = por %p10569_p1, %p10568_p6 }
  0x96   : > { %p10571_p10 = pnand %p10570_p0, %p10564_p7 }
  0x98   : > { %10574 = shalt.err (!%p10571_p10)
}
  0x99   : > { %10185 = dma.hbm_to_vmem [thread:$0]  (!%p10825_p5), %s10866_s14, 256, %s10870_s29, %s377_s3, %s10644_s21, %s10644_s21, %s10645_s18  }
  0x9a   : > { %399 = sbr.rel (%p10725_p3) target bundleno = 2297 (0x8f9), region = 56 }
  0x9f   : > { %s401_s4 = sand.u32 1, %s10621_s10   ;;  %p11516_p4 = scmp.ne.s32.totalorder %s11512_s17, 0 }
  0xa0   : > { %s10900_s19 = sshll.u32 %s401_s4, 4  ;;  %s402_s25 = scalar_lea.sflag [#allocation3], %s401_s4 }
  0xa1   : > { %s10903_s26 = scalar_lea.vmem [#allocation2], %s10900_s19 }
  0xa2   : > { %10592 = dma.done.wait (%p11516_p4), %s402_s25, 256  }
  0xa3   : > { %10594 = vsyncadd (%p11516_p4), %s402_s25, 4294967040  ;;  %s410_s3 = sand.u32 1, %s10720_s15   ;;  %s414_s27 = scalar_lea.vmem [#allocation4], %s10900_s19 }
  0xa4   : > { %s411_s16 = scalar_lea.sflag [#allocation5], %s410_s3 }
  0xa5   : > { %10596 = dma.done.wait (%p11516_p4), %s411_s16, 256  }
  0xa6   : > { %10598 = vsyncadd (%p11516_p4), %s411_s16, 4294967040  ;;  %p11517_p3 = scmp.eq.s32.totalorder %s10720_s15, 0 }
  0xa8   : > { %10600 = dma.done.wait (%p11517_p3), [#allocation5], 6656   ;;  %p11518_p5 = pmov %p11517_p3 }
  0xa9   : > { %p11519_p8 = pmov %p11517_p3 }
  0xaa   : > { %10602 = vsyncadd (%p11518_p5), [#allocation5], 4294960640 }
  0xab   : > { %10604 = dma.done.wait (%p11519_p8), [#allocation8], 106704   ;;  %p11520_p9 = pmov %p11517_p3 }
  0xac   : > { %p11521_p11 = pmov %p11517_p3 }
  0xad   : > { %10606 = vsyncadd (%p11520_p9), [#allocation8], 4294860592 }
  0xae   : > { %10608 = dma.done.wait (%p11521_p11), [#allocation11], 4160   ;;  %p11522_p12 = pmov %p11517_p3 }
  0xaf   : > { %p11523_p13 = pmov %p11517_p3 }
  0xb0   : > { %10610 = vsyncadd (%p11522_p12), [#allocation11], 4294963136 }
  0xb1   : > { %10612 = dma.done.wait (%p11523_p13), [#allocation14], 16   ;;  %p11524_p2 = pmov %p11517_p3 }
  0xb2   : > { %v11496_v0 = vmov 0   ;;  %v10247_v1 = vld [vmem:[#allocation6 + $0xd4] ss:$104 sps:$4 sm:$0xff]   ;;  %v10251_v3 = vld [vmem:[#allocation6 + $0xd0] ss:$104 sps:$4 sm:$0xff]   ;;  %vm807_vm0 = vcmask 261120  }
  0xb3   : > { %10614 = vsyncadd (%p11524_p2), [#allocation14], 4294967280  ;;  %843 = vmatprep.mubr.bf16.mxu0 %v11496_v0  ;;  %886 = vmatprep.mubr.bf16.mxu1 %v11496_v0  ;;  %v10249_v2 = vld [vmem:[#allocation6 + $0xdc] ss:$104 sps:$4 sm:$0xff]   ;;  %v10252_v4 = vld [vmem:[#allocation6 + $0xd8] ss:$104 sps:$4 sm:$0xff]  }
  0xb4   : > { %823 = vmatprep.subr.bf16.mxu0 %v10247_v1  ;;  %866 = vmatprep.subr.bf16.mxu1 %v10249_v2  ;;  %v10253_v5 = vld [vmem:[#allocation6 + $0x4] ss:$104 sps:$4 sm:$0xff]   ;;  %v10257_v7 = vld [vmem:[#allocation6] ss:$104 sps:$4 sm:$0xff]   ;;  %v10267_v16 = vld [vmem:[#allocation6 + $0x14] ss:$104 sps:$4 sm:$0xff]  }
  0xb5   : > { %824 = vmatpush1.bf16.msra.mxu0 %v10251_v3  ;;  %867 = vmatpush1.bf16.msra.mxu1 %v10252_v4  ;;  %v10255_v6 = vld [vmem:[#allocation6 + $0xc] ss:$104 sps:$4 sm:$0xff]   ;;  %v10258_v8 = vld [vmem:[#allocation6 + $0x8] ss:$104 sps:$4 sm:$0xff]   ;;  %v10270_v17 = vld [vmem:[#allocation6 + $0x1c] ss:$104 sps:$4 sm:$0xff]  }
  0xb6   : > { %825 = vmatprep.subr.bf16.mxu0 %v10253_v5  ;;  %v492_v9 = vld [vmem:[%s414_s27] sm:$0xff]  ;;  %v493_v10 = vld [vmem:[%s414_s27 + $0x8] sm:$0xff]  ;;  %868 = vmatprep.subr.bf16.mxu1 %v10255_v6  ;;  %v11494_v56 = vmov 0.0   ;;  %vm1370_vm1 = vcmask 130048   ;;  %p481_p7 = scmp.lt.s32.totalorder %s10720_s15, 1 }
  0xb7   : > { %v10259_v11 = vld [vmem:[#allocation6 + $0xe0] ss:$104 sps:$4 sm:$0xff]   ;;  %v10933_v12 = vpack.c.bf16 %v493_v10, %v492_v9  ;;  %v10261_v13 = vld [vmem:[#allocation6 + $0xe4] ss:$104 sps:$4 sm:$0xff]   ;;  %v10265_v18 = vld [vmem:[#allocation6 + $0x10] ss:$104 sps:$4 sm:$0xff]  }
  0xb8   : > { %v10262_v14 = vld [vmem:[#allocation6 + $0xe8] ss:$104 sps:$4 sm:$0xff]   ;;  %v10264_v15 = vld [vmem:[#allocation6 + $0xec] ss:$104 sps:$4 sm:$0xff]   ;;  %v10268_v19 = vld [vmem:[#allocation6 + $0x18] ss:$104 sps:$4 sm:$0xff]  }
  0xb9   : > { %826 = vmatpush1.bf16.msra.mxu0 %v10257_v7  ;;  %869 = vmatpush1.bf16.msra.mxu1 %v10258_v8  ;;  %v10273_v20 = vld [vmem:[#allocation6 + $0xf4] ss:$104 sps:$4 sm:$0xff]   ;;  %v10271_v22 = vld [vmem:[#allocation6 + $0xf0] ss:$104 sps:$4 sm:$0xff]   ;;  %v10279_v24 = vld [vmem:[#allocation6 + $0x24] ss:$104 sps:$4 sm:$0xff]  }
  0xba   : > { %909 = vmatprep.subr.bf16.mxu0 %v10261_v13  ;;  %952 = vmatprep.subr.bf16.mxu1 %v10264_v15  ;;  %v10276_v21 = vld [vmem:[#allocation6 + $0xfc] ss:$104 sps:$4 sm:$0xff]   ;;  %v10274_v23 = vld [vmem:[#allocation6 + $0xf8] ss:$104 sps:$4 sm:$0xff]   ;;  %v10282_v25 = vld [vmem:[#allocation6 + $0x2c] ss:$104 sps:$4 sm:$0xff]  }
  0xbb   : > { %v10277_v26 = vld [vmem:[#allocation6 + $0x20] ss:$104 sps:$4 sm:$0xff]   ;;  %v10285_v28 = vld [vmem:[#allocation6 + $0x104] ss:$104 sps:$4 sm:$0xff]   ;;  %v10288_v31 = vld [vmem:[#allocation6 + $0x34] ss:$104 sps:$4 sm:$0xff]  }
  0xbc   : > { %9175 = vmatmul.mubr.msk.bf16.vlgmr.msra.gmra.mxu0 %vm807_vm0, %v10933_v12  ;;  %9176 = vmatmul.mubr.msk.bf16.vlgmr.msra.gmra.mxu1 %vm807_vm0, %v10933_v12  ;;  %v10280_v27 = vld [vmem:[#allocation6 + $0x28] ss:$104 sps:$4 sm:$0xff]   ;;  %v10291_v29 = vld [vmem:[#allocation6 + $0x10c] ss:$104 sps:$4 sm:$0xff]   ;;  %v10297_v33 = vld [vmem:[#allocation6 + $0x3c] ss:$104 sps:$4 sm:$0xff]  }
  0xbd   : > { %910 = vmatpush1.bf16.msra.mxu0 %v10259_v11  ;;  %953 = vmatpush1.bf16.msra.mxu1 %v10262_v14  ;;  %v10283_v30 = vld [vmem:[#allocation6 + $0x100] ss:$104 sps:$4 sm:$0xff]   ;;  %v10286_v34 = vld [vmem:[#allocation6 + $0x30] ss:$104 sps:$4 sm:$0xff]   ;;  %v10294_v35 = vld [vmem:[#allocation6 + $0x114] ss:$104 sps:$4 sm:$0xff]  }
  0xbe   : > { %911 = vmatprep.subr.bf16.mxu0 %v10267_v16  ;;  %954 = vmatprep.subr.bf16.mxu1 %v10270_v17  ;;  %v10289_v32 = vld [vmem:[#allocation6 + $0x108] ss:$104 sps:$4 sm:$0xff]   ;;  %v10295_v36 = vld [vmem:[#allocation6 + $0x38] ss:$104 sps:$4 sm:$0xff]   ;;  %v10303_v37 = vld [vmem:[#allocation6 + $0x11c] ss:$104 sps:$4 sm:$0xff]  }
  0xbf   : > { %929 = vmatprep.mubr.bf16.mxu0 %v11496_v0  ;;  %972 = vmatprep.mubr.bf16.mxu1 %v11496_v0  ;;  %v10292_v38 = vld [vmem:[#allocation6 + $0x110] ss:$104 sps:$4 sm:$0xff]   ;;  %v10300_v39 = vld [vmem:[#allocation6 + $0x44] ss:$104 sps:$4 sm:$0xff]   ;;  %v10298_v40 = vld [vmem:[#allocation6 + $0x40] ss:$104 sps:$4 sm:$0xff]  }
  0xc0   : > { %v10301_v41 = vld [vmem:[#allocation6 + $0x118] ss:$104 sps:$4 sm:$0xff]   ;;  %v10306_v42 = vld [vmem:[#allocation6 + $0x124] ss:$104 sps:$4 sm:$0xff]   ;;  %v10307_v44 = vld [vmem:[#allocation6 + $0x48] ss:$104 sps:$4 sm:$0xff]  }
  0xc1   : > { %912 = vmatpush1.bf16.msra.mxu0 %v10265_v18  ;;  %955 = vmatpush1.bf16.msra.mxu1 %v10268_v19  ;;  %v10309_v43 = vld [vmem:[#allocation6 + $0x4c] ss:$104 sps:$4 sm:$0xff]   ;;  %v10304_v46 = vld [vmem:[#allocation6 + $0x120] ss:$104 sps:$4 sm:$0xff]   ;;  %v10321_v49 = vld [vmem:[#allocation6 + $0x5c] ss:$104 sps:$4 sm:$0xff]  }
  0xc2   : > { %995 = vmatprep.subr.bf16.mxu0 %v10273_v20  ;;  %1038 = vmatprep.subr.bf16.mxu1 %v10276_v21  ;;  %v10315_v45 = vld [vmem:[#allocation6 + $0x12c] ss:$104 sps:$4 sm:$0xff]   ;;  %v10313_v48 = vld [vmem:[#allocation6 + $0x128] ss:$104 sps:$4 sm:$0xff]   ;;  %v10319_v52 = vld [vmem:[#allocation6 + $0x58] ss:$104 sps:$4 sm:$0xff]  }
  0xc3   : > { %v10312_v47 = vld [vmem:[#allocation6 + $0x54] ss:$104 sps:$4 sm:$0xff]   ;;  %v10310_v50 = vld [vmem:[#allocation6 + $0x50] ss:$104 sps:$4 sm:$0xff]   ;;  %v10324_v54 = vld [vmem:[#allocation6 + $0x64] ss:$104 sps:$4 sm:$0xff]  }
  0xc4   : > { %9177 = vmatmul.mubr.msk.bf16.vlgmr.msra.gmra.mxu0 %vm807_vm0, %v10933_v12  ;;  %9178 = vmatmul.mubr.msk.bf16.vlgmr.msra.gmra.mxu1 %vm807_vm0, %v10933_v12  ;;  %v10318_v51 = vld [vmem:[#allocation6 + $0x134] ss:$104 sps:$4 sm:$0xff]   ;;  %v10316_v53 = vld [vmem:[#allocation6 + $0x130] ss:$104 sps:$4 sm:$0xff]   ;;  %v10322_v55 = vld [vmem:[#allocation6 + $0x60] ss:$104 sps:$4 sm:$0xff]  }
  0xc5   : > { %996 = vmatpush1.bf16.msra.mxu0 %v10271_v22  ;;  %1039 = vmatpush1.bf16.msra.mxu1 %v10274_v23  ;;  %v10975_v4 = vld [vmem:[%s10903_s26] sm:$0xff]  ;;  %v10984_v9 = vld [vmem:[%s10903_s26 + $0x8] sm:$0xff]  ;;  %s11562_s15 = smov (!%p481_p7, %s10720_s15), 1 }
  0xc6   : > { %997 = vmatprep.subr.bf16.mxu0 %v10279_v24  ;;  %1040 = vmatprep.subr.bf16.mxu1 %v10282_v25  ;;  %v2104_v21 = vld [vmem:[#allocation9 + $0x1c0] sm:$0xff]  ;;  %s9121_s17 = sshll.u32 %s11562_s15, 3 }
  0xc7   : > { %1015 = vmatprep.mubr.bf16.mxu0 %v11496_v0  ;;  %1058 = vmatprep.mubr.bf16.mxu1 %v11496_v0  ;;  %v2108_v22 = vld [vmem:[#allocation9 + $0x1e0] sm:$0xff]  ;;  %s484_s14 = scalar_lea.vmem %s11482_s1, %s9121_s17  ;;  %s488_s24 = scalar_lea.vmem %s11490_s9, %s9121_s17 }
  0xc8   : > { %v9259_v24 = vcombine.high %v2104_v21, %v2108_v22 }
  0xc9   : > { %998 = vmatpush1.bf16.msra.mxu0 %v10277_v26  ;;  %1041 = vmatpush1.bf16.msra.mxu1 %v10280_v27  ;;  %v9258_v26 = vcombine.low %v2104_v21, %v2108_v22  ;;  %v2096_v27 = vld [vmem:[#allocation9 + $0x180] sm:$0xff] }
  0xca   : > { %1081 = vmatprep.subr.bf16.mxu0 %v10285_v28  ;;  %1124 = vmatprep.subr.bf16.mxu1 %v10291_v29  ;;  %v2100_v28 = vld [vmem:[#allocation9 + $0x1a0] sm:$0xff] }
  0xcb   : > { %v2232_v29 = vld [vmem:[#allocation9 + $0x5c0] sm:$0xff] }
  0xcc   : > { %9179 = vmatmul.mubr.msk.bf16.vlgmr.msra.gmra.mxu0 %vm807_vm0, %v10933_v12  ;;  %9180 = vmatmul.mubr.msk.bf16.vlgmr.msra.gmra.mxu1 %vm807_vm0, %v10933_v12  ;;  %v2176_v22 = vld [vmem:[#allocation9 + $0x400] sm:$0xff] }
  0xcd   : > { %1082 = vmatpush1.bf16.msra.mxu0 %v10283_v30  ;;  %1101 = vmatprep.mubr.bf16.mxu0 %v11496_v0  ;;  %v2236_v30 = vld [vmem:[#allocation9 + $0x5e0] sm:$0xff] }
  0xce   : > { %1083 = vmatprep.subr.bf16.mxu0 %v10288_v31  ;;  %1125 = vmatpush1.bf16.msra.mxu1 %v10289_v32  ;;  %v2088_v31 = vld [vmem:[#allocation9 + $0x140] sm:$0xff] }
  0xcf   : > { %1126 = vmatprep.subr.bf16.mxu1 %v10297_v33  ;;  %1144 = vmatprep.mubr.bf16.mxu1 %v11496_v0  ;;  %v2092_v32 = vld [vmem:[#allocation9 + $0x160] sm:$0xff]  ;;  %v9251_v33 = vcombine.high %v2096_v27, %v2100_v28 }
  0xd1   : > { %1084 = vmatpush1.bf16.msra.mxu0 %v10286_v34  ;;  %v9387_v34 = vcombine.high %v2232_v29, %v2236_v30 }
  0xd2   : > { %1167 = vmatprep.subr.bf16.mxu0 %v10294_v35  ;;  %1127 = vmatpush1.bf16.msra.mxu1 %v10295_v36  ;;  %v9250_v35 = vcombine.low %v2096_v27, %v2100_v28  ;;  %v2224_v36 = vld [vmem:[#allocation9 + $0x580] sm:$0xff] }
  0xd3   : > { %1210 = vmatprep.subr.bf16.mxu1 %v10303_v37  ;;  %v2228_v37 = vld [vmem:[#allocation9 + $0x5a0] sm:$0xff] }
  0xd4   : > { %9181 = vmatmul.mubr.msk.bf16.vlgmr.msra.gmra.mxu0 %vm807_vm0, %v10933_v12  ;;  %v2160_v27 = vld [vmem:[#allocation9 + $0x380] sm:$0xff] }
  0xd5   : > { %1168 = vmatpush1.bf16.msra.mxu0 %v10292_v38  ;;  %9182 = vmatmul.mubr.msk.bf16.vlgmr.msra.gmra.mxu1 %vm807_vm0, %v10933_v12  ;;  %v9243_v38 = vcombine.high %v2088_v31, %v2092_v32  ;;  %v2164_v28 = vld [vmem:[#allocation9 + $0x3a0] sm:$0xff] }
  0xd6   : > { %1169 = vmatprep.subr.bf16.mxu0 %v10300_v39  ;;  %1187 = vmatprep.mubr.bf16.mxu0 %v11496_v0  ;;  %v9386_v39 = vcombine.low %v2232_v29, %v2236_v30 }
  0xd7   : > { %1211 = vmatpush1.bf16.msra.mxu1 %v10301_v41  ;;  %1230 = vmatprep.mubr.bf16.mxu1 %v11496_v0  ;;  %v2084_v41 = vld [vmem:[#allocation9 + $0x120] sm:$0xff] }
  0xd8   : > { %1212 = vmatprep.subr.bf16.mxu1 %v10309_v43  ;;  %v9242_v43 = vcombine.low %v2088_v31, %v2092_v32  ;;  %v2296_v31 = vld [vmem:[#allocation9 + $0x7c0] sm:$0xff] }
  0xd9   : > { %1170 = vmatpush1.bf16.msra.mxu0 %v10298_v40  ;;  %v2080_v40 = vld [vmem:[#allocation9 + $0x100] sm:$0xff] }
  0xda   : > { %1253 = vmatprep.subr.bf16.mxu0 %v10306_v42  ;;  %v9379_v42 = vcombine.high %v2224_v36, %v2228_v37  ;;  %v2300_v32 = vld [vmem:[#allocation9 + $0x7e0] sm:$0xff] }
  0xdb   : > { %1213 = vmatpush1.bf16.msra.mxu1 %v10307_v44  ;;  %v2216_v44 = vld [vmem:[#allocation9 + $0x540] sm:$0xff] }
  0xdc   : > { %9183 = vmatmul.mubr.msk.bf16.vlgmr.msra.gmra.mxu0 %vm807_vm0, %v10933_v12  ;;  %1296 = vmatprep.subr.bf16.mxu1 %v10315_v45  ;;  %v2220_v45 = vld [vmem:[#allocation9 + $0x560] sm:$0xff] }
  0xdd   : > { %1254 = vmatpush1.bf16.msra.mxu0 %v10304_v46  ;;  %1273 = vmatprep.mubr.bf16.mxu0 %v11496_v0  ;;  %v9235_v46 = vcombine.high %v2080_v40, %v2084_v41 }
  0xde   : > { %1255 = vmatprep.subr.bf16.mxu0 %v10312_v47  ;;  %9184 = vmatmul.mubr.msk.bf16.vlgmr.msra.gmra.mxu1 %vm807_vm0, %v10933_v12  ;;  %v9378_v47 = vcombine.low %v2224_v36, %v2228_v37  ;;  %v2156_v36 = vld [vmem:[#allocation9 + $0x360] sm:$0xff]  ;;  %v9451_v37 = vcombine.high %v2296_v31, %v2300_v32 }
  0xdf   : > { %1297 = vmatpush1.bf16.msra.mxu1 %v10313_v48  ;;  %1316 = vmatprep.mubr.bf16.mxu1 %v11496_v0  ;;  %v2072_v48 = vld [vmem:[#allocation9 + $0xc0] sm:$0xff] }
  0xe0   : > { %1298 = vmatprep.subr.bf16.mxu1 %v10321_v49  ;;  %v2076_v49 = vld [vmem:[#allocation9 + $0xe0] sm:$0xff] }
  0xe1   : > { %1256 = vmatpush1.bf16.msra.mxu0 %v10310_v50  ;;  %v9371_v50 = vcombine.high %v2216_v44, %v2220_v45 }
  0xe2   : > { %1339 = vmatprep.subr.bf16.mxu0 %v10318_v51  ;;  %v9234_v51 = vcombine.low %v2080_v40, %v2084_v41  ;;  %v2292_v40 = vld [vmem:[#allocation9 + $0x7a0] sm:$0xff] }
  0xe3   : > { %1299 = vmatpush1.bf16.msra.mxu1 %v10319_v52  ;;  %v2208_v52 = vld [vmem:[#allocation9 + $0x500] sm:$0xff] }
  0xe4   : > { %9185 = vmatmul.mubr.msk.bf16.vlgmr.msra.gmra.mxu0 %vm807_vm0, %v10933_v12 }
  0xe5   : > { %1340 = vmatpush1.bf16.msra.mxu0 %v10316_v53  ;;  %1359 = vmatprep.mubr.bf16.mxu0 %v11496_v0  ;;  %v2212_v53 = vld [vmem:[#allocation9 + $0x520] sm:$0xff] }
  0xe6   : > { %1341 = vmatprep.subr.bf16.mxu0 %v10324_v54  ;;  %9186 = vmatmul.mubr.msk.bf16.vlgmr.msra.gmra.mxu1 %vm807_vm0, %v10933_v12  ;;  %v9227_v54 = vcombine.high %v2072_v48, %v2076_v49 }
  0xe7   : > { %1441 = vmatprep.mubr.f32.mxu1 %v11494_v56 }
  0xe9   : > { %1342 = vmatpush1.bf16.msra.mxu0 %v10322_v55  ;;  %v9370_v55 = vcombine.low %v2216_v44, %v2220_v45  ;;  %v2148_v44 = vld [vmem:[#allocation9 + $0x320] sm:$0xff] }
  0xec   : > { %9187 = vmatmul.mubr.msk.bf16.vlgmr.msra.gmra.mxu0 %vm807_vm0, %v10933_v12 }
  0xed   : > { %1518 = vmatprep.mubr.f32.mxu0 %v11494_v56 }
 0x17c   : > { %v845_v57 = vpop.f32.mrf.mxu0  ;;  %v888_v58 = vpop.f32.mrf.mxu1 }
 0x17e   : > { %v847_v59 = vpop.f32.mrf.mxu0  ;;  %v890_v60 = vpop.f32.mrf.mxu1 }
 0x180   : > { %v849_v61 = vpop.f32.mrf.mxu0  ;;  %v892_v62 = vpop.f32.mrf.mxu1 }
 0x182   : > { %v851_v63 = vpop.f32.mrf.mxu0  ;;  %v894_v1 = vpop.f32.mrf.mxu1 }
 0x183   : > { %1405 = vmatprep.subr.mxu1 %v851_v63  ;;  %1482 = vmatprep.subr.mxu0 %v894_v1  ;;  %v9362_v1 = vcombine.low %v2208_v52, %v2212_v53 }
 0x184   : > { %v931_v2 = vpop.f32.mrf.mxu0  ;;  %v974_v3 = vpop.f32.mrf.mxu1  ;;  %1406 = vmatpush1.msra.mxu1 %v849_v61  ;;  %1483 = vmatpush1.msra.mxu0 %v892_v62  ;;  %v2200_v61 = vld [vmem:[#allocation9 + $0x4c0] sm:$0xff] }
 0x185   : > { %1407 = vmatprep.subr.mxu1 %v847_v59  ;;  %1484 = vmatprep.subr.mxu0 %v890_v60  ;;  %v9363_v59 = vcombine.high %v2208_v52, %v2212_v53  ;;  %v9226_v60 = vcombine.low %v2072_v48, %v2076_v49  ;;  %v2204_v62 = vld [vmem:[#allocation9 + $0x4e0] sm:$0xff] }
 0x186   : > { %v933_v5 = vpop.f32.mrf.mxu0  ;;  %v976_v6 = vpop.f32.mrf.mxu1  ;;  %1408 = vmatpush1.msra.mxu1 %v845_v57  ;;  %1485 = vmatpush1.msra.mxu0 %v888_v58  ;;  %v2064_v57 = vld [vmem:[#allocation9 + $0x80] sm:$0xff] }
 0x187   : > { %9188 = vmatmul.mubr.msk.f32.vlgmr.msra.gmra.mxu1 %vm1370_vm1, %v10975_v4  ;;  %9190 = vmatmul.mubr.msk.f32.vlgmr.msra.gmra.mxu0 %vm1370_vm1, %v10975_v4  ;;  %v2068_v58 = vld [vmem:[#allocation9 + $0xa0] sm:$0xff] }
 0x188   : > { %v935_v7 = vpop.f32.mrf.mxu0  ;;  %v978_v8 = vpop.f32.mrf.mxu1  ;;  %1447 = vmatprep.mubr.f32.mxu1 %v11494_v56  ;;  %1524 = vmatprep.mubr.f32.mxu0 %v11494_v56  ;;  %v9219_v63 = vcombine.high %v2064_v57, %v2068_v58  ;;  %v2284_v48 = vld [vmem:[#allocation9 + $0x760] sm:$0xff] }
 0x189   : > { %v2140_v52 = vld [vmem:[#allocation9 + $0x2e0] sm:$0xff] }
 0x18a   : > { %v937_v10 = vpop.f32.mrf.mxu0  ;;  %v980_v11 = vpop.f32.mrf.mxu1 }
 0x18b   : > { %9189 = vmatmul.mubr.msk.f32.gmra.mxu1 %vm1370_vm1, %v10984_v9  ;;  %9191 = vmatmul.mubr.msk.f32.gmra.mxu0 %vm1370_vm1, %v10984_v9 }
 0x18c   : > { %1559 = vmatprep.subr.mxu1 %v937_v10  ;;  %1636 = vmatprep.subr.mxu0 %v980_v11  ;;  %v1017_v12 = vpop.f32.mrf.mxu0  ;;  %v1060_v13 = vpop.f32.mrf.mxu1  ;;  %v2048_v10 = vld [vmem:[#allocation9] sm:$0xff] }
 0x18d   : > { %1560 = vmatpush1.msra.mxu1 %v935_v7  ;;  %1637 = vmatpush1.msra.mxu0 %v978_v8  ;;  %v2196_v7 = vld [vmem:[#allocation9 + $0x4a0] sm:$0xff] }
 0x18e   : > { %1561 = vmatprep.subr.mxu1 %v933_v5  ;;  %1638 = vmatprep.subr.mxu0 %v976_v6  ;;  %v1019_v14 = vpop.f32.mrf.mxu0  ;;  %v1062_v15 = vpop.f32.mrf.mxu1  ;;  %v9218_v5 = vcombine.low %v2064_v57, %v2068_v58  ;;  %v2192_v6 = vld [vmem:[#allocation9 + $0x480] sm:$0xff] }
 0x18f   : > { %1562 = vmatpush1.msra.mxu1 %v931_v2  ;;  %1595 = vmatprep.mubr.f32.mxu1 %v11494_v56  ;;  %v2056_v2 = vld [vmem:[#allocation9 + $0x40] sm:$0xff] }
 0x190   : > { %1639 = vmatpush1.msra.mxu0 %v974_v3  ;;  %1672 = vmatprep.mubr.f32.mxu0 %v11494_v56  ;;  %v1021_v16 = vpop.f32.mrf.mxu0  ;;  %v1064_v17 = vpop.f32.mrf.mxu1  ;;  %v2060_v3 = vld [vmem:[#allocation9 + $0x60] sm:$0xff] }
 0x191   : > { %9192 = vmatmul.mubr.msk.f32.vlgmr.msra.gmra.mxu1 %vm1370_vm1, %v10975_v4  ;;  %9194 = vmatmul.mubr.msk.f32.vlgmr.msra.gmra.mxu0 %vm1370_vm1, %v10975_v4  ;;  %v9211_v8 = vcombine.high %v2056_v2, %v2060_v3  ;;  %v2052_v11 = vld [vmem:[#allocation9 + $0x20] sm:$0xff] }
 0x192   : > { %v1023_v18 = vpop.f32.mrf.mxu0  ;;  %v1066_v19 = vpop.f32.mrf.mxu1  ;;  %1601 = vmatprep.mubr.f32.mxu1 %v11494_v56  ;;  %1678 = vmatprep.mubr.f32.mxu0 %v11494_v56  ;;  %v9202_v21 = vcombine.low %v2048_v10, %v2052_v11  ;;  %v2276_v57 = vld [vmem:[#allocation9 + $0x720] sm:$0xff] }
 0x193   : > { %1713 = vmatprep.subr.mxu1 %v1023_v18  ;;  %1790 = vmatprep.subr.mxu0 %v1066_v19  ;;  %v2168_v18 = vld [vmem:[#allocation9 + $0x3c0] sm:$0xff] }
 0x194   : > { %1714 = vmatpush1.msra.mxu1 %v1021_v16  ;;  %1791 = vmatpush1.msra.mxu0 %v1064_v17  ;;  %v1103_v20 = vpop.f32.mrf.mxu0  ;;  %v9203_v16 = vcombine.high %v2048_v10, %v2052_v11  ;;  %v9346_v17 = vcombine.low %v2192_v6, %v2196_v7  ;;  %v2172_v19 = vld [vmem:[#allocation9 + $0x3e0] sm:$0xff] }
 0x195   : > { %9193 = vmatmul.mubr.msk.f32.gmra.mxu1 %vm1370_vm1, %v10984_v9  ;;  %9195 = vmatmul.mubr.msk.f32.gmra.mxu0 %vm1370_vm1, %v10984_v9  ;;  %v9322_v30 = vcombine.low %v2168_v18, %v2172_v19  ;;  %v2120_v10 = vld [vmem:[#allocation9 + $0x240] sm:$0xff] }
 0x196   : > { %1715 = vmatprep.subr.mxu1 %v1019_v14  ;;  %1792 = vmatprep.subr.mxu0 %v1062_v15  ;;  %v11002_v23 = vpop.f32.mrf.mxu0  ;;  %v2184_v14 = vld [vmem:[#allocation9 + $0x440] sm:$0xff] }
 0x197   : > { %1716 = vmatpush1.msra.mxu1 %v1017_v12  ;;  %1749 = vmatprep.mubr.f32.mxu1 %v11494_v56  ;;  %v9347_v12 = vcombine.high %v2192_v6, %v2196_v7  ;;  %v2188_v15 = vld [vmem:[#allocation9 + $0x460] sm:$0xff] }
 0x198   : > { %1793 = vmatpush1.msra.mxu0 %v1060_v13  ;;  %1826 = vmatprep.mubr.f32.mxu0 %v11494_v56  ;;  %v1107_v25 = vpop.f32.mrf.mxu0  ;;  %v9210_v13 = vcombine.low %v2056_v2, %v2060_v3  ;;  %v2132_v2 = vld [vmem:[#allocation9 + $0x2a0] sm:$0xff] }
 0x199   : > { %9196 = vmatmul.mubr.msk.f32.vlgmr.msra.gmra.mxu1 %vm1370_vm1, %v10975_v4  ;;  %9198 = vmatmul.mubr.msk.f32.vlgmr.msra.gmra.mxu0 %vm1370_vm1, %v10975_v4  ;;  %v2124_v11 = vld [vmem:[#allocation9 + $0x260] sm:$0xff] }
 0x19a   : > { %1755 = vmatprep.mubr.f32.mxu1 %v11494_v56  ;;  %1832 = vmatprep.mubr.f32.mxu0 %v11494_v56 }
 0x19b   : > { %10125 = vmatprep.subr.mxu1 %v1107_v25  ;;  %7040 = vmatprep.subr.bf16.mxu0 %v9259_v24  ;;  %v2180_v24 = vld [vmem:[#allocation9 + $0x420] sm:$0xff] }
 0x19c   : > { %10126 = vmatpush3.msra.mxu1 %v1107_v25  ;;  %7041 = vmatpush1.bf16.msra.mxu0 %v9258_v26  ;;  %v9323_v25 = vcombine.high %v2168_v18, %v2172_v19  ;;  %v9338_v26 = vcombine.low %v2184_v14, %v2188_v15  ;;  %v9331_v29 = vcombine.high %v2176_v22, %v2180_v24  ;;  %v2252_v18 = vld [vmem:[#allocation9 + $0x660] sm:$0xff] }
 0x19d   : > { %9197 = vmatmul.mubr.msk.f32.gmra.mxu1 %vm1370_vm1, %v10984_v9  ;;  %9199 = vmatmul.mubr.msk.f32.gmra.mxu0 %vm1370_vm1, %v10984_v9 }
 0x19e   : > { %10127 = vmatprep.subr.mxu1 %v1103_v20  ;;  %10129 = vmatprep.mubr.msk.f32.mxu1 %vm1370_vm1, %v10975_v4  ;;  %v9355_v4 = vcombine.high %v2200_v61, %v2204_v62 }
 0x19f   : > { %10128 = vmatpush3.msra.mxu1 %v1103_v20  ;;  %7042 = vmatprep.subr.bf16.mxu0 %v9251_v33  ;;  %v9339_v20 = vcombine.high %v2184_v14, %v2188_v15  ;;  %v9315_v33 = vcombine.high %v2160_v27, %v2164_v28  ;;  %v9275_v14 = vcombine.high %v2120_v10, %v2124_v11 }
 0x1a0   : > { %7083 = vmatprep.subr.bf16.mxu1 %v9387_v34  ;;  %7043 = vmatpush1.bf16.msra.mxu0 %v9250_v35  ;;  %v9330_v34 = vcombine.low %v2176_v22, %v2180_v24  ;;  %v2152_v35 = vld [vmem:[#allocation9 + $0x340] sm:$0xff] }
 0x1a1   : > { %10130 = vmatmul.mubr.msk.f32.vlgmr.msra.gmra.mxu1 %vm1370_vm1, %v10984_v9  ;;  %7044 = vmatprep.subr.bf16.mxu0 %v9243_v38  ;;  %v9354_v9 = vcombine.low %v2200_v61, %v2204_v62  ;;  %v9314_v38 = vcombine.low %v2160_v27, %v2164_v28  ;;  %v9307_v41 = vcombine.high %v2152_v35, %v2156_v36  ;;  %v2264_v62 = vld [vmem:[#allocation9 + $0x6c0] sm:$0xff] }
 0x1a2   : > { %7084 = vmatpush1.bf16.msra.mxu1 %v9386_v39  ;;  %v2288_v39 = vld [vmem:[#allocation9 + $0x780] sm:$0xff] }
 0x1a3   : > { %7085 = vmatprep.subr.bf16.mxu1 %v9379_v42  ;;  %v9450_v42 = vcombine.low %v2296_v31, %v2300_v32  ;;  %v9443_v45 = vcombine.high %v2288_v39, %v2292_v40  ;;  %v2116_v27 = vld [vmem:[#allocation9 + $0x220] sm:$0xff] }
 0x1a4   : > { %7045 = vmatpush1.bf16.msra.mxu0 %v9242_v43  ;;  %v2144_v43 = vld [vmem:[#allocation9 + $0x300] sm:$0xff] }
 0x1a5   : > { %7046 = vmatprep.subr.bf16.mxu0 %v9235_v46  ;;  %v9306_v46 = vcombine.low %v2152_v35, %v2156_v36  ;;  %v9299_v49 = vcombine.high %v2144_v43, %v2148_v44  ;;  %v2240_v31 = vld [vmem:[#allocation9 + $0x600] sm:$0xff] }
 0x1a6   : > { %7086 = vmatpush1.bf16.msra.mxu1 %v9378_v47  ;;  %v2280_v47 = vld [vmem:[#allocation9 + $0x740] sm:$0xff] }
 0x1a7   : > { %7087 = vmatprep.subr.bf16.mxu1 %v9371_v50  ;;  %v9442_v50 = vcombine.low %v2288_v39, %v2292_v40  ;;  %v9435_v53 = vcombine.high %v2280_v47, %v2284_v48  ;;  %v2244_v32 = vld [vmem:[#allocation9 + $0x620] sm:$0xff] }
 0x1a8   : > { %7047 = vmatpush1.bf16.msra.mxu0 %v9234_v51  ;;  %v2136_v51 = vld [vmem:[#allocation9 + $0x2c0] sm:$0xff] }
 0x1a9   : > { %7048 = vmatprep.subr.bf16.mxu0 %v9227_v54  ;;  %v9298_v54 = vcombine.low %v2144_v43, %v2148_v44  ;;  %v9291_v58 = vcombine.high %v2136_v51, %v2140_v52  ;;  %v9290_v61 = vcombine.low %v2136_v51, %v2140_v52  ;;  %v11034_v35 = vld [vmem:[#allocation9 + $0x9e0] sm:$0xff]  ;;  %v11048_v44 = vld [vmem:[#allocation7 + $0x8] sm:$0x1f] }
 0x1aa   : > { %7088 = vmatpush1.bf16.msra.mxu1 %v9370_v55  ;;  %v2272_v55 = vld [vmem:[#allocation9 + $0x700] sm:$0xff] }
 0x1ab   : > { %7089 = vmatprep.subr.bf16.mxu1 %v9363_v59  ;;  %v9434_v59 = vcombine.low %v2280_v47, %v2284_v48  ;;  %v9426_v3 = vcombine.low %v2272_v55, %v2276_v57  ;;  %v11036_v36 = vld [vmem:[#allocation9 + $0xdc0] sm:$0xff]  ;;  %v1146_v47 = vpop.f32.mrf.mxu1 }
 0x1ac   : > { %7049 = vmatpush1.bf16.msra.mxu0 %v9226_v60  ;;  %v9427_v60 = vcombine.high %v2272_v55, %v2276_v57  ;;  %v11040_v39 = vld [vmem:[#allocation9 + $0xde0] sm:$0xff] }
 0x1ad   : > { %7050 = vmatprep.subr.bf16.mxu0 %v9219_v63  ;;  %v2268_v63 = vld [vmem:[#allocation9 + $0x6e0] sm:$0xff]  ;;  %v9643_v43 = vcombine.high %v11036_v36, %v11040_v39 }
 0x1ae   : > { %7090 = vmatpush1.bf16.msra.mxu1 %v9362_v1  ;;  %v2128_v1 = vld [vmem:[#allocation9 + $0x280] sm:$0xff] }
 0x1af   : > { %7091 = vmatprep.subr.bf16.mxu1 %v9355_v4  ;;  %v1918_v4 = vlaneseq  ;;  %v9283_v6 = vcombine.high %v2128_v1, %v2132_v2  ;;  %v9282_v7 = vcombine.low %v2128_v1, %v2132_v2 }
 0x1b0   : > { %7051 = vmatpush1.bf16.msra.mxu0 %v9218_v5  ;;  %v9419_v5 = vcombine.high %v2264_v62, %v2268_v63 }
 0x1b1   : > { %7052 = vmatprep.subr.bf16.mxu0 %v9211_v8  ;;  %v2256_v8 = vld [vmem:[#allocation9 + $0x680] sm:$0xff] }
 0x1b2   : > { %7092 = vmatpush1.bf16.msra.mxu1 %v9354_v9  ;;  %v2260_v9 = vld [vmem:[#allocation9 + $0x6a0] sm:$0xff] }
 0x1b3   : > { %7093 = vmatprep.subr.bf16.mxu1 %v9347_v12  ;;  %v9418_v12 = vcombine.low %v2264_v62, %v2268_v63  ;;  %v9411_v15 = vcombine.high %v2256_v8, %v2260_v9  ;;  %v9410_v22 = vcombine.low %v2256_v8, %v2260_v9 }
 0x1b4   : > { %7053 = vmatpush1.bf16.msra.mxu0 %v9210_v13  ;;  %v11020_v13 = vshrl.u32 %v1918_v4, 7 }
 0x1b5   : > { %7054 = vmatprep.subr.bf16.mxu0 %v9203_v16  ;;  %v9274_v16 = vcombine.low %v2120_v10, %v2124_v11 }
 0x1b6   : > { %7094 = vmatpush1.bf16.msra.mxu1 %v9346_v17  ;;  %v2248_v17 = vld [vmem:[#allocation9 + $0x640] sm:$0xff]  ;;  %v1936_v19 = vsub.s32 4, %v11020_v13  ;;  %v11090_v9 = vsub.s32 1, %v11020_v13  ;;  %v11093_v10 = vsub.s32 3, %v11020_v13  ;;  %v1948_v0 = vsub.s32 7, %v11020_v13 }
 0x1b7   : > { %7095 = vmatprep.subr.bf16.mxu1 %v9339_v20  ;;  %v1944_v20 = vsub.s32 6, %v11020_v13  ;;  %v9403_v28 = vcombine.high %v2248_v17, %v2252_v18 }
 0x1b8   : > { %7055 = vmatpush1.bf16.msra.mxu0 %v9202_v21  ;;  %v11024_v21 = vld [vmem:[#allocation7] sm:$0xff]  ;;  %11525 = vst [vmem:[#allocation21_spill] sm:$0xff] %v11090_v9  ;;  %11526 = vst [vmem:[#allocation22_spill] sm:$0xff] %v11093_v10 }
 0x1b9   : > { %7056 = vmatprep.subr.bf16.mxu0 %v9323_v25  ;;  %v11027_v24 = vrot.slane %v11024_v21, %v1936_v19  ;;  %v11030_v25 = vrot.slane %v11024_v21, %v1944_v20 }
 0x1ba   : > { %7096 = vmatpush1.bf16.msra.mxu1 %v9338_v26  ;;  %v2112_v26 = vld [vmem:[#allocation9 + $0x200] sm:$0xff] }
 0x1bb   : > { %7097 = vmatprep.subr.bf16.mxu1 %v9331_v29  ;;  %v9267_v29 = vcombine.high %v2112_v26, %v2116_v27 }
 0x1bc   : > { %7057 = vmatpush2.bf16.msra.mxu0 %v9322_v30  ;;  %v9266_v30 = vcombine.low %v2112_v26, %v2116_v27 }
 0x1bd   : > { %7058 = vmatprep.subr.bf16.mxu0 %v9315_v33  ;;  %v9402_v33 = vcombine.low %v2248_v17, %v2252_v18 }
 0x1be   : > { %7098 = vmatpush1.bf16.msra.mxu1 %v9330_v34  ;;  %v11032_v34 = vld [vmem:[#allocation9 + $0x9c0] sm:$0xff] }
 0x1bf   : > { %7099 = vmatprep.subr.bf16.mxu1 %v9451_v37  ;;  %v9395_v37 = vcombine.high %v2240_v31, %v2244_v32 }
 0x1c0   : > { %7059 = vmatpush2.bf16.msra.mxu0 %v9314_v38  ;;  %v9515_v38 = vcombine.high %v11032_v34, %v11034_v35 }
 0x1c1   : > { %7060 = vmatprep.subr.bf16.mxu0 %v9307_v41 }
 0x1c2   : > { %7100 = vmatpush2.bf16.msra.mxu1 %v9450_v42  ;;  %v9394_v42 = vcombine.low %v2240_v31, %v2244_v32 }
 0x1c3   : > { %7101 = vmatprep.subr.bf16.mxu1 %v9443_v45  ;;  %v11051_v45 = vrot.slane %v11048_v44, %v1936_v19  ;;  %v1925_v19 = vrot.slane %v11024_v21, %v11090_v9 }
 0x1c4   : > { %7061 = vmatpush2.bf16.msra.mxu0 %v9306_v46  ;;  %v1109_v46 = vpop.f32.mrf.mxu0 }
 0x1c5   : > { %7062 = vmatprep.subr.bf16.mxu0 %v9299_v49  ;;  %v1148_v49 = vpop.f32.mrf.mxu1 }
 0x1c6   : > { %7102 = vmatpush2.bf16.msra.mxu1 %v9442_v50  ;;  %v1189_v48 = vpop.f32.mrf.mxu0 }
 0x1c7   : > { %7103 = vmatprep.subr.bf16.mxu1 %v9435_v53  ;;  %v1150_v51 = vpop.f32.mrf.mxu1 }
 0x1c8   : > { %7063 = vmatpush2.bf16.msra.mxu0 %v9298_v54  ;;  %v11053_v50 = vpop.f32.mrf.mxu0 }
 0x1c9   : > { %7064 = vmatprep.subr.bf16.mxu0 %v9291_v58  ;;  %v1152_v53 = vpop.f32.mrf.mxu1 }
 0x1ca   : > { %7104 = vmatpush2.bf16.msra.mxu1 %v9434_v59  ;;  %v1193_v52 = vpop.f32.mrf.mxu0 }
 0x1cb   : > { %7105 = vmatprep.subr.bf16.mxu1 %v9427_v60  ;;  %v11057_v55 = vpop.f32.mrf.mxu1 }
 0x1cc   : > { %7065 = vmatpush2.bf16.msra.mxu0 %v9290_v61  ;;  %v11055_v54 = vpop.f32.mrf.mxu0 }
 0x1cd   : > { %7066 = vmatprep.subr.bf16.mxu0 %v9283_v6  ;;  %v11061_v58 = vpop.f32.mrf.mxu1 }
 0x1ce   : > { %7106 = vmatpush2.bf16.msra.mxu1 %v9426_v3  ;;  %v11059_v57 = vpop.f32.mrf.mxu0 }
 0x1cf   : > { %7107 = vmatprep.subr.bf16.mxu1 %v9419_v5  ;;  %v11065_v60 = vpop.f32.mrf.mxu1 }
 0x1d0   : > { %7067 = vmatpush2.bf16.msra.mxu0 %v9282_v7  ;;  %v11063_v59 = vpop.f32.mrf.mxu0 }
 0x1d1   : > { %7068 = vmatprep.subr.bf16.mxu0 %v9275_v14  ;;  %v11069_v62 = vpop.f32.mrf.mxu1 }
 0x1d2   : > { %7108 = vmatpush2.bf16.msra.mxu1 %v9418_v12  ;;  %v11067_v61 = vpop.f32.mrf.mxu0  ;;  %v11096_v12 = vsub.s32 0, %v11020_v13 }
 0x1d3   : > { %7109 = vmatprep.subr.bf16.mxu1 %v9411_v15  ;;  %v11073_v1 = vpop.f32.mrf.mxu1  ;;  %v11099_v15 = vsub.s32 2, %v11020_v13 }
 0x1d4   : > { %7069 = vmatpush2.bf16.msra.mxu0 %v9274_v16  ;;  %v11071_v63 = vpop.f32.mrf.mxu0  ;;  %11527 = vst [vmem:[#allocation23_spill] sm:$0xff] %v11096_v12  ;;  %v1921_v27 = vrot.slane %v11024_v21, %v11096_v12 }
 0x1d5   : > { %7070 = vmatprep.subr.bf16.mxu0 %v9267_v29  ;;  %v11077_v3 = vpop.f32.mrf.mxu1  ;;  %11528 = vst [vmem:[#allocation24_spill] sm:$0xff] %v11099_v15  ;;  %v1929_v29 = vrot.slane %v11024_v21, %v11099_v15 }
 0x1d6   : > { %7110 = vmatpush2.bf16.msra.mxu1 %v9410_v22  ;;  %v11075_v2 = vpop.f32.mrf.mxu0  ;;  %v1933_v22 = vrot.slane %v11024_v21, %v11093_v10 }
 0x1d7   : > { %7111 = vmatprep.subr.bf16.mxu1 %v9403_v28  ;;  %v11081_v5 = vpop.f32.mrf.mxu1 }
 0x1d8   : > { %7071 = vmatpush2.bf16.msra.mxu0 %v9266_v30  ;;  %v11079_v4 = vpop.f32.mrf.mxu0 }
 0x1d9   : > { %7126 = vmatprep.subr.bf16.mxu0 %v9515_v38  ;;  %v11085_v7 = vpop.f32.mrf.mxu1 }
 0x1da   : > { %7112 = vmatpush2.bf16.msra.mxu1 %v9402_v33  ;;  %v11083_v6 = vpop.f32.mrf.mxu0 }
 0x1db   : > { %7113 = vmatprep.subr.bf16.mxu1 %v9395_v37 }
 0x1dc   : > { %v11087_v8 = vpop.f32.mrf.mxu0 }
 0x1de   : > { %7114 = vmatpush2.bf16.msra.mxu1 %v9394_v42  ;;  %v1940_v42 = vsub.s32 5, %v11020_v13  ;;  %v2480_v13 = vld [vmem:[#allocation9 + $0xd80] sm:$0xff] }
 0x1df   : > { %7169 = vmatprep.subr.bf16.mxu1 %v9643_v43 }
 0x247   : > { %v1443_v11 = vpop.f32.mrf.mxu1  ;;  %v1520_v14 = vpop.f32.mrf.mxu0 }
 0x248   : > { %v1444_v26 = vadd.f32 %v1443_v11, %v11002_v23  ;;  %v1521_v28 = vadd.f32 %v1520_v14, %v1148_v49 }
 0x249   : > { %v1445_v16 = vpop.f32.mrf.mxu1  ;;  %v1522_v17 = vpop.f32.mrf.mxu0 }
 0x24a   : > { %v1446_v18 = vadd.f32 %v1445_v16, %v1146_v47  ;;  %v1523_v20 = vadd.f32 %v1522_v17, %v1189_v48  ;;  %v1983_v23 = vadd.f32 %v1921_v27, %v1444_v26  ;;  %v1985_v11 = vadd.f32 %v1929_v29, %v1521_v28 }
 0x24b   : > { %v1449_v30 = vpop.f32.mrf.mxu1  ;;  %v1526_v31 = vpop.f32.mrf.mxu0 }
 0x24c   : > { %v1450_v32 = vadd.f32 %v1449_v30, %v1109_v46  ;;  %v1527_v33 = vadd.f32 %v1526_v31, %v1152_v53  ;;  %v1984_v43 = vadd.f32 %v1925_v19, %v1446_v18  ;;  %v1986_v47 = vadd.f32 %v1933_v22, %v1523_v20  ;;  %v11116_v30 = vld [vmem:[#allocation9 + $0x980] sm:$0xff] }
 0x24d   : > { %v1451_v37 = vpop.f32.mrf.mxu1  ;;  %v1528_v38 = vpop.f32.mrf.mxu0  ;;  %v2356_v18 = vld [vmem:[#allocation9 + $0x9a0] sm:$0xff]  ;;  %v2009_v28 = vmax.f32 %v1983_v23, 0.0 }
 0x24e   : > { %v1452_v48 = vadd.f32 %v1451_v37, %v1150_v51  ;;  %v1529_v16 = vadd.f32 %v1528_v38, %v1193_v52  ;;  %v1996_v17 = vadd.f32 %v1921_v27, %v1450_v32  ;;  %v1998_v56 = vadd.f32 %v1929_v29, %v1527_v33  ;;  %v2484_v31 = vld [vmem:[#allocation9 + $0xda0] sm:$0xff] }
 0x24f   : > { %v2010_v20 = vmax.f32 %v1984_v43, 0.0  ;;  %v2012_v51 = vmax.f32 %v1986_v47, 0.0  ;;  %v2011_v27 = vmax.f32 %v1985_v11, 0.0  ;;  %v1949_v33 = vrot.slane %v11024_v21, %v1948_v0 }
 0x250   : > { %v1997_v49 = vadd.f32 %v1925_v19, %v1452_v48  ;;  %v1999_v14 = vadd.f32 %v1933_v22, %v1529_v16  ;;  %v2022_v41 = vmax.f32 %v1996_v17, 0.0  ;;  %v2024_v40 = vmax.f32 %v1998_v56, 0.0 }
 0x251   : > { %v11112_v46 = vpop.f32.mrf.mxu1  ;;  %v11114_v53 = vpop.f32.mrf.mxu0  ;;  %v1941_v19 = vrot.slane %v11024_v21, %v1940_v42  ;;  %v9507_v37 = vcombine.high %v11116_v30, %v2356_v18  ;;  %v9635_v23 = vcombine.high %v2480_v13, %v2484_v31 }
 0x252   : > { %v2023_v52 = vmax.f32 %v1997_v49, 0.0  ;;  %v2025_v26 = vmax.f32 %v1999_v14, 0.0  ;;  %v11125_v38 = vpack.c.bf16 %v2022_v41, %v2009_v28  ;;  %v11127_v43 = vpack.c.bf16 %v2024_v40, %v2011_v27  ;;  %v2344_v41 = vld [vmem:[#allocation9 + $0x940] sm:$0xff] }
 0x253   : > { %v1599_v29 = vpop.f32.mrf.mxu1  ;;  %v1676_v22 = vpop.f32.mrf.mxu0  ;;  %v9506_v40 = vcombine.low %v11116_v30, %v2356_v18  ;;  %v11529_v14 = vcombine.low %v11032_v34, %v11034_v35  ;;  %v1961_v30 = vrot.slane %v11048_v44, %v11099_v15  ;;  %v11530_v18 = vcombine.low %v11036_v36, %v11040_v39  ;;  %v2336_v35 = vld [vmem:[#allocation9 + $0x900] sm:$0xff]  ;;  %v2879_v15 = vld [vmem:[#allocation9 + $0x19f8] sm:$0xff] }
 0x254   : > { %v11119_v56 = vpack.c.bf16 %v2023_v52, %v2010_v20  ;;  %v11121_v32 = vpack.c.bf16 %v2025_v26, %v2012_v51  ;;  %v1600_v47 = vadd.f32 %v1599_v29, %v11057_v55  ;;  %v1677_v48 = vadd.f32 %v1676_v22, %v11059_v57  ;;  %v2348_v55 = vld [vmem:[#allocation9 + $0x960] sm:$0xff] }
 0x255   : > { %v11131_v42 = vpop.f32.mrf.mxu1  ;;  %v11133_v16 = vpop.f32.mrf.mxu0  ;;  %v2472_v20 = vld [vmem:[#allocation9 + $0xd40] sm:$0xff]  ;;  %v1953_v26 = vrot.slane %v11048_v44, %v11096_v12  ;;  %v9499_v34 = vcombine.high %v2344_v41, %v2348_v55  ;;  %v2871_v12 = vld [vmem:[#allocation9 + $0x19b8] sm:$0xff] }
 0x256   : > { %7072 = vmatprep.mubr.bf16.mxu0 %v11119_v56  ;;  %7115 = vmatprep.mubr.bf16.mxu1 %v11121_v32  ;;  %v1988_v57 = vadd.f32 %v1941_v19, %v1600_v47  ;;  %v1990_v11 = vadd.f32 %v1949_v33, %v1677_v48  ;;  %v2476_v51 = vld [vmem:[#allocation9 + $0xd60] sm:$0xff] }
 0x257   : > { %v1605_v0 = vpop.f32.mrf.mxu1  ;;  %v1682_v21 = vpop.f32.mrf.mxu0  ;;  %7073 = vmatmul.mubr.bf16.vlgmr.msra.gmra.mxu0 %v11125_v38  ;;  %7116 = vmatmul.mubr.bf16.vlgmr.msra.gmra.mxu1 %v11127_v43  ;;  %v2340_v29 = vld [vmem:[#allocation9 + $0x920] sm:$0xff] }
 0x258   : > { %v1606_v17 = vadd.f32 %v1605_v0, %v11065_v60  ;;  %v1683_v49 = vadd.f32 %v1682_v21, %v11067_v61  ;;  %7127 = vmatpush1.bf16.msra.mxu0 %v11529_v14  ;;  %7170 = vmatpush1.bf16.msra.mxu1 %v11530_v18  ;;  %v9634_v60 = vcombine.low %v2480_v13, %v2484_v31  ;;  %v2014_v36 = vmax.f32 %v1988_v57, 0.0  ;;  %v2468_v31 = vld [vmem:[#allocation9 + $0xd20] sm:$0xff] }
 0x259   : > { %v1751_v52 = vpop.f32.mrf.mxu1  ;;  %v1828_v28 = vpop.f32.mrf.mxu0  ;;  %7128 = vmatprep.subr.bf16.mxu0 %v9507_v37  ;;  %7171 = vmatprep.subr.bf16.mxu1 %v9635_v23  ;;  %v9498_v21 = vcombine.low %v2344_v41, %v2348_v55  ;;  %v9627_v14 = vcombine.high %v2472_v20, %v2476_v51  ;;  %v2016_v39 = vmax.f32 %v1990_v11, 0.0  ;;  %v2328_v57 = vld [vmem:[#allocation9 + $0x8c0] sm:$0xff] }
 0x25a   : > { %v2001_v61 = vadd.f32 %v1941_v19, %v1606_v17  ;;  %v2003_v27 = vadd.f32 %v1949_v33, %v1683_v49  ;;  %v1752_v22 = vadd.f32 %v1751_v52, %v11063_v59  ;;  %v1829_v47 = vadd.f32 %v1828_v28, %v11077_v3  ;;  %v2464_v19 = vld [vmem:[#allocation9 + $0xd00] sm:$0xff] }
 0x25b   : > { %v11154_v48 = vpop.f32.mrf.mxu1  ;;  %v11156_v0 = vpop.f32.mrf.mxu0  ;;  %v9626_v59 = vcombine.low %v2472_v20, %v2476_v51  ;;  %v9491_v3 = vcombine.high %v2336_v35, %v2340_v29  ;;  %v9619_v18 = vcombine.high %v2464_v19, %v2468_v31  ;;  %v2456_v20 = vld [vmem:[#allocation9 + $0xcc0] sm:$0xff] }
 0x25c   : > { %v2027_v37 = vmax.f32 %v2001_v61, 0.0  ;;  %v2029_v13 = vmax.f32 %v2003_v27, 0.0  ;;  %7129 = vmatpush1.bf16.msra.mxu0 %v9506_v40  ;;  %v1991_v33 = vadd.f32 %v1953_v26, %v1752_v22  ;;  %v1993_v23 = vadd.f32 %v1961_v30, %v1829_v47  ;;  %7172 = vmatpush1.bf16.msra.mxu1 %v9634_v60  ;;  %v2332_v40 = vld [vmem:[#allocation9 + $0x8e0] sm:$0xff] }
 0x25d   : > { %v1757_v17 = vpop.f32.mrf.mxu1  ;;  %v1834_v49 = vpop.f32.mrf.mxu0  ;;  %7130 = vmatprep.subr.bf16.mxu0 %v9499_v34  ;;  %7173 = vmatprep.subr.bf16.mxu1 %v9627_v14  ;;  %v2460_v51 = vld [vmem:[#allocation9 + $0xce0] sm:$0xff]  ;;  %v9618_v22 = vcombine.low %v2464_v19, %v2468_v31  ;;  %v9482_v31 = vcombine.low %v2328_v57, %v2332_v40 }
 0x25e   : > { %v11158_v52 = vpack.c.bf16 %v2027_v37, %v2014_v36  ;;  %v11160_v28 = vpack.c.bf16 %v2029_v13, %v2016_v39  ;;  %v1758_v41 = vadd.f32 %v1757_v17, %v11071_v63  ;;  %v1835_v55 = vadd.f32 %v1834_v49, %v11085_v7  ;;  %v2320_v37 = vld [vmem:[#allocation9 + $0x880] sm:$0xff] }
 0x25f   : > { %v11164_v11 = vpop.f32.mrf.mxu1  ;;  %v9490_v63 = vcombine.low %v2336_v35, %v2340_v29  ;;  %v9483_v7 = vcombine.high %v2328_v57, %v2332_v40  ;;  %v2017_v34 = vmax.f32 %v1991_v33, 0.0  ;;  %v2019_v47 = vmax.f32 %v1993_v23, 0.0  ;;  %v2324_v13 = vld [vmem:[#allocation9 + $0x8a0] sm:$0xff] }
 0x260   : > { %v2004_v61 = vadd.f32 %v1953_v26, %v1758_v41  ;;  %v2006_v27 = vadd.f32 %v1961_v30, %v1835_v55  ;;  %7158 = vmatprep.mubr.bf16.mxu0 %v11158_v52  ;;  %7201 = vmatprep.mubr.bf16.mxu1 %v11160_v28  ;;  %v9611_v14 = vcombine.high %v2456_v20, %v2460_v51  ;;  %v2448_v35 = vld [vmem:[#allocation9 + $0xc80] sm:$0xff] }
 0x261   : > { %v10131_v60 = vpop.f32.mrf.mxu1  ;;  %7131 = vmatpush1.bf16.msra.mxu0 %v9498_v21  ;;  %7174 = vmatpush1.bf16.msra.mxu1 %v9626_v59  ;;  %v2452_v29 = vld [vmem:[#allocation9 + $0xca0] sm:$0xff]  ;;  %v9475_v33 = vcombine.high %v2320_v37, %v2324_v13 }
 0x262   : > { %v2030_v36 = vmax.f32 %v2004_v61, 0.0  ;;  %v2032_v39 = vmax.f32 %v2006_v27, 0.0  ;;  %7132 = vmatprep.subr.bf16.mxu0 %v9491_v3  ;;  %v1911_v26 = vadd.f32 %v10131_v60, %v11087_v8  ;;  %7175 = vmatprep.subr.bf16.mxu1 %v9619_v18  ;;  %v9610_v8 = vcombine.low %v2456_v20, %v2460_v51  ;;  %v2312_v3 = vld [vmem:[#allocation9 + $0x840] sm:$0xff] }
 0x263   : > { %v1905_v30 = vpop.f32.mrf.mxu1  ;;  %v9603_v59 = vcombine.high %v2448_v35, %v2452_v29  ;;  %v2316_v41 = vld [vmem:[#allocation9 + $0x860] sm:$0xff]  ;;  %v9474_v60 = vcombine.low %v2320_v37, %v2324_v13 }
 0x264   : > { %v11169_v17 = vpack.c.bf16 %v2030_v36, %v2017_v34  ;;  %v11171_v49 = vpack.c.bf16 %v2032_v39, %v2019_v47  ;;  %v2008_v21 = vadd.f32 %v11051_v45, %v1911_v26  ;;  %v1906_v19 = vadd.f32 %v1905_v30, %v11079_v4  ;;  %v2440_v55 = vld [vmem:[#allocation9 + $0xc40] sm:$0xff] }
 0x265   : > { %7133 = vmatpush1.bf16.msra.mxu0 %v9490_v63  ;;  %7176 = vmatpush1.bf16.msra.mxu1 %v9618_v22  ;;  %v2444_v18 = vld [vmem:[#allocation9 + $0xc60] sm:$0xff]  ;;  %v9602_v4 = vcombine.low %v2448_v35, %v2452_v29  ;;  %v9467_v57 = vcombine.high %v2312_v3, %v2316_v41 }
 0x266   : > { %11531 = vst [vmem:[#allocation25_spill] sm:$0xff] %v11171_v49  ;;  %7134 = vmatprep.subr.bf16.mxu0 %v9483_v7  ;;  %v1995_v23 = vadd.f32 %v11051_v45, %v1906_v19  ;;  %7177 = vmatprep.subr.bf16.mxu1 %v9611_v14  ;;  %v2034_v61 = vmax.f32 %v2008_v21, 0.0  ;;  %v9595_v20 = vcombine.high %v2440_v55, %v2444_v18  ;;  %v2304_v51 = vld [vmem:[#allocation9 + $0x800] sm:$0xff] }
 0x267   : > { %v2308_v45 = vld [vmem:[#allocation9 + $0x820] sm:$0xff]  ;;  %v9466_v7 = vcombine.low %v2312_v3, %v2316_v41  ;;  %v9594_v34 = vcombine.low %v2440_v55, %v2444_v18 }
 0x268   : > { %v2021_v27 = vmax.f32 %v1995_v23, 0.0  ;;  %v2432_v63 = vld [vmem:[#allocation9 + $0xc00] sm:$0xff]  ;;  %v9459_v47 = vcombine.high %v2304_v51, %v2308_v45  ;;  %v9458_v37 = vcombine.low %v2304_v51, %v2308_v45 }
 0x269   : > { %7135 = vmatpush1.bf16.msra.mxu0 %v9482_v31  ;;  %7178 = vmatpush1.bf16.msra.mxu1 %v9610_v8  ;;  %v2436_v22 = vld [vmem:[#allocation9 + $0xc20] sm:$0xff] }
 0x26a   : > { %7136 = vmatprep.subr.bf16.mxu0 %v9475_v33  ;;  %v11176_v40 = vpack.c.bf16 %v2034_v61, %v2021_v27  ;;  %7179 = vmatprep.subr.bf16.mxu1 %v9603_v59  ;;  %v9587_v36 = vcombine.high %v2432_v63, %v2436_v22  ;;  %v2424_v39 = vld [vmem:[#allocation9 + $0xbc0] sm:$0xff]  ;;  %v9586_v13 = vcombine.low %v2432_v63, %v2436_v22 }
 0x26b   : > { %v2428_v26 = vld [vmem:[#allocation9 + $0xbe0] sm:$0xff] }
 0x26c   : > { %11532 = vst [vmem:[#allocation26_spill] sm:$0xff] %v11176_v40  ;;  %v2552_v30 = vld [vmem:[#allocation9 + $0xfc0] sm:$0xff]  ;;  %v9579_v35 = vcombine.high %v2424_v39, %v2428_v26  ;;  %v9578_v33 = vcombine.low %v2424_v39, %v2428_v26 }
 0x26d   : > { %7137 = vmatpush1.bf16.msra.mxu0 %v9474_v60  ;;  %7180 = vmatpush1.bf16.msra.mxu1 %v9602_v4  ;;  %v2556_v14 = vld [vmem:[#allocation9 + $0xfe0] sm:$0xff] }
 0x26e   : > { %7138 = vmatprep.subr.bf16.mxu0 %v9467_v57  ;;  %7181 = vmatprep.subr.bf16.mxu1 %v9595_v20  ;;  %v9707_v29 = vcombine.high %v2552_v30, %v2556_v14  ;;  %v2416_v21 = vld [vmem:[#allocation9 + $0xb80] sm:$0xff]  ;;  %v9706_v23 = vcombine.low %v2552_v30, %v2556_v14 }
 0x26f   : > { %v2420_v19 = vld [vmem:[#allocation9 + $0xba0] sm:$0xff] }
 0x270   : > { %v2544_v31 = vld [vmem:[#allocation9 + $0xf80] sm:$0xff]  ;;  %v9571_v59 = vcombine.high %v2416_v21, %v2420_v19  ;;  %v9570_v27 = vcombine.low %v2416_v21, %v2420_v19 }
 0x271   : > { %7139 = vmatpush1.bf16.msra.mxu0 %v9466_v7  ;;  %7182 = vmatpush1.bf16.msra.mxu1 %v9594_v34  ;;  %v2548_v8 = vld [vmem:[#allocation9 + $0xfa0] sm:$0xff] }
 0x272   : > { %7140 = vmatprep.subr.bf16.mxu0 %v9459_v47  ;;  %7183 = vmatprep.subr.bf16.mxu1 %v9587_v36  ;;  %v9699_v3 = vcombine.high %v2544_v31, %v2548_v8  ;;  %v2408_v41 = vld [vmem:[#allocation9 + $0xb40] sm:$0xff]  ;;  %v9698_v60 = vcombine.low %v2544_v31, %v2548_v8 }
 0x273   : > { %v2412_v55 = vld [vmem:[#allocation9 + $0xb60] sm:$0xff] }
 0x274   : > { %v2536_v18 = vld [vmem:[#allocation9 + $0xf40] sm:$0xff]  ;;  %v9563_v4 = vcombine.high %v2408_v41, %v2412_v55  ;;  %v9562_v22 = vcombine.low %v2408_v41, %v2412_v55 }
 0x275   : > { %7141 = vmatpush1.bf16.msra.mxu0 %v9458_v37  ;;  %7184 = vmatpush1.bf16.msra.mxu1 %v9586_v13  ;;  %v2540_v61 = vld [vmem:[#allocation9 + $0xf60] sm:$0xff] }
 0x276   : > { %7142 = vmatprep.subr.bf16.mxu0 %v9579_v35  ;;  %7185 = vmatprep.subr.bf16.mxu1 %v9707_v29  ;;  %v9691_v57 = vcombine.high %v2536_v18, %v2540_v61  ;;  %v2400_v20 = vld [vmem:[#allocation9 + $0xb00] sm:$0xff]  ;;  %v9690_v7 = vcombine.low %v2536_v18, %v2540_v61 }
 0x277   : > { %v2404_v51 = vld [vmem:[#allocation9 + $0xb20] sm:$0xff] }
 0x278   : > { %v2528_v45 = vld [vmem:[#allocation9 + $0xf00] sm:$0xff]  ;;  %v9555_v34 = vcombine.high %v2400_v20, %v2404_v51  ;;  %v9554_v14 = vcombine.low %v2400_v20, %v2404_v51  ;;  %v1681_v20 = vadd.f32 %v11133_v16, %v11069_v62 }
 0x279   : > { %7143 = vmatpush2.bf16.msra.mxu0 %v9578_v33  ;;  %7186 = vmatpush2.bf16.msra.mxu1 %v9706_v23  ;;  %v2532_v63 = vld [vmem:[#allocation9 + $0xf20] sm:$0xff] }
 0x27a   : > { %7144 = vmatprep.subr.bf16.mxu0 %v9571_v59  ;;  %7187 = vmatprep.subr.bf16.mxu1 %v9699_v3  ;;  %v9683_v47 = vcombine.high %v2528_v45, %v2532_v63  ;;  %v2392_v36 = vld [vmem:[#allocation9 + $0xac0] sm:$0xff]  ;;  %v9682_v37 = vcombine.low %v2528_v45, %v2532_v63 }
 0x27b   : > { %v2396_v39 = vld [vmem:[#allocation9 + $0xae0] sm:$0xff] }
 0x27c   : > { %v2520_v26 = vld [vmem:[#allocation9 + $0xec0] sm:$0xff]  ;;  %v9547_v13 = vcombine.high %v2392_v36, %v2396_v39  ;;  %v9546_v8 = vcombine.low %v2392_v36, %v2396_v39 }
 0x27d   : > { %7145 = vmatpush2.bf16.msra.mxu0 %v9570_v27  ;;  %7188 = vmatpush2.bf16.msra.mxu1 %v9698_v60  ;;  %v2524_v30 = vld [vmem:[#allocation9 + $0xee0] sm:$0xff]  ;;  %v1604_v27 = vadd.f32 %v11131_v42, %v11055_v54  ;;  %v1836_v60 = vpop.f32.mrf.mxu0  ;;  %v1760_v54 = vadd.f32 %v11164_v11, %v11081_v5  ;;  %v2002_v5 = vadd.f32 %v11030_v25, %v1681_v20 }
 0x27e   : > { %7146 = vmatprep.subr.bf16.mxu0 %v9563_v4  ;;  %7189 = vmatprep.subr.bf16.mxu1 %v9691_v57  ;;  %v9675_v35 = vcombine.high %v2520_v26, %v2524_v30  ;;  %v2384_v29 = vld [vmem:[#allocation9 + $0xa80] sm:$0xff]  ;;  %v9674_v33 = vcombine.low %v2520_v26, %v2524_v30  ;;  %v1837_v62 = vadd.f32 %v1836_v60, %v11083_v6 }
 0x27f   : > { %v2388_v21 = vld [vmem:[#allocation9 + $0xaa0] sm:$0xff]  ;;  %v2000_v39 = vadd.f32 %v11027_v24, %v1604_v27  ;;  %v1831_v11 = vadd.f32 %v11156_v0, %v11075_v2  ;;  %v2028_v0 = vmax.f32 %v2002_v5, 0.0 }
 0x280   : > { %v2512_v19 = vld [vmem:[#allocation9 + $0xe80] sm:$0xff]  ;;  %v9539_v23 = vcombine.high %v2384_v29, %v2388_v21  ;;  %v9538_v61 = vcombine.low %v2384_v29, %v2388_v21 }
 0x281   : > { %7147 = vmatpush2.bf16.msra.mxu0 %v9562_v22  ;;  %7190 = vmatpush2.bf16.msra.mxu1 %v9690_v7  ;;  %v2516_v31 = vld [vmem:[#allocation9 + $0xea0] sm:$0xff]  ;;  %v1598_v22 = vadd.f32 %v11112_v46, %v11053_v50  ;;  %v1957_v7 = vrot.slane %v11048_v44, %v11090_v9  ;;  %v1754_v50 = vadd.f32 %v11154_v48, %v11073_v1  ;;  %v2026_v29 = vmax.f32 %v2000_v39, 0.0 }
 0x282   : > { %7148 = vmatprep.subr.bf16.mxu0 %v9555_v34  ;;  %7191 = vmatprep.subr.bf16.mxu1 %v9683_v47  ;;  %v9667_v59 = vcombine.high %v2512_v19, %v2516_v31  ;;  %v2376_v3 = vld [vmem:[#allocation9 + $0xa40] sm:$0xff]  ;;  %v9666_v4 = vcombine.low %v2512_v19, %v2516_v31  ;;  %v1675_v47 = vadd.f32 %v11114_v53, %v11061_v58 }
 0x283   : > { %v2380_v41 = vld [vmem:[#allocation9 + $0xa60] sm:$0xff]  ;;  %v1965_v58 = vrot.slane %v11048_v44, %v11093_v10  ;;  %v1987_v30 = vadd.f32 %v11027_v24, %v1598_v22  ;;  %v1992_v21 = vadd.f32 %v1957_v7, %v1754_v50 }
 0x284   : > { %v2504_v55 = vld [vmem:[#allocation9 + $0xe40] sm:$0xff]  ;;  %v9531_v57 = vcombine.high %v2376_v3, %v2380_v41  ;;  %v9530_v16 = vcombine.low %v2376_v3, %v2380_v41  ;;  %v1989_v48 = vadd.f32 %v11030_v25, %v1675_v47 }
 0x285   : > { %7149 = vmatpush2.bf16.msra.mxu0 %v9554_v14  ;;  %7192 = vmatpush2.bf16.msra.mxu1 %v9682_v37  ;;  %v2508_v18 = vld [vmem:[#allocation9 + $0xe60] sm:$0xff]  ;;  %v2005_v14 = vadd.f32 %v1957_v7, %v1760_v54  ;;  %v1994_v19 = vadd.f32 %v1965_v58, %v1831_v11 }
 0x286   : > { %7150 = vmatprep.subr.bf16.mxu0 %v9547_v13  ;;  %7193 = vmatprep.subr.bf16.mxu1 %v9675_v35  ;;  %v9659_v51 = vcombine.high %v2504_v55, %v2508_v18  ;;  %v2368_v45 = vld [vmem:[#allocation9 + $0xa00] sm:$0xff]  ;;  %v9658_v36 = vcombine.low %v2504_v55, %v2508_v18  ;;  %v2007_v13 = vadd.f32 %v1965_v58, %v1837_v62 }
 0x287   : > { %v2372_v63 = vld [vmem:[#allocation9 + $0xa20] sm:$0xff]  ;;  %v2031_v24 = vmax.f32 %v2005_v14, 0.0 }
 0x288   : > { %v2496_v42 = vld [vmem:[#allocation9 + $0xe00] sm:$0xff]  ;;  %v9523_v46 = vcombine.high %v2368_v45, %v2372_v63  ;;  %v9522_v35 = vcombine.low %v2368_v45, %v2372_v63  ;;  %v2033_v3 = vmax.f32 %v2007_v13, 0.0 }
 0x289   : > { %7151 = vmatpush2.bf16.msra.mxu0 %v9546_v8  ;;  %7194 = vmatpush2.bf16.msra.mxu1 %v9674_v33  ;;  %v2500_v34 = vld [vmem:[#allocation9 + $0xe20] sm:$0xff]  ;;  %v2013_v8 = vmax.f32 %v1987_v30, 0.0 }
 0x28a   : > { %7152 = vmatprep.subr.bf16.mxu0 %v9539_v23  ;;  %7195 = vmatprep.subr.bf16.mxu1 %v9667_v59  ;;  %v9651_v6 = vcombine.high %v2496_v42, %v2500_v34  ;;  %v2616_v53 = vld [vmem:[#allocation9 + $0x11c0] sm:$0xff]  ;;  %v9650_v2 = vcombine.low %v2496_v42, %v2500_v34  ;;  %v2015_v59 = vmax.f32 %v1989_v48, 0.0 }
 0x28b   : > { %v2620_v26 = vld [vmem:[#allocation9 + $0x11e0] sm:$0xff]  ;;  %v11201_v18 = vpack.c.bf16 %v2026_v29, %v2013_v8 }
 0x28c   : > { %v2744_v37 = vld [vmem:[#allocation9 + $0x15c0] sm:$0xff]  ;;  %v9771_v44 = vcombine.high %v2616_v53, %v2620_v26  ;;  %v9770_v25 = vcombine.low %v2616_v53, %v2620_v26  ;;  %v11203_v60 = vpack.c.bf16 %v2028_v0, %v2015_v59 }
 0x28d   : > { %7153 = vmatpush2.bf16.msra.mxu0 %v9538_v61  ;;  %7196 = vmatpush2.bf16.msra.mxu1 %v9666_v4  ;;  %v2748_v1 = vld [vmem:[#allocation9 + $0x15e0] sm:$0xff]  ;;  %v2018_v61 = vmax.f32 %v1992_v21, 0.0  ;;  %v2020_v4 = vmax.f32 %v1994_v19, 0.0 }
 0x28e   : > { %7154 = vmatprep.subr.bf16.mxu0 %v9531_v57  ;;  %7197 = vmatprep.subr.bf16.mxu1 %v9659_v51  ;;  %v9899_v31 = vcombine.high %v2744_v37, %v2748_v1  ;;  %v2608_v33 = vld [vmem:[#allocation9 + $0x1180] sm:$0xff]  ;;  %v9898_v27 = vcombine.low %v2744_v37, %v2748_v1 }
 0x28f   : > { %v2612_v23 = vld [vmem:[#allocation9 + $0x11a0] sm:$0xff]  ;;  %v11205_v45 = vpack.c.bf16 %v2031_v24, %v2018_v61  ;;  %v11208_v54 = vpack.c.bf16 %v2033_v3, %v2020_v4 }
 0x290   : > { %v2736_v41 = vld [vmem:[#allocation9 + $0x1580] sm:$0xff]  ;;  %v9763_v57 = vcombine.high %v2608_v33, %v2612_v23  ;;  %v9762_v42 = vcombine.low %v2608_v33, %v2612_v23 }
 0x291   : > { %7155 = vmatpush2.bf16.msra.mxu0 %v9530_v16  ;;  %7198 = vmatpush2.bf16.msra.mxu1 %v9658_v36  ;;  %v2740_v55 = vld [vmem:[#allocation9 + $0x15a0] sm:$0xff] }
 0x292   : > { %7156 = vmatprep.subr.bf16.mxu0 %v9523_v46  ;;  %7199 = vmatprep.subr.bf16.mxu1 %v9651_v6  ;;  %v2600_v20 = vld [vmem:[#allocation9 + $0x1140] sm:$0xff]  ;;  %v9891_v63 = vcombine.high %v2736_v41, %v2740_v55  ;;  %v9890_v34 = vcombine.low %v2736_v41, %v2740_v55 }
 0x293   : > { %v2604_v51 = vld [vmem:[#allocation9 + $0x1160] sm:$0xff] }
 0x294   : > { %v2728_v22 = vld [vmem:[#allocation9 + $0x1540] sm:$0xff]  ;;  %v9755_v47 = vcombine.high %v2600_v20, %v2604_v51  ;;  %v9754_v46 = vcombine.low %v2600_v20, %v2604_v51 }
 0x295   : > { %7157 = vmatpush2.bf16.msra.mxu0 %v9522_v35  ;;  %7200 = vmatpush2.bf16.msra.mxu1 %v9650_v2  ;;  %v2732_v7 = vld [vmem:[#allocation9 + $0x1560] sm:$0xff] }
 0x296   : > { %7212 = vmatprep.subr.bf16.mxu0 %v9771_v44  ;;  %7255 = vmatprep.subr.bf16.mxu1 %v9899_v31  ;;  %v9883_v62 = vcombine.high %v2728_v22, %v2732_v7  ;;  %v2592_v16 = vld [vmem:[#allocation9 + $0x1100] sm:$0xff]  ;;  %v9882_v5 = vcombine.low %v2728_v22, %v2732_v7 }
 0x297   : > { %v2596_v36 = vld [vmem:[#allocation9 + $0x1120] sm:$0xff] }
 0x298   : > { %7159 = vmatmul.mubr.bf16.vlgmr.msra.gmra.mxu0 %v11201_v18  ;;  %7202 = vmatmul.mubr.bf16.vlgmr.msra.gmra.mxu1 %v11203_v60  ;;  %v2720_v39 = vld [vmem:[#allocation9 + $0x1500] sm:$0xff]  ;;  %v9747_v11 = vcombine.high %v2592_v16, %v2596_v36  ;;  %v9746_v14 = vcombine.low %v2592_v16, %v2596_v36 }
 0x299   : > { %7213 = vmatpush1.bf16.msra.mxu0 %v9770_v25  ;;  %7244 = vmatprep.mubr.bf16.mxu0 %v11205_v45  ;;  %v2724_v50 = vld [vmem:[#allocation9 + $0x1520] sm:$0xff] }
 0x29a   : > { %7256 = vmatpush1.bf16.msra.mxu1 %v9898_v27  ;;  %7287 = vmatprep.mubr.bf16.mxu1 %v11208_v54  ;;  %v9875_v58 = vcombine.high %v2720_v39, %v2724_v50  ;;  %v2584_v6 = vld [vmem:[#allocation9 + $0x10c0] sm:$0xff]  ;;  %v9874_v37 = vcombine.low %v2720_v39, %v2724_v50 }
 0x29b   : > { %7214 = vmatprep.subr.bf16.mxu0 %v9763_v57  ;;  %7257 = vmatprep.subr.bf16.mxu1 %v9891_v63  ;;  %v2588_v53 = vld [vmem:[#allocation9 + $0x10e0] sm:$0xff] }
 0x29c   : > { %v2712_v26 = vld [vmem:[#allocation9 + $0x14c0] sm:$0xff]  ;;  %v9739_v1 = vcombine.high %v2584_v6, %v2588_v53  ;;  %v9738_v2 = vcombine.low %v2584_v6, %v2588_v53 }
 0x29d   : > { %7215 = vmatpush1.bf16.msra.mxu0 %v9762_v42  ;;  %v2716_v30 = vld [vmem:[#allocation9 + $0x14e0] sm:$0xff] }
 0x29e   : > { %7258 = vmatpush1.bf16.msra.mxu1 %v9890_v34  ;;  %7216 = vmatprep.subr.bf16.mxu0 %v9755_v47  ;;  %v9867_v48 = vcombine.high %v2712_v26, %v2716_v30  ;;  %v2576_v13 = vld [vmem:[#allocation9 + $0x1080] sm:$0xff]  ;;  %v9866_v44 = vcombine.low %v2712_v26, %v2716_v30 }
 0x29f   : > { %7259 = vmatprep.subr.bf16.mxu1 %v9883_v62  ;;  %v2580_v35 = vld [vmem:[#allocation9 + $0x10a0] sm:$0xff] }
 0x2a0   : > { %v2704_v29 = vld [vmem:[#allocation9 + $0x1480] sm:$0xff]  ;;  %v9731_v0 = vcombine.high %v2576_v13, %v2580_v35  ;;  %v9730_v23 = vcombine.low %v2576_v13, %v2580_v35 }
 0x2a1   : > { %7217 = vmatpush1.bf16.msra.mxu0 %v9754_v46  ;;  %v2708_v21 = vld [vmem:[#allocation9 + $0x14a0] sm:$0xff] }
 0x2a2   : > { %7260 = vmatpush1.bf16.msra.mxu1 %v9882_v5  ;;  %7218 = vmatprep.subr.bf16.mxu0 %v9747_v11  ;;  %v9859_v19 = vcombine.high %v2704_v29, %v2708_v21  ;;  %v2568_v31 = vld [vmem:[#allocation9 + $0x1040] sm:$0xff]  ;;  %v9858_v59 = vcombine.low %v2704_v29, %v2708_v21 }
 0x2a3   : > { %7261 = vmatprep.subr.bf16.mxu1 %v9875_v58  ;;  %v2572_v8 = vld [vmem:[#allocation9 + $0x1060] sm:$0xff] }
 0x2a4   : > { %v2696_v24 = vld [vmem:[#allocation9 + $0x1440] sm:$0xff]  ;;  %v9723_v3 = vcombine.high %v2568_v31, %v2572_v8  ;;  %v9722_v4 = vcombine.low %v2568_v31, %v2572_v8 }
 0x2a5   : > { %7219 = vmatpush1.bf16.msra.mxu0 %v9746_v14  ;;  %v2700_v33 = vld [vmem:[#allocation9 + $0x1460] sm:$0xff] }
 0x2a6   : > { %7262 = vmatpush1.bf16.msra.mxu1 %v9874_v37  ;;  %7220 = vmatprep.subr.bf16.mxu0 %v9739_v1  ;;  %v9851_v25 = vcombine.high %v2696_v24, %v2700_v33  ;;  %v2560_v41 = vld [vmem:[#allocation9 + $0x1000] sm:$0xff]  ;;  %v9850_v57 = vcombine.low %v2696_v24, %v2700_v33 }
 0x2a7   : > { %7263 = vmatprep.subr.bf16.mxu1 %v9867_v48  ;;  %v2564_v55 = vld [vmem:[#allocation9 + $0x1020] sm:$0xff] }
 0x2a8   : > { %v2688_v61 = vld [vmem:[#allocation9 + $0x1400] sm:$0xff]  ;;  %v9715_v20 = vcombine.high %v2560_v41, %v2564_v55  ;;  %v9714_v34 = vcombine.low %v2560_v41, %v2564_v55 }
 0x2a9   : > { %7221 = vmatpush1.bf16.msra.mxu0 %v9738_v2  ;;  %v2692_v27 = vld [vmem:[#allocation9 + $0x1420] sm:$0xff] }
 0x2aa   : > { %7264 = vmatpush1.bf16.msra.mxu1 %v9866_v44  ;;  %7222 = vmatprep.subr.bf16.mxu0 %v9731_v0  ;;  %v9843_v51 = vcombine.high %v2688_v61, %v2692_v27  ;;  %v2680_v63 = vld [vmem:[#allocation9 + $0x13c0] sm:$0xff]  ;;  %v9842_v47 = vcombine.low %v2688_v61, %v2692_v27 }
 0x2ab   : > { %7265 = vmatprep.subr.bf16.mxu1 %v9859_v19  ;;  %v2684_v22 = vld [vmem:[#allocation9 + $0x13e0] sm:$0xff] }
 0x2ac   : > { %v2808_v7 = vld [vmem:[#allocation9 + $0x17c0] sm:$0xff]  ;;  %v9835_v62 = vcombine.high %v2680_v63, %v2684_v22  ;;  %v9834_v5 = vcombine.low %v2680_v63, %v2684_v22 }
 0x2ad   : > { %7223 = vmatpush1.bf16.msra.mxu0 %v9730_v23  ;;  %v2812_v42 = vld [vmem:[#allocation9 + $0x17e0] sm:$0xff] }
 0x2ae   : > { %7266 = vmatpush1.bf16.msra.mxu1 %v9858_v59  ;;  %7224 = vmatprep.subr.bf16.mxu0 %v9723_v3  ;;  %v9963_v16 = vcombine.high %v2808_v7, %v2812_v42  ;;  %v2672_v36 = vld [vmem:[#allocation9 + $0x1380] sm:$0xff]  ;;  %v9962_v11 = vcombine.low %v2808_v7, %v2812_v42 }
 0x2af   : > { %7267 = vmatprep.subr.bf16.mxu1 %v9851_v25  ;;  %v2676_v39 = vld [vmem:[#allocation9 + $0x13a0] sm:$0xff] }
 0x2b0   : > { %v2800_v50 = vld [vmem:[#allocation9 + $0x1780] sm:$0xff]  ;;  %v9827_v58 = vcombine.high %v2672_v36, %v2676_v39  ;;  %v9826_v37 = vcombine.low %v2672_v36, %v2676_v39 }
 0x2b1   : > { %7225 = vmatpush1.bf16.msra.mxu0 %v9722_v4  ;;  %v2804_v46 = vld [vmem:[#allocation9 + $0x17a0] sm:$0xff] }
 0x2b2   : > { %7268 = vmatpush1.bf16.msra.mxu1 %v9850_v57  ;;  %7226 = vmatprep.subr.bf16.mxu0 %v9715_v20  ;;  %v9955_v6 = vcombine.high %v2800_v50, %v2804_v46  ;;  %v2664_v53 = vld [vmem:[#allocation9 + $0x1340] sm:$0xff]  ;;  %v9954_v1 = vcombine.low %v2800_v50, %v2804_v46 }
 0x2b3   : > { %7269 = vmatprep.subr.bf16.mxu1 %v9843_v51  ;;  %v2668_v26 = vld [vmem:[#allocation9 + $0x1360] sm:$0xff] }
 0x2b4   : > { %v2792_v30 = vld [vmem:[#allocation9 + $0x1740] sm:$0xff]  ;;  %v9819_v48 = vcombine.high %v2664_v53, %v2668_v26  ;;  %v9818_v44 = vcombine.low %v2664_v53, %v2668_v26 }
 0x2b5   : > { %7227 = vmatpush1.bf16.msra.mxu0 %v9714_v34  ;;  %v2796_v14 = vld [vmem:[#allocation9 + $0x1760] sm:$0xff] }
 0x2b6   : > { %7270 = vmatpush1.bf16.msra.mxu1 %v9842_v47  ;;  %7228 = vmatprep.subr.bf16.mxu0 %v9835_v62  ;;  %v9947_v13 = vcombine.high %v2792_v30, %v2796_v14  ;;  %v2656_v35 = vld [vmem:[#allocation9 + $0x1300] sm:$0xff]  ;;  %v9946_v0 = vcombine.low %v2792_v30, %v2796_v14  ;;  %v2105_v14 = vld [vmem:[#allocation9 + $0x1c8] sm:$0xff] }
 0x2b7   : > { %7271 = vmatprep.subr.bf16.mxu1 %v9963_v16  ;;  %v2660_v29 = vld [vmem:[#allocation9 + $0x1320] sm:$0xff] }
 0x2b8   : > { %v2784_v21 = vld [vmem:[#allocation9 + $0x1700] sm:$0xff]  ;;  %v9811_v19 = vcombine.high %v2656_v35, %v2660_v29  ;;  %v9810_v59 = vcombine.low %v2656_v35, %v2660_v29 }
 0x2b9   : > { %7229 = vmatpush2.bf16.msra.mxu0 %v9834_v5  ;;  %v2788_v2 = vld [vmem:[#allocation9 + $0x1720] sm:$0xff] }
 0x2ba   : > { %7272 = vmatpush2.bf16.msra.mxu1 %v9962_v11  ;;  %7230 = vmatprep.subr.bf16.mxu0 %v9827_v58  ;;  %v9939_v31 = vcombine.high %v2784_v21, %v2788_v2  ;;  %v2648_v8 = vld [vmem:[#allocation9 + $0x12c0] sm:$0xff]  ;;  %v9938_v3 = vcombine.low %v2784_v21, %v2788_v2  ;;  %v2097_v2 = vld [vmem:[#allocation9 + $0x188] sm:$0xff] }
 0x2bb   : > { %7273 = vmatprep.subr.bf16.mxu1 %v9955_v6  ;;  %v2652_v24 = vld [vmem:[#allocation9 + $0x12e0] sm:$0xff] }
 0x2bc   : > { %v2776_v33 = vld [vmem:[#allocation9 + $0x16c0] sm:$0xff]  ;;  %v9803_v25 = vcombine.high %v2648_v8, %v2652_v24  ;;  %v9802_v57 = vcombine.low %v2648_v8, %v2652_v24 }
 0x2bd   : > { %7231 = vmatpush2.bf16.msra.mxu0 %v9826_v37  ;;  %v2780_v23 = vld [vmem:[#allocation9 + $0x16e0] sm:$0xff]  ;;  %v2109_v37 = vld [vmem:[#allocation9 + $0x1e8] sm:$0xff] }
 0x2be   : > { %7274 = vmatpush2.bf16.msra.mxu1 %v9954_v1  ;;  %7232 = vmatprep.subr.bf16.mxu0 %v9819_v48  ;;  %v9931_v41 = vcombine.high %v2776_v33, %v2780_v23  ;;  %v2640_v55 = vld [vmem:[#allocation9 + $0x1280] sm:$0xff]  ;;  %v9930_v20 = vcombine.low %v2776_v33, %v2780_v23  ;;  %v9261_v35 = vcombine.high %v2105_v14, %v2109_v37  ;;  %v2089_v23 = vld [vmem:[#allocation9 + $0x148] sm:$0xff] }
 0x2bf   : > { %7275 = vmatprep.subr.bf16.mxu1 %v9947_v13  ;;  %v2644_v61 = vld [vmem:[#allocation9 + $0x12a0] sm:$0xff] }
 0x2c0   : > { %v2768_v27 = vld [vmem:[#allocation9 + $0x1680] sm:$0xff]  ;;  %v9795_v51 = vcombine.high %v2640_v55, %v2644_v61  ;;  %v9794_v47 = vcombine.low %v2640_v55, %v2644_v61 }
 0x2c1   : > { %7233 = vmatpush2.bf16.msra.mxu0 %v9818_v44  ;;  %v2772_v4 = vld [vmem:[#allocation9 + $0x16a0] sm:$0xff]  ;;  %v2101_v44 = vld [vmem:[#allocation9 + $0x1a8] sm:$0xff] }
 0x2c2   : > { %7276 = vmatpush2.bf16.msra.mxu1 %v9946_v0  ;;  %7234 = vmatprep.subr.bf16.mxu0 %v9811_v19  ;;  %v9923_v63 = vcombine.high %v2768_v27, %v2772_v4  ;;  %v2632_v22 = vld [vmem:[#allocation9 + $0x1240] sm:$0xff]  ;;  %v9922_v62 = vcombine.low %v2768_v27, %v2772_v4  ;;  %v9260_v19 = vcombine.low %v2105_v14, %v2109_v37  ;;  %v2081_v4 = vld [vmem:[#allocation9 + $0x108] sm:$0xff] }
 0x2c3   : > { %7277 = vmatprep.subr.bf16.mxu1 %v9939_v31  ;;  %v2636_v7 = vld [vmem:[#allocation9 + $0x1260] sm:$0xff]  ;;  %v9253_v8 = vcombine.high %v2097_v2, %v2101_v44 }
 0x2c4   : > { %v2760_v42 = vld [vmem:[#allocation9 + $0x1640] sm:$0xff]  ;;  %v9787_v16 = vcombine.high %v2632_v22, %v2636_v7  ;;  %v9786_v11 = vcombine.low %v2632_v22, %v2636_v7 }
 0x2c5   : > { %7235 = vmatpush2.bf16.msra.mxu0 %v9810_v59  ;;  %v2764_v34 = vld [vmem:[#allocation9 + $0x1660] sm:$0xff]  ;;  %v2093_v59 = vld [vmem:[#allocation9 + $0x168] sm:$0xff] }
 0x2c6   : > { %7278 = vmatpush2.bf16.msra.mxu1 %v9938_v3  ;;  %7236 = vmatprep.subr.bf16.mxu0 %v9803_v25  ;;  %v9915_v36 = vcombine.high %v2760_v42, %v2764_v34  ;;  %v2624_v39 = vld [vmem:[#allocation9 + $0x1200] sm:$0xff]  ;;  %v9914_v58 = vcombine.low %v2760_v42, %v2764_v34  ;;  %v9252_v25 = vcombine.low %v2097_v2, %v2101_v44 }
 0x2c7   : > { %7279 = vmatprep.subr.bf16.mxu1 %v9931_v41  ;;  %v2628_v50 = vld [vmem:[#allocation9 + $0x1220] sm:$0xff]  ;;  %v9245_v55 = vcombine.high %v2089_v23, %v2093_v59 }
 0x2c8   : > { %v2752_v46 = vld [vmem:[#allocation9 + $0x1600] sm:$0xff]  ;;  %v9779_v6 = vcombine.high %v2624_v39, %v2628_v50  ;;  %v9778_v1 = vcombine.low %v2624_v39, %v2628_v50 }
 0x2c9   : > { %7237 = vmatpush2.bf16.msra.mxu0 %v9802_v57  ;;  %v2756_v5 = vld [vmem:[#allocation9 + $0x1620] sm:$0xff]  ;;  %v2085_v57 = vld [vmem:[#allocation9 + $0x128] sm:$0xff] }
 0x2ca   : > { %7280 = vmatpush2.bf16.msra.mxu1 %v9930_v20  ;;  %7238 = vmatprep.subr.bf16.mxu0 %v9795_v51  ;;  %v9907_v53 = vcombine.high %v2752_v46, %v2756_v5  ;;  %v2872_v26 = vld [vmem:[#allocation9 + $0x19c0] sm:$0xff]  ;;  %v9906_v48 = vcombine.low %v2752_v46, %v2756_v5  ;;  %v11533_v20 = vmov 0   ;;  %v9237_v7 = vcombine.high %v2081_v4, %v2085_v57 }
 0x2cb   : > { %7281 = vmatprep.subr.bf16.mxu1 %v9923_v63  ;;  %v2876_v30 = vld [vmem:[#allocation9 + $0x19e0] sm:$0xff]  ;;  %v9244_v63 = vcombine.low %v2089_v23, %v2093_v59  ;;  %v2233_v23 = vld [vmem:[#allocation9 + $0x5c8] sm:$0xff] }
 0x2cc   : > { %v10027_v13 = vcombine.high %v2872_v26, %v2876_v30  ;;  %v2864_v29 = vld [vmem:[#allocation9 + $0x1980] sm:$0xff]  ;;  %v10026_v0 = vcombine.low %v2872_v26, %v2876_v30  ;;  %v2237_v59 = vld [vmem:[#allocation9 + $0x5e8] sm:$0xff] }
 0x2cd   : > { %7239 = vmatpush2.bf16.msra.mxu0 %v9794_v47  ;;  %v2868_v21 = vld [vmem:[#allocation9 + $0x19a0] sm:$0xff]  ;;  %v2073_v47 = vld [vmem:[#allocation9 + $0xc8] sm:$0xff] }
 0x2ce   : > { %7282 = vmatpush2.bf16.msra.mxu1 %v9922_v62  ;;  %7240 = vmatprep.subr.bf16.mxu0 %v9787_v16  ;;  %v10019_v31 = vcombine.high %v2864_v29, %v2868_v21  ;;  %v2856_v24 = vld [vmem:[#allocation9 + $0x1940] sm:$0xff]  ;;  %v10018_v3 = vcombine.low %v2864_v29, %v2868_v21  ;;  %v2077_v62 = vld [vmem:[#allocation9 + $0xe8] sm:$0xff] }
 0x2cf   : > { %7283 = vmatprep.subr.bf16.mxu1 %v9915_v36  ;;  %v2860_v33 = vld [vmem:[#allocation9 + $0x1960] sm:$0xff]  ;;  %v9236_v36 = vcombine.low %v2081_v4, %v2085_v57  ;;  %v9229_v50 = vcombine.high %v2073_v47, %v2077_v62  ;;  %v2225_v4 = vld [vmem:[#allocation9 + $0x588] sm:$0xff] }
 0x2d0   : > { %v10011_v41 = vcombine.high %v2856_v24, %v2860_v33  ;;  %v2848_v61 = vld [vmem:[#allocation9 + $0x1900] sm:$0xff]  ;;  %v10010_v51 = vcombine.low %v2856_v24, %v2860_v33  ;;  %v2229_v57 = vld [vmem:[#allocation9 + $0x5a8] sm:$0xff] }
 0x2d1   : > { %7241 = vmatpush2.bf16.msra.mxu0 %v9786_v11  ;;  %v2852_v27 = vld [vmem:[#allocation9 + $0x1920] sm:$0xff]  ;;  %v2065_v11 = vld [vmem:[#allocation9 + $0x88] sm:$0xff] }
 0x2d2   : > { %7284 = vmatpush2.bf16.msra.mxu1 %v9914_v58  ;;  %7242 = vmatprep.subr.bf16.mxu0 %v9779_v6  ;;  %v10003_v22 = vcombine.high %v2848_v61, %v2852_v27  ;;  %v2840_v42 = vld [vmem:[#allocation9 + $0x18c0] sm:$0xff]  ;;  %v10002_v16 = vcombine.low %v2848_v61, %v2852_v27  ;;  %v2069_v58 = vld [vmem:[#allocation9 + $0xa8] sm:$0xff]  ;;  %v9389_v61 = vcombine.high %v2233_v23, %v2237_v59 }
 0x2d3   : > { %7285 = vmatprep.subr.bf16.mxu1 %v9907_v53  ;;  %v2844_v34 = vld [vmem:[#allocation9 + $0x18e0] sm:$0xff]  ;;  %v9228_v53 = vcombine.low %v2073_v47, %v2077_v62  ;;  %v9221_v30 = vcombine.high %v2065_v11, %v2069_v58  ;;  %v2217_v47 = vld [vmem:[#allocation9 + $0x548] sm:$0xff] }
 0x2d4   : > { %v9995_v39 = vcombine.high %v2840_v42, %v2844_v34  ;;  %v2832_v46 = vld [vmem:[#allocation9 + $0x1880] sm:$0xff]  ;;  %v9994_v6 = vcombine.low %v2840_v42, %v2844_v34  ;;  %v9381_v42 = vcombine.high %v2225_v4, %v2229_v57  ;;  %v2221_v62 = vld [vmem:[#allocation9 + $0x568] sm:$0xff] }
 0x2d5   : > { %7243 = vmatpush2.bf16.msra.mxu0 %v9778_v1  ;;  %v2836_v5 = vld [vmem:[#allocation9 + $0x18a0] sm:$0xff]  ;;  %v2057_v1 = vld [vmem:[#allocation9 + $0x48] sm:$0xff] }
 0x2d6   : > { %7286 = vmatpush2.bf16.msra.mxu1 %v9906_v48  ;;  %7298 = vmatprep.subr.bf16.mxu0 %v10027_v13  ;;  %v9987_v26 = vcombine.high %v2832_v46, %v2836_v5  ;;  %v2824_v14 = vld [vmem:[#allocation9 + $0x1840] sm:$0xff]  ;;  %v2061_v48 = vld [vmem:[#allocation9 + $0x68] sm:$0xff]  ;;  %v9986_v13 = vcombine.low %v2832_v46, %v2836_v5  ;;  %v9373_v46 = vcombine.high %v2217_v47, %v2221_v62 }
 0x2d7   : > { %7341 = vmatprep.subr.bf16.mxu1 %v9261_v35  ;;  %v2828_v37 = vld [vmem:[#allocation9 + $0x1860] sm:$0xff]  ;;  %v9220_v35 = vcombine.low %v2065_v11, %v2069_v58  ;;  %v9213_v21 = vcombine.high %v2057_v1, %v2061_v48  ;;  %v2209_v11 = vld [vmem:[#allocation9 + $0x508] sm:$0xff] }
 0x2d8   : > { %7245 = vmatmul.mubr.bf16.vlgmr.msra.gmra.mxu0 %v11169_v17  ;;  %v9979_v29 = vcombine.high %v2824_v14, %v2828_v37  ;;  %v2816_v2 = vld [vmem:[#allocation9 + $0x1800] sm:$0xff]  ;;  %v2213_v58 = vld [vmem:[#allocation9 + $0x528] sm:$0xff] }
 0x2d9   : > { %7288 = vmatmul.mubr.bf16.vlgmr.msra.gmra.mxu1 %v11171_v49  ;;  %7299 = vmatpush1.bf16.msra.mxu0 %v10026_v0  ;;  %v2820_v44 = vld [vmem:[#allocation9 + $0x1820] sm:$0xff]  ;;  %v2049_v0 = vld [vmem:[#allocation9 + $0x8] sm:$0xff] }
 0x2da   : > { %7342 = vmatpush1.bf16.msra.mxu1 %v9260_v19  ;;  %7373 = vmatprep.mubr.bf16.mxu1 %v11119_v56  ;;  %v2053_v19 = vld [vmem:[#allocation9 + $0x28] sm:$0xff]  ;;  %v9971_v24 = vcombine.high %v2816_v2, %v2820_v44 }
 0x2db   : > { %7300 = vmatprep.subr.bf16.mxu0 %v10019_v31  ;;  %7343 = vmatprep.subr.bf16.mxu1 %v9253_v8  ;;  %v9978_v31 = vcombine.low %v2824_v14, %v2828_v37  ;;  %v9212_v8 = vcombine.low %v2057_v1, %v2061_v48  ;;  %v9205_v33 = vcombine.high %v2049_v0, %v2053_v19  ;;  %v2201_v1 = vld [vmem:[#allocation9 + $0x4c8] sm:$0xff] }
 0x2dc   : > { %7330 = vmatprep.mubr.bf16.mxu0 %v11533_v20  ;;  %v9365_v14 = vcombine.high %v2209_v11, %v2213_v58  ;;  %v2205_v48 = vld [vmem:[#allocation9 + $0x4e8] sm:$0xff] }
 0x2dd   : > { %7301 = vmatpush1.bf16.msra.mxu0 %v10018_v3  ;;  %v2169_v3 = vld [vmem:[#allocation9 + $0x3c8] sm:$0xff] }
 0x2de   : > { %7344 = vmatpush1.bf16.msra.mxu1 %v9252_v25  ;;  %7302 = vmatprep.subr.bf16.mxu0 %v10011_v41  ;;  %v2173_v25 = vld [vmem:[#allocation9 + $0x3e8] sm:$0xff]  ;;  %v9970_v41 = vcombine.low %v2816_v2, %v2820_v44  ;;  %v9357_v2 = vcombine.high %v2201_v1, %v2205_v48 }
 0x2df   : > { %7345 = vmatprep.subr.bf16.mxu1 %v9245_v55  ;;  %v9204_v55 = vcombine.low %v2049_v0, %v2053_v19  ;;  %v9325_v27 = vcombine.high %v2169_v3, %v2173_v25  ;;  %v2193_v0 = vld [vmem:[#allocation9 + $0x488] sm:$0xff] }
 0x2e0   : > { %v2197_v19 = vld [vmem:[#allocation9 + $0x4a8] sm:$0xff] }
 0x2e1   : > { %7303 = vmatpush1.bf16.msra.mxu0 %v10010_v51  ;;  %v2161_v51 = vld [vmem:[#allocation9 + $0x388] sm:$0xff] }
 0x2e2   : > { %7346 = vmatpush1.bf16.msra.mxu1 %v9244_v63  ;;  %7304 = vmatprep.subr.bf16.mxu0 %v10003_v22  ;;  %v2165_v63 = vld [vmem:[#allocation9 + $0x3a8] sm:$0xff]  ;;  %v9388_v22 = vcombine.low %v2233_v23, %v2237_v59  ;;  %v9349_v23 = vcombine.high %v2193_v0, %v2197_v19 }
 0x2e3   : > { %7347 = vmatprep.subr.bf16.mxu1 %v9237_v7  ;;  %v9324_v7 = vcombine.low %v2169_v3, %v2173_v25  ;;  %v9317_v34 = vcombine.high %v2161_v51, %v2165_v63  ;;  %v2185_v3 = vld [vmem:[#allocation9 + $0x448] sm:$0xff] }
 0x2e4   : > { %v2189_v25 = vld [vmem:[#allocation9 + $0x468] sm:$0xff] }
 0x2e5   : > { %7305 = vmatpush1.bf16.msra.mxu0 %v10002_v16  ;;  %v2153_v16 = vld [vmem:[#allocation9 + $0x348] sm:$0xff] }
 0x2e6   : > { %7348 = vmatpush1.bf16.msra.mxu1 %v9236_v36  ;;  %7306 = vmatprep.subr.bf16.mxu0 %v9995_v39  ;;  %v2157_v36 = vld [vmem:[#allocation9 + $0x368] sm:$0xff]  ;;  %v9380_v39 = vcombine.low %v2225_v4, %v2229_v57  ;;  %v9341_v4 = vcombine.high %v2185_v3, %v2189_v25 }
 0x2e7   : > { %7349 = vmatprep.subr.bf16.mxu1 %v9229_v50  ;;  %v9316_v50 = vcombine.low %v2161_v51, %v2165_v63  ;;  %v9309_v5 = vcombine.high %v2153_v16, %v2157_v36  ;;  %v2177_v51 = vld [vmem:[#allocation9 + $0x408] sm:$0xff] }
 0x2e8   : > { %v2181_v63 = vld [vmem:[#allocation9 + $0x428] sm:$0xff] }
 0x2e9   : > { %7307 = vmatpush1.bf16.msra.mxu0 %v9994_v6  ;;  %v2145_v6 = vld [vmem:[#allocation9 + $0x308] sm:$0xff] }
 0x2ea   : > { %7350 = vmatpush1.bf16.msra.mxu1 %v9228_v53  ;;  %7308 = vmatprep.subr.bf16.mxu0 %v9987_v26  ;;  %v2149_v53 = vld [vmem:[#allocation9 + $0x328] sm:$0xff]  ;;  %v9372_v26 = vcombine.low %v2217_v47, %v2221_v62  ;;  %v9333_v47 = vcombine.high %v2177_v51, %v2181_v63 }
 0x2eb   : > { %7351 = vmatprep.subr.bf16.mxu1 %v9221_v30  ;;  %v9308_v30 = vcombine.low %v2153_v16, %v2157_v36  ;;  %v9301_v37 = vcombine.high %v2145_v6, %v2149_v53  ;;  %v2297_v16 = vld [vmem:[#allocation9 + $0x7c8] sm:$0xff] }
 0x2ec   : > { %v2301_v36 = vld [vmem:[#allocation9 + $0x7e8] sm:$0xff] }
 0x2ed   : > { %7309 = vmatpush1.bf16.msra.mxu0 %v9986_v13  ;;  %v2137_v13 = vld [vmem:[#allocation9 + $0x2c8] sm:$0xff] }
 0x2ee   : > { %7352 = vmatpush1.bf16.msra.mxu1 %v9220_v35  ;;  %7310 = vmatprep.subr.bf16.mxu0 %v9979_v29  ;;  %v2141_v35 = vld [vmem:[#allocation9 + $0x2e8] sm:$0xff]  ;;  %v9364_v29 = vcombine.low %v2209_v11, %v2213_v58  ;;  %v9453_v11 = vcombine.high %v2297_v16, %v2301_v36 }
 0x2ef   : > { %7353 = vmatprep.subr.bf16.mxu1 %v9213_v21  ;;  %v9300_v21 = vcombine.low %v2145_v6, %v2149_v53  ;;  %v9293_v44 = vcombine.high %v2137_v13, %v2141_v35  ;;  %v2289_v6 = vld [vmem:[#allocation9 + $0x788] sm:$0xff] }
 0x2f0   : > { %v2293_v53 = vld [vmem:[#allocation9 + $0x7a8] sm:$0xff] }
 0x2f1   : > { %7311 = vmatpush1.bf16.msra.mxu0 %v9978_v31  ;;  %v2129_v31 = vld [vmem:[#allocation9 + $0x288] sm:$0xff] }
 0x2f2   : > { %7354 = vmatpush1.bf16.msra.mxu1 %v9212_v8  ;;  %7312 = vmatprep.subr.bf16.mxu0 %v9971_v24  ;;  %v2133_v8 = vld [vmem:[#allocation9 + $0x2a8] sm:$0xff]  ;;  %v9356_v24 = vcombine.low %v2201_v1, %v2205_v48  ;;  %v9445_v1 = vcombine.high %v2289_v6, %v2293_v53 }
 0x2f3   : > { %7355 = vmatprep.subr.bf16.mxu1 %v9205_v33  ;;  %v9292_v33 = vcombine.low %v2137_v13, %v2141_v35  ;;  %v9285_v59 = vcombine.high %v2129_v31, %v2133_v8  ;;  %v2281_v13 = vld [vmem:[#allocation9 + $0x748] sm:$0xff] }
 0x2f4   : > { %v2285_v35 = vld [vmem:[#allocation9 + $0x768] sm:$0xff] }
 0x2f5   : > { %7313 = vmatpush1.bf16.msra.mxu0 %v9970_v41  ;;  %v2121_v41 = vld [vmem:[#allocation9 + $0x248] sm:$0xff] }
 0x2f6   : > { %7356 = vmatpush1.bf16.msra.mxu1 %v9204_v55  ;;  %7384 = vmatprep.subr.bf16.mxu0 %v9389_v61  ;;  %v2125_v55 = vld [vmem:[#allocation9 + $0x268] sm:$0xff]  ;;  %v9348_v61 = vcombine.low %v2193_v0, %v2197_v19  ;;  %v9437_v0 = vcombine.high %v2281_v13, %v2285_v35 }
 0x2f7   : > { %7357 = vmatprep.subr.bf16.mxu1 %v9325_v27  ;;  %v9284_v27 = vcombine.low %v2129_v31, %v2133_v8  ;;  %v9277_v57 = vcombine.high %v2121_v41, %v2125_v55  ;;  %v2273_v31 = vld [vmem:[#allocation9 + $0x708] sm:$0xff] }
 0x2f8   : > { %7331 = vmatmul.mubr.bf16.vlgmr.msra.gmra.mxu0 %v11176_v40  ;;  %v2277_v8 = vld [vmem:[#allocation9 + $0x728] sm:$0xff] }
 0x2f9   : > { %7385 = vmatpush1.bf16.msra.mxu0 %v9388_v22  ;;  %7416 = vmatprep.mubr.bf16.mxu0 %v11121_v32  ;;  %v2113_v22 = vld [vmem:[#allocation9 + $0x208] sm:$0xff] }
 0x2fa   : > { %7358 = vmatpush2.bf16.msra.mxu1 %v9324_v7  ;;  %7386 = vmatprep.subr.bf16.mxu0 %v9381_v42  ;;  %v2117_v7 = vld [vmem:[#allocation9 + $0x228] sm:$0xff]  ;;  %v9340_v42 = vcombine.low %v2185_v3, %v2189_v25  ;;  %v9429_v3 = vcombine.high %v2273_v31, %v2277_v8 }
 0x2fb   : > { %7359 = vmatprep.subr.bf16.mxu1 %v9317_v34  ;;  %v9276_v34 = vcombine.low %v2121_v41, %v2125_v55  ;;  %v9269_v62 = vcombine.high %v2113_v22, %v2117_v7  ;;  %v2265_v41 = vld [vmem:[#allocation9 + $0x6c8] sm:$0xff] }
 0x2fc   : > { %v2269_v55 = vld [vmem:[#allocation9 + $0x6e8] sm:$0xff] }
 0x2fd   : > { %7387 = vmatpush1.bf16.msra.mxu0 %v9380_v39  ;;  %v2361_v39 = vld [vmem:[#allocation9 + $0x9c8] sm:$0xff] }
 0x2fe   : > { %7360 = vmatpush2.bf16.msra.mxu1 %v9316_v50  ;;  %7388 = vmatprep.subr.bf16.mxu0 %v9373_v46  ;;  %v2365_v50 = vld [vmem:[#allocation9 + $0x9e8] sm:$0xff]  ;;  %v9332_v46 = vcombine.low %v2177_v51, %v2181_v63  ;;  %v9421_v51 = vcombine.high %v2265_v41, %v2269_v55 }
 0x2ff   : > { %7361 = vmatprep.subr.bf16.mxu1 %v9309_v5  ;;  %v9268_v5 = vcombine.low %v2113_v22, %v2117_v7  ;;  %v9517_v58 = vcombine.high %v2361_v39, %v2365_v50  ;;  %v2257_v22 = vld [vmem:[#allocation9 + $0x688] sm:$0xff] }
 0x300   : > { %v2261_v7 = vld [vmem:[#allocation9 + $0x6a8] sm:$0xff] }
 0x301   : > { %7389 = vmatpush1.bf16.msra.mxu0 %v9372_v26  ;;  %v2353_v26 = vld [vmem:[#allocation9 + $0x988] sm:$0xff] }
 0x302   : > { %7362 = vmatpush2.bf16.msra.mxu1 %v9308_v30  ;;  %7390 = vmatprep.subr.bf16.mxu0 %v9365_v14  ;;  %v2357_v30 = vld [vmem:[#allocation9 + $0x9a8] sm:$0xff]  ;;  %v9452_v14 = vcombine.low %v2297_v16, %v2301_v36  ;;  %v9413_v16 = vcombine.high %v2257_v22, %v2261_v7 }
 0x303   : > { %7363 = vmatprep.subr.bf16.mxu1 %v9301_v37  ;;  %v9516_v37 = vcombine.low %v2361_v39, %v2365_v50  ;;  %v9509_v48 = vcombine.high %v2353_v26, %v2357_v30  ;;  %v2249_v39 = vld [vmem:[#allocation9 + $0x648] sm:$0xff] }
 0x304   : > { %v2253_v50 = vld [vmem:[#allocation9 + $0x668] sm:$0xff] }
 0x305   : > { %7391 = vmatpush1.bf16.msra.mxu0 %v9364_v29  ;;  %v2345_v29 = vld [vmem:[#allocation9 + $0x948] sm:$0xff] }
 0x306   : > { %7364 = vmatpush2.bf16.msra.mxu1 %v9300_v21  ;;  %7392 = vmatprep.subr.bf16.mxu0 %v9357_v2  ;;  %v2349_v21 = vld [vmem:[#allocation9 + $0x968] sm:$0xff]  ;;  %v9444_v2 = vcombine.low %v2289_v6, %v2293_v53  ;;  %v9405_v6 = vcombine.high %v2249_v39, %v2253_v50 }
 0x307   : > { %7365 = vmatprep.subr.bf16.mxu1 %v9293_v44  ;;  %v9508_v44 = vcombine.low %v2353_v26, %v2357_v30  ;;  %v9501_v19 = vcombine.high %v2345_v29, %v2349_v21  ;;  %v2241_v26 = vld [vmem:[#allocation9 + $0x608] sm:$0xff] }
 0x308   : > { %v2245_v30 = vld [vmem:[#allocation9 + $0x628] sm:$0xff] }
 0x309   : > { %7393 = vmatpush1.bf16.msra.mxu0 %v9356_v24  ;;  %v2337_v24 = vld [vmem:[#allocation9 + $0x908] sm:$0xff] }
 0x30a   : > { %7366 = vmatpush2.bf16.msra.mxu1 %v9292_v33  ;;  %7394 = vmatprep.subr.bf16.mxu0 %v9349_v23  ;;  %v2341_v33 = vld [vmem:[#allocation9 + $0x928] sm:$0xff]  ;;  %v9436_v23 = vcombine.low %v2281_v13, %v2285_v35  ;;  %v9397_v13 = vcombine.high %v2241_v26, %v2245_v30 }
 0x30b   : > { %7367 = vmatprep.subr.bf16.mxu1 %v9285_v59  ;;  %v9500_v59 = vcombine.low %v2345_v29, %v2349_v21  ;;  %v9493_v25 = vcombine.high %v2337_v24, %v2341_v33  ;;  %v2489_v29 = vld [vmem:[#allocation9 + $0xdc8] sm:$0xff] }
 0x30c   : > { %v2493_v21 = vld [vmem:[#allocation9 + $0xde8] sm:$0xff] }
 0x30d   : > { %7395 = vmatpush1.bf16.msra.mxu0 %v9348_v61  ;;  %v2329_v61 = vld [vmem:[#allocation9 + $0x8c8] sm:$0xff] }
 0x30e   : > { %7368 = vmatpush2.bf16.msra.mxu1 %v9284_v27  ;;  %7396 = vmatprep.subr.bf16.mxu0 %v9341_v4  ;;  %v2333_v27 = vld [vmem:[#allocation9 + $0x8e8] sm:$0xff]  ;;  %v9428_v4 = vcombine.low %v2273_v31, %v2277_v8  ;;  %v9645_v31 = vcombine.high %v2489_v29, %v2493_v21 }
 0x30f   : > { %7369 = vmatprep.subr.bf16.mxu1 %v9277_v57  ;;  %v9492_v57 = vcombine.low %v2337_v24, %v2341_v33  ;;  %v9485_v63 = vcombine.high %v2329_v61, %v2333_v27  ;;  %v2481_v24 = vld [vmem:[#allocation9 + $0xd88] sm:$0xff] }
 0x310   : > { %v2485_v33 = vld [vmem:[#allocation9 + $0xda8] sm:$0xff] }
 0x311   : > { %7397 = vmatpush1.bf16.msra.mxu0 %v9340_v42  ;;  %v2321_v42 = vld [vmem:[#allocation9 + $0x888] sm:$0xff] }
 0x312   : > { %7370 = vmatpush2.bf16.msra.mxu1 %v9276_v34  ;;  %7398 = vmatprep.subr.bf16.mxu0 %v9333_v47  ;;  %v2325_v34 = vld [vmem:[#allocation9 + $0x8a8] sm:$0xff]  ;;  %v9420_v47 = vcombine.low %v2265_v41, %v2269_v55  ;;  %v9637_v41 = vcombine.high %v2481_v24, %v2485_v33 }
 0x313   : > { %7371 = vmatprep.subr.bf16.mxu1 %v9269_v62  ;;  %v9484_v62 = vcombine.low %v2329_v61, %v2333_v27  ;;  %v9477_v36 = vcombine.high %v2321_v42, %v2325_v34  ;;  %v2473_v61 = vld [vmem:[#allocation9 + $0xd48] sm:$0xff] }
 0x314   : > { %v2477_v27 = vld [vmem:[#allocation9 + $0xd68] sm:$0xff] }
 0x315   : > { %7399 = vmatpush1.bf16.msra.mxu0 %v9332_v46  ;;  %v2313_v46 = vld [vmem:[#allocation9 + $0x848] sm:$0xff] }
 0x316   : > { %7372 = vmatpush2.bf16.msra.mxu1 %v9268_v5  ;;  %7400 = vmatprep.subr.bf16.mxu0 %v9453_v11  ;;  %v2317_v5 = vld [vmem:[#allocation9 + $0x868] sm:$0xff]  ;;  %v9412_v11 = vcombine.low %v2257_v22, %v2261_v7  ;;  %v9629_v22 = vcombine.high %v2473_v61, %v2477_v27 }
 0x317   : > { %7427 = vmatprep.subr.bf16.mxu1 %v9517_v58  ;;  %v9476_v58 = vcombine.low %v2321_v42, %v2325_v34  ;;  %v9469_v53 = vcombine.high %v2313_v46, %v2317_v5  ;;  %v2465_v42 = vld [vmem:[#allocation9 + $0xd08] sm:$0xff] }
 0x318   : > { %v2469_v34 = vld [vmem:[#allocation9 + $0xd28] sm:$0xff] }
 0x319   : > { %7374 = vmatmul.mubr.bf16.vlgmr.msra.gmra.mxu1 %v11125_v38  ;;  %7401 = vmatpush2.bf16.msra.mxu0 %v9452_v14  ;;  %v2305_v14 = vld [vmem:[#allocation9 + $0x808] sm:$0xff] }
 0x31a   : > { %7428 = vmatpush1.bf16.msra.mxu1 %v9516_v37  ;;  %7459 = vmatprep.mubr.bf16.mxu1 %v11158_v52  ;;  %v2309_v37 = vld [vmem:[#allocation9 + $0x828] sm:$0xff] }
 0x31b   : > { %7402 = vmatprep.subr.bf16.mxu0 %v9445_v1  ;;  %7429 = vmatprep.subr.bf16.mxu1 %v9509_v48  ;;  %v9404_v1 = vcombine.low %v2249_v39, %v2253_v50  ;;  %v9468_v48 = vcombine.low %v2313_v46, %v2317_v5  ;;  %v9461_v35 = vcombine.high %v2305_v14, %v2309_v37  ;;  %v2457_v46 = vld [vmem:[#allocation9 + $0xcc8] sm:$0xff] }
 0x31c   : > { %v9621_v39 = vcombine.high %v2465_v42, %v2469_v34  ;;  %v2461_v5 = vld [vmem:[#allocation9 + $0xce8] sm:$0xff] }
 0x31d   : > { %7403 = vmatpush2.bf16.msra.mxu0 %v9444_v2  ;;  %v2425_v2 = vld [vmem:[#allocation9 + $0xbc8] sm:$0xff] }
 0x31e   : > { %7430 = vmatpush1.bf16.msra.mxu1 %v9508_v44  ;;  %7404 = vmatprep.subr.bf16.mxu0 %v9437_v0  ;;  %v2429_v44 = vld [vmem:[#allocation9 + $0xbe8] sm:$0xff]  ;;  %v9396_v0 = vcombine.low %v2241_v26, %v2245_v30  ;;  %v9613_v26 = vcombine.high %v2457_v46, %v2461_v5 }
 0x31f   : > { %7431 = vmatprep.subr.bf16.mxu1 %v9501_v19  ;;  %v9460_v19 = vcombine.low %v2305_v14, %v2309_v37  ;;  %v9581_v8 = vcombine.high %v2425_v2, %v2429_v44  ;;  %v2449_v14 = vld [vmem:[#allocation9 + $0xc88] sm:$0xff] }
 0x320   : > { %v2453_v37 = vld [vmem:[#allocation9 + $0xca8] sm:$0xff] }
 0x321   : > { %7405 = vmatpush2.bf16.msra.mxu0 %v9436_v23  ;;  %v2417_v23 = vld [vmem:[#allocation9 + $0xb88] sm:$0xff] }
 0x322   : > { %7432 = vmatpush1.bf16.msra.mxu1 %v9500_v59  ;;  %7406 = vmatprep.subr.bf16.mxu0 %v9429_v3  ;;  %v2421_v59 = vld [vmem:[#allocation9 + $0xba8] sm:$0xff]  ;;  %v9644_v3 = vcombine.low %v2489_v29, %v2493_v21  ;;  %v9605_v29 = vcombine.high %v2449_v14, %v2453_v37 }
 0x323   : > { %7433 = vmatprep.subr.bf16.mxu1 %v9493_v25  ;;  %v9580_v25 = vcombine.low %v2425_v2, %v2429_v44  ;;  %v9573_v55 = vcombine.high %v2417_v23, %v2421_v59  ;;  %v2441_v2 = vld [vmem:[#allocation9 + $0xc48] sm:$0xff] }
 0x324   : > { %v2445_v44 = vld [vmem:[#allocation9 + $0xc68] sm:$0xff] }
 0x325   : > { %7407 = vmatpush2.bf16.msra.mxu0 %v9428_v4  ;;  %v2409_v4 = vld [vmem:[#allocation9 + $0xb48] sm:$0xff] }
 0x326   : > { %7434 = vmatpush1.bf16.msra.mxu1 %v9492_v57  ;;  %7408 = vmatprep.subr.bf16.mxu0 %v9421_v51  ;;  %v2413_v57 = vld [vmem:[#allocation9 + $0xb68] sm:$0xff]  ;;  %v9636_v51 = vcombine.low %v2481_v24, %v2485_v33  ;;  %v9597_v24 = vcombine.high %v2441_v2, %v2445_v44 }
 0x327   : > { %7435 = vmatprep.subr.bf16.mxu1 %v9485_v63  ;;  %v9572_v63 = vcombine.low %v2417_v23, %v2421_v59  ;;  %v9565_v7 = vcombine.high %v2409_v4, %v2413_v57  ;;  %v2433_v23 = vld [vmem:[#allocation9 + $0xc08] sm:$0xff] }
 0x328   : > { %v2437_v59 = vld [vmem:[#allocation9 + $0xc28] sm:$0xff] }
 0x329   : > { %7409 = vmatpush2.bf16.msra.mxu0 %v9420_v47  ;;  %v2401_v47 = vld [vmem:[#allocation9 + $0xb08] sm:$0xff] }
 0x32a   : > { %7436 = vmatpush1.bf16.msra.mxu1 %v9484_v62  ;;  %7410 = vmatprep.subr.bf16.mxu0 %v9413_v16  ;;  %v2405_v62 = vld [vmem:[#allocation9 + $0xb28] sm:$0xff]  ;;  %v9628_v16 = vcombine.low %v2473_v61, %v2477_v27  ;;  %v9589_v61 = vcombine.high %v2433_v23, %v2437_v59 }
 0x32b   : > { %7437 = vmatprep.subr.bf16.mxu1 %v9477_v36  ;;  %v9564_v36 = vcombine.low %v2409_v4, %v2413_v57  ;;  %v9557_v50 = vcombine.high %v2401_v47, %v2405_v62  ;;  %v2553_v4 = vld [vmem:[#allocation9 + $0xfc8] sm:$0xff] }
 0x32c   : > { %v2557_v57 = vld [vmem:[#allocation9 + $0xfe8] sm:$0xff] }
 0x32d   : > { %7411 = vmatpush2.bf16.msra.mxu0 %v9412_v11  ;;  %v2393_v11 = vld [vmem:[#allocation9 + $0xac8] sm:$0xff] }
 0x32e   : > { %7438 = vmatpush1.bf16.msra.mxu1 %v9476_v58  ;;  %7412 = vmatprep.subr.bf16.mxu0 %v9405_v6  ;;  %v2397_v58 = vld [vmem:[#allocation9 + $0xae8] sm:$0xff]  ;;  %v9620_v6 = vcombine.low %v2465_v42, %v2469_v34  ;;  %v9709_v42 = vcombine.high %v2553_v4, %v2557_v57 }
 0x32f   : > { %7439 = vmatprep.subr.bf16.mxu1 %v9469_v53  ;;  %v9556_v53 = vcombine.low %v2401_v47, %v2405_v62  ;;  %v9549_v30 = vcombine.high %v2393_v11, %v2397_v58  ;;  %v2545_v47 = vld [vmem:[#allocation9 + $0xf88] sm:$0xff] }
 0x330   : > { %v2549_v62 = vld [vmem:[#allocation9 + $0xfa8] sm:$0xff] }
 0x331   : > { %7413 = vmatpush2.bf16.msra.mxu0 %v9404_v1  ;;  %v2385_v1 = vld [vmem:[#allocation9 + $0xa88] sm:$0xff] }
 0x332   : > { %7440 = vmatpush1.bf16.msra.mxu1 %v9468_v48  ;;  %7414 = vmatprep.subr.bf16.mxu0 %v9397_v13  ;;  %v2389_v48 = vld [vmem:[#allocation9 + $0xaa8] sm:$0xff]  ;;  %v9612_v13 = vcombine.low %v2457_v46, %v2461_v5  ;;  %v9701_v46 = vcombine.high %v2545_v47, %v2549_v62 }
 0x333   : > { %7441 = vmatprep.subr.bf16.mxu1 %v9461_v35  ;;  %v9548_v35 = vcombine.low %v2393_v11, %v2397_v58  ;;  %v9541_v21 = vcombine.high %v2385_v1, %v2389_v48  ;;  %v2537_v11 = vld [vmem:[#allocation9 + $0xf48] sm:$0xff] }
 0x334   : > { %v2541_v58 = vld [vmem:[#allocation9 + $0xf68] sm:$0xff] }
 0x335   : > { %7415 = vmatpush2.bf16.msra.mxu0 %v9396_v0  ;;  %v2377_v0 = vld [vmem:[#allocation9 + $0xa48] sm:$0xff] }
 0x336   : > { %7442 = vmatpush1.bf16.msra.mxu1 %v9460_v19  ;;  %7470 = vmatprep.subr.bf16.mxu0 %v9645_v31  ;;  %v2381_v19 = vld [vmem:[#allocation9 + $0xa68] sm:$0xff]  ;;  %v9604_v31 = vcombine.low %v2449_v14, %v2453_v37  ;;  %v9693_v14 = vcombine.high %v2537_v11, %v2541_v58 }
 0x337   : > { %7443 = vmatprep.subr.bf16.mxu1 %v9581_v8  ;;  %v9540_v8 = vcombine.low %v2385_v1, %v2389_v48  ;;  %v9533_v33 = vcombine.high %v2377_v0, %v2381_v19  ;;  %v2529_v1 = vld [vmem:[#allocation9 + $0xf08] sm:$0xff] }
 0x338   : > { %7417 = vmatmul.mubr.bf16.vlgmr.msra.gmra.mxu0 %v11127_v43  ;;  %v2533_v48 = vld [vmem:[#allocation9 + $0xf28] sm:$0xff] }
 0x339   : > { %7471 = vmatpush1.bf16.msra.mxu0 %v9644_v3  ;;  %7502 = vmatprep.mubr.bf16.mxu0 %v11160_v28  ;;  %v2369_v3 = vld [vmem:[#allocation9 + $0xa08] sm:$0xff] }
 0x33a   : > { %7444 = vmatpush2.bf16.msra.mxu1 %v9580_v25  ;;  %7472 = vmatprep.subr.bf16.mxu0 %v9637_v41  ;;  %v2373_v25 = vld [vmem:[#allocation9 + $0xa28] sm:$0xff]  ;;  %v9596_v41 = vcombine.low %v2441_v2, %v2445_v44  ;;  %v9685_v2 = vcombine.high %v2529_v1, %v2533_v48 }
 0x33b   : > { %7445 = vmatprep.subr.bf16.mxu1 %v9573_v55  ;;  %v9532_v55 = vcombine.low %v2377_v0, %v2381_v19  ;;  %v9525_v27 = vcombine.high %v2369_v3, %v2373_v25  ;;  %v2521_v0 = vld [vmem:[#allocation9 + $0xec8] sm:$0xff] }
 0x33c   : > { %v2525_v19 = vld [vmem:[#allocation9 + $0xee8] sm:$0xff] }
 0x33d   : > { %7473 = vmatpush1.bf16.msra.mxu0 %v9636_v51  ;;  %v2617_v51 = vld [vmem:[#allocation9 + $0x11c8] sm:$0xff] }
 0x33e   : > { %7446 = vmatpush2.bf16.msra.mxu1 %v9572_v63  ;;  %7474 = vmatprep.subr.bf16.mxu0 %v9629_v22  ;;  %v2621_v63 = vld [vmem:[#allocation9 + $0x11e8] sm:$0xff]  ;;  %v9588_v22 = vcombine.low %v2433_v23, %v2437_v59  ;;  %v9677_v23 = vcombine.high %v2521_v0, %v2525_v19 }
 0x33f   : > { %7447 = vmatprep.subr.bf16.mxu1 %v9565_v7  ;;  %v9524_v7 = vcombine.low %v2369_v3, %v2373_v25  ;;  %v9773_v34 = vcombine.high %v2617_v51, %v2621_v63  ;;  %v2513_v3 = vld [vmem:[#allocation9 + $0xe88] sm:$0xff] }
 0x340   : > { %v2517_v25 = vld [vmem:[#allocation9 + $0xea8] sm:$0xff] }
 0x341   : > { %7475 = vmatpush1.bf16.msra.mxu0 %v9628_v16  ;;  %v2609_v16 = vld [vmem:[#allocation9 + $0x1188] sm:$0xff] }
 0x342   : > { %7448 = vmatpush2.bf16.msra.mxu1 %v9564_v36  ;;  %7476 = vmatprep.subr.bf16.mxu0 %v9621_v39  ;;  %v2613_v36 = vld [vmem:[#allocation9 + $0x11a8] sm:$0xff]  ;;  %v9708_v39 = vcombine.low %v2553_v4, %v2557_v57  ;;  %v9669_v4 = vcombine.high %v2513_v3, %v2517_v25 }
 0x343   : > { %7449 = vmatprep.subr.bf16.mxu1 %v9557_v50  ;;  %v9772_v50 = vcombine.low %v2617_v51, %v2621_v63  ;;  %v9765_v5 = vcombine.high %v2609_v16, %v2613_v36  ;;  %v2505_v51 = vld [vmem:[#allocation9 + $0xe48] sm:$0xff] }
 0x344   : > { %v2509_v63 = vld [vmem:[#allocation9 + $0xe68] sm:$0xff] }
 0x345   : > { %7477 = vmatpush1.bf16.msra.mxu0 %v9620_v6  ;;  %v2601_v6 = vld [vmem:[#allocation9 + $0x1148] sm:$0xff] }
 0x346   : > { %7450 = vmatpush2.bf16.msra.mxu1 %v9556_v53  ;;  %7478 = vmatprep.subr.bf16.mxu0 %v9613_v26  ;;  %v2605_v53 = vld [vmem:[#allocation9 + $0x1168] sm:$0xff]  ;;  %v9700_v26 = vcombine.low %v2545_v47, %v2549_v62  ;;  %v9661_v47 = vcombine.high %v2505_v51, %v2509_v63 }
 0x347   : > { %7451 = vmatprep.subr.bf16.mxu1 %v9549_v30  ;;  %v9764_v30 = vcombine.low %v2609_v16, %v2613_v36  ;;  %v9757_v37 = vcombine.high %v2601_v6, %v2605_v53  ;;  %v2497_v16 = vld [vmem:[#allocation9 + $0xe08] sm:$0xff] }
 0x348   : > { %v2501_v36 = vld [vmem:[#allocation9 + $0xe28] sm:$0xff] }
 0x349   : > { %7479 = vmatpush1.bf16.msra.mxu0 %v9612_v13  ;;  %v2593_v13 = vld [vmem:[#allocation9 + $0x1108] sm:$0xff] }
 0x34a   : > { %7452 = vmatpush2.bf16.msra.mxu1 %v9548_v35  ;;  %7480 = vmatprep.subr.bf16.mxu0 %v9605_v29  ;;  %v2597_v35 = vld [vmem:[#allocation9 + $0x1128] sm:$0xff]  ;;  %v9692_v29 = vcombine.low %v2537_v11, %v2541_v58  ;;  %v9653_v11 = vcombine.high %v2497_v16, %v2501_v36 }
 0x34b   : > { %7453 = vmatprep.subr.bf16.mxu1 %v9541_v21  ;;  %v9756_v21 = vcombine.low %v2601_v6, %v2605_v53  ;;  %v9749_v44 = vcombine.high %v2593_v13, %v2597_v35  ;;  %v2745_v6 = vld [vmem:[#allocation9 + $0x15c8] sm:$0xff] }
 0x34c   : > { %v2749_v53 = vld [vmem:[#allocation9 + $0x15e8] sm:$0xff] }
 0x34d   : > { %7481 = vmatpush1.bf16.msra.mxu0 %v9604_v31  ;;  %v2585_v31 = vld [vmem:[#allocation9 + $0x10c8] sm:$0xff] }
 0x34e   : > { %7454 = vmatpush2.bf16.msra.mxu1 %v9540_v8  ;;  %7482 = vmatprep.subr.bf16.mxu0 %v9597_v24  ;;  %v2589_v8 = vld [vmem:[#allocation9 + $0x10e8] sm:$0xff]  ;;  %v9684_v24 = vcombine.low %v2529_v1, %v2533_v48  ;;  %v9901_v1 = vcombine.high %v2745_v6, %v2749_v53 }
 0x34f   : > { %7455 = vmatprep.subr.bf16.mxu1 %v9533_v33  ;;  %v9748_v33 = vcombine.low %v2593_v13, %v2597_v35  ;;  %v9741_v59 = vcombine.high %v2585_v31, %v2589_v8  ;;  %v2737_v13 = vld [vmem:[#allocation9 + $0x1588] sm:$0xff] }
 0x350   : > { %v2741_v35 = vld [vmem:[#allocation9 + $0x15a8] sm:$0xff] }
 0x351   : > { %7483 = vmatpush1.bf16.msra.mxu0 %v9596_v41  ;;  %v2577_v41 = vld [vmem:[#allocation9 + $0x1088] sm:$0xff] }
 0x352   : > { %7456 = vmatpush2.bf16.msra.mxu1 %v9532_v55  ;;  %7484 = vmatprep.subr.bf16.mxu0 %v9589_v61  ;;  %v2581_v55 = vld [vmem:[#allocation9 + $0x10a8] sm:$0xff]  ;;  %v9676_v61 = vcombine.low %v2521_v0, %v2525_v19  ;;  %v9893_v0 = vcombine.high %v2737_v13, %v2741_v35 }
 0x353   : > { %7457 = vmatprep.subr.bf16.mxu1 %v9525_v27  ;;  %v9740_v27 = vcombine.low %v2585_v31, %v2589_v8  ;;  %v9733_v57 = vcombine.high %v2577_v41, %v2581_v55  ;;  %v2729_v31 = vld [vmem:[#allocation9 + $0x1548] sm:$0xff] }
 0x354   : > { %v2733_v8 = vld [vmem:[#allocation9 + $0x1568] sm:$0xff] }
 0x355   : > { %7485 = vmatpush1.bf16.msra.mxu0 %v9588_v22  ;;  %v2569_v22 = vld [vmem:[#allocation9 + $0x1048] sm:$0xff] }
 0x356   : > { %7458 = vmatpush2.bf16.msra.mxu1 %v9524_v7  ;;  %7486 = vmatprep.subr.bf16.mxu0 %v9709_v42  ;;  %v2573_v7 = vld [vmem:[#allocation9 + $0x1068] sm:$0xff]  ;;  %v9668_v42 = vcombine.low %v2513_v3, %v2517_v25  ;;  %v9885_v3 = vcombine.high %v2729_v31, %v2733_v8 }
 0x357   : > { %7513 = vmatprep.subr.bf16.mxu1 %v9773_v34  ;;  %v9732_v34 = vcombine.low %v2577_v41, %v2581_v55  ;;  %v9725_v62 = vcombine.high %v2569_v22, %v2573_v7  ;;  %v2721_v41 = vld [vmem:[#allocation9 + $0x1508] sm:$0xff] }
 0x358   : > { %v2725_v55 = vld [vmem:[#allocation9 + $0x1528] sm:$0xff] }
 0x359   : > { %7460 = vmatmul.mubr.bf16.vlgmr.msra.gmra.mxu1 %v11201_v18  ;;  %7487 = vmatpush2.bf16.msra.mxu0 %v9708_v39  ;;  %v2561_v39 = vld [vmem:[#allocation9 + $0x1008] sm:$0xff] }
 0x35a   : > { %7514 = vmatpush1.bf16.msra.mxu1 %v9772_v50  ;;  %7545 = vmatprep.mubr.bf16.mxu1 %v11205_v45  ;;  %v2565_v50 = vld [vmem:[#allocation9 + $0x1028] sm:$0xff] }
 0x35b   : > { %7488 = vmatprep.subr.bf16.mxu0 %v9701_v46  ;;  %7515 = vmatprep.subr.bf16.mxu1 %v9765_v5  ;;  %v9660_v46 = vcombine.low %v2505_v51, %v2509_v63  ;;  %v9724_v5 = vcombine.low %v2569_v22, %v2573_v7  ;;  %v9717_v58 = vcombine.high %v2561_v39, %v2565_v50  ;;  %v2713_v22 = vld [vmem:[#allocation9 + $0x14c8] sm:$0xff] }
 0x35c   : > { %v9877_v51 = vcombine.high %v2721_v41, %v2725_v55  ;;  %v2717_v7 = vld [vmem:[#allocation9 + $0x14e8] sm:$0xff] }
 0x35d   : > { %7489 = vmatpush2.bf16.msra.mxu0 %v9700_v26  ;;  %v2681_v26 = vld [vmem:[#allocation9 + $0x13c8] sm:$0xff] }
 0x35e   : > { %7516 = vmatpush1.bf16.msra.mxu1 %v9764_v30  ;;  %7490 = vmatprep.subr.bf16.mxu0 %v9693_v14  ;;  %v2685_v30 = vld [vmem:[#allocation9 + $0x13e8] sm:$0xff]  ;;  %v9652_v14 = vcombine.low %v2497_v16, %v2501_v36  ;;  %v9869_v16 = vcombine.high %v2713_v22, %v2717_v7 }
 0x35f   : > { %7517 = vmatprep.subr.bf16.mxu1 %v9757_v37  ;;  %v9716_v37 = vcombine.low %v2561_v39, %v2565_v50  ;;  %v9837_v48 = vcombine.high %v2681_v26, %v2685_v30  ;;  %v2705_v39 = vld [vmem:[#allocation9 + $0x1488] sm:$0xff] }
 0x360   : > { %v2709_v50 = vld [vmem:[#allocation9 + $0x14a8] sm:$0xff] }
 0x361   : > { %7491 = vmatpush2.bf16.msra.mxu0 %v9692_v29  ;;  %v2673_v29 = vld [vmem:[#allocation9 + $0x1388] sm:$0xff] }
 0x362   : > { %7518 = vmatpush1.bf16.msra.mxu1 %v9756_v21  ;;  %7492 = vmatprep.subr.bf16.mxu0 %v9685_v2  ;;  %v2677_v21 = vld [vmem:[#allocation9 + $0x13a8] sm:$0xff]  ;;  %v9900_v2 = vcombine.low %v2745_v6, %v2749_v53  ;;  %v9861_v6 = vcombine.high %v2705_v39, %v2709_v50 }
 0x363   : > { %7519 = vmatprep.subr.bf16.mxu1 %v9749_v44  ;;  %v9836_v44 = vcombine.low %v2681_v26, %v2685_v30  ;;  %v9829_v19 = vcombine.high %v2673_v29, %v2677_v21  ;;  %v2697_v26 = vld [vmem:[#allocation9 + $0x1448] sm:$0xff] }
 0x364   : > { %v2701_v30 = vld [vmem:[#allocation9 + $0x1468] sm:$0xff] }
 0x365   : > { %7493 = vmatpush2.bf16.msra.mxu0 %v9684_v24  ;;  %v2665_v24 = vld [vmem:[#allocation9 + $0x1348] sm:$0xff] }
 0x366   : > { %7520 = vmatpush1.bf16.msra.mxu1 %v9748_v33  ;;  %7494 = vmatprep.subr.bf16.mxu0 %v9677_v23  ;;  %v2669_v33 = vld [vmem:[#allocation9 + $0x1368] sm:$0xff]  ;;  %v9892_v23 = vcombine.low %v2737_v13, %v2741_v35  ;;  %v9853_v13 = vcombine.high %v2697_v26, %v2701_v30 }
 0x367   : > { %7521 = vmatprep.subr.bf16.mxu1 %v9741_v59  ;;  %v9828_v59 = vcombine.low %v2673_v29, %v2677_v21  ;;  %v9821_v25 = vcombine.high %v2665_v24, %v2669_v33  ;;  %v2689_v29 = vld [vmem:[#allocation9 + $0x1408] sm:$0xff] }
 0x368   : > { %v2693_v21 = vld [vmem:[#allocation9 + $0x1428] sm:$0xff] }
 0x369   : > { %7495 = vmatpush2.bf16.msra.mxu0 %v9676_v61  ;;  %v2657_v61 = vld [vmem:[#allocation9 + $0x1308] sm:$0xff] }
 0x36a   : > { %7522 = vmatpush1.bf16.msra.mxu1 %v9740_v27  ;;  %7496 = vmatprep.subr.bf16.mxu0 %v9669_v4  ;;  %v2661_v27 = vld [vmem:[#allocation9 + $0x1328] sm:$0xff]  ;;  %v9884_v4 = vcombine.low %v2729_v31, %v2733_v8  ;;  %v9845_v31 = vcombine.high %v2689_v29, %v2693_v21 }
 0x36b   : > { %7523 = vmatprep.subr.bf16.mxu1 %v9733_v57  ;;  %v9820_v57 = vcombine.low %v2665_v24, %v2669_v33  ;;  %v9813_v63 = vcombine.high %v2657_v61, %v2661_v27  ;;  %v2809_v24 = vld [vmem:[#allocation9 + $0x17c8] sm:$0xff] }
 0x36c   : > { %v2813_v33 = vld [vmem:[#allocation9 + $0x17e8] sm:$0xff] }
 0x36d   : > { %7497 = vmatpush2.bf16.msra.mxu0 %v9668_v42  ;;  %v2649_v42 = vld [vmem:[#allocation9 + $0x12c8] sm:$0xff] }
 0x36e   : > { %7524 = vmatpush1.bf16.msra.mxu1 %v9732_v34  ;;  %7498 = vmatprep.subr.bf16.mxu0 %v9661_v47  ;;  %v2653_v34 = vld [vmem:[#allocation9 + $0x12e8] sm:$0xff]  ;;  %v9876_v47 = vcombine.low %v2721_v41, %v2725_v55  ;;  %v9965_v41 = vcombine.high %v2809_v24, %v2813_v33 }
 0x36f   : > { %7525 = vmatprep.subr.bf16.mxu1 %v9725_v62  ;;  %v9812_v62 = vcombine.low %v2657_v61, %v2661_v27  ;;  %v9805_v36 = vcombine.high %v2649_v42, %v2653_v34  ;;  %v2801_v61 = vld [vmem:[#allocation9 + $0x1788] sm:$0xff] }
 0x370   : > { %v2805_v27 = vld [vmem:[#allocation9 + $0x17a8] sm:$0xff] }
 0x371   : > { %7499 = vmatpush2.bf16.msra.mxu0 %v9660_v46  ;;  %v2641_v46 = vld [vmem:[#allocation9 + $0x1288] sm:$0xff] }
 0x372   : > { %7526 = vmatpush1.bf16.msra.mxu1 %v9724_v5  ;;  %7500 = vmatprep.subr.bf16.mxu0 %v9653_v11  ;;  %v2645_v5 = vld [vmem:[#allocation9 + $0x12a8] sm:$0xff]  ;;  %v9868_v11 = vcombine.low %v2713_v22, %v2717_v7  ;;  %v9957_v22 = vcombine.high %v2801_v61, %v2805_v27 }
 0x373   : > { %7527 = vmatprep.subr.bf16.mxu1 %v9717_v58  ;;  %v9804_v58 = vcombine.low %v2649_v42, %v2653_v34  ;;  %v9797_v53 = vcombine.high %v2641_v46, %v2645_v5  ;;  %v2793_v42 = vld [vmem:[#allocation9 + $0x1748] sm:$0xff] }
 0x374   : > { %v2797_v34 = vld [vmem:[#allocation9 + $0x1768] sm:$0xff] }
 0x375   : > { %7501 = vmatpush2.bf16.msra.mxu0 %v9652_v14  ;;  %v2633_v14 = vld [vmem:[#allocation9 + $0x1248] sm:$0xff] }
 0x376   : > { %7528 = vmatpush1.bf16.msra.mxu1 %v9716_v37  ;;  %7556 = vmatprep.subr.bf16.mxu0 %v9901_v1  ;;  %v2637_v37 = vld [vmem:[#allocation9 + $0x1268] sm:$0xff]  ;;  %v9860_v1 = vcombine.low %v2705_v39, %v2709_v50  ;;  %v9949_v39 = vcombine.high %v2793_v42, %v2797_v34 }
 0x377   : > { %7529 = vmatprep.subr.bf16.mxu1 %v9837_v48  ;;  %v9796_v48 = vcombine.low %v2641_v46, %v2645_v5  ;;  %v9789_v35 = vcombine.high %v2633_v14, %v2637_v37  ;;  %v2785_v46 = vld [vmem:[#allocation9 + $0x1708] sm:$0xff] }
 0x378   : > { %7503 = vmatmul.mubr.bf16.vlgmr.msra.gmra.mxu0 %v11203_v60  ;;  %v2789_v5 = vld [vmem:[#allocation9 + $0x1728] sm:$0xff] }
 0x379   : > { %7557 = vmatpush1.bf16.msra.mxu0 %v9900_v2  ;;  %7588 = vmatprep.mubr.bf16.mxu0 %v11208_v54  ;;  %v2625_v2 = vld [vmem:[#allocation9 + $0x1208] sm:$0xff] }
 0x37a   : > { %7530 = vmatpush2.bf16.msra.mxu1 %v9836_v44  ;;  %7558 = vmatprep.subr.bf16.mxu0 %v9893_v0  ;;  %v2629_v44 = vld [vmem:[#allocation9 + $0x1228] sm:$0xff]  ;;  %v9852_v0 = vcombine.low %v2697_v26, %v2701_v30  ;;  %v9941_v26 = vcombine.high %v2785_v46, %v2789_v5 }
 0x37b   : > { %7531 = vmatprep.subr.bf16.mxu1 %v9829_v19  ;;  %v9788_v19 = vcombine.low %v2633_v14, %v2637_v37  ;;  %v9781_v8 = vcombine.high %v2625_v2, %v2629_v44  ;;  %v2777_v14 = vld [vmem:[#allocation9 + $0x16c8] sm:$0xff] }
 0x37c   : > { %v2781_v37 = vld [vmem:[#allocation9 + $0x16e8] sm:$0xff] }
 0x37d   : > { %7559 = vmatpush1.bf16.msra.mxu0 %v9892_v23  ;;  %v2873_v23 = vld [vmem:[#allocation9 + $0x19c8] sm:$0xff] }
 0x37e   : > { %7532 = vmatpush2.bf16.msra.mxu1 %v9828_v59  ;;  %7560 = vmatprep.subr.bf16.mxu0 %v9885_v3  ;;  %v2877_v59 = vld [vmem:[#allocation9 + $0x19e8] sm:$0xff]  ;;  %v9844_v3 = vcombine.low %v2689_v29, %v2693_v21  ;;  %v9933_v29 = vcombine.high %v2777_v14, %v2781_v37 }
 0x37f   : > { %7533 = vmatprep.subr.bf16.mxu1 %v9821_v25  ;;  %v9780_v25 = vcombine.low %v2625_v2, %v2629_v44  ;;  %v10029_v55 = vcombine.high %v2873_v23, %v2877_v59  ;;  %v2769_v2 = vld [vmem:[#allocation9 + $0x1688] sm:$0xff] }
 0x380   : > { %v2773_v44 = vld [vmem:[#allocation9 + $0x16a8] sm:$0xff] }
 0x381   : > { %7561 = vmatpush1.bf16.msra.mxu0 %v9884_v4  ;;  %v2865_v4 = vld [vmem:[#allocation9 + $0x1988] sm:$0xff] }
 0x382   : > { %7534 = vmatpush2.bf16.msra.mxu1 %v9820_v57  ;;  %7562 = vmatprep.subr.bf16.mxu0 %v9877_v51  ;;  %v2869_v57 = vld [vmem:[#allocation9 + $0x19a8] sm:$0xff]  ;;  %v9964_v51 = vcombine.low %v2809_v24, %v2813_v33  ;;  %v9925_v24 = vcombine.high %v2769_v2, %v2773_v44 }
 0x383   : > { %7535 = vmatprep.subr.bf16.mxu1 %v9813_v63  ;;  %v10028_v63 = vcombine.low %v2873_v23, %v2877_v59  ;;  %v10021_v7 = vcombine.high %v2865_v4, %v2869_v57  ;;  %v2761_v23 = vld [vmem:[#allocation9 + $0x1648] sm:$0xff] }
 0x384   : > { %v2765_v59 = vld [vmem:[#allocation9 + $0x1668] sm:$0xff] }
 0x385   : > { %7563 = vmatpush1.bf16.msra.mxu0 %v9876_v47  ;;  %v2857_v47 = vld [vmem:[#allocation9 + $0x1948] sm:$0xff] }
 0x386   : > { %7536 = vmatpush2.bf16.msra.mxu1 %v9812_v62  ;;  %7564 = vmatprep.subr.bf16.mxu0 %v9869_v16  ;;  %v2861_v62 = vld [vmem:[#allocation9 + $0x1968] sm:$0xff]  ;;  %v9956_v16 = vcombine.low %v2801_v61, %v2805_v27  ;;  %v9917_v61 = vcombine.high %v2761_v23, %v2765_v59 }
 0x387   : > { %7537 = vmatprep.subr.bf16.mxu1 %v9805_v36  ;;  %v10020_v36 = vcombine.low %v2865_v4, %v2869_v57  ;;  %v10013_v50 = vcombine.high %v2857_v47, %v2861_v62  ;;  %v2753_v4 = vld [vmem:[#allocation9 + $0x1608] sm:$0xff] }
 0x388   : > { %v2757_v57 = vld [vmem:[#allocation9 + $0x1628] sm:$0xff] }
 0x389   : > { %7565 = vmatpush1.bf16.msra.mxu0 %v9868_v11  ;;  %v2849_v11 = vld [vmem:[#allocation9 + $0x1908] sm:$0xff] }
 0x38a   : > { %7538 = vmatpush2.bf16.msra.mxu1 %v9804_v58  ;;  %7566 = vmatprep.subr.bf16.mxu0 %v9861_v6  ;;  %v2853_v58 = vld [vmem:[#allocation9 + $0x1928] sm:$0xff]  ;;  %v9948_v6 = vcombine.low %v2793_v42, %v2797_v34  ;;  %v9909_v42 = vcombine.high %v2753_v4, %v2757_v57 }
 0x38b   : > { %7539 = vmatprep.subr.bf16.mxu1 %v9797_v53  ;;  %v10012_v53 = vcombine.low %v2857_v47, %v2861_v62  ;;  %v10005_v30 = vcombine.high %v2849_v11, %v2853_v58  ;;  %v2106_v47 = vld [vmem:[#allocation9 + $0x1d0] sm:$0xff] }
 0x38c   : > { %v2110_v62 = vld [vmem:[#allocation9 + $0x1f0] sm:$0xff] }
 0x38d   : > { %7567 = vmatpush1.bf16.msra.mxu0 %v9860_v1  ;;  %v2841_v1 = vld [vmem:[#allocation9 + $0x18c8] sm:$0xff] }
 0x38e   : > { %7540 = vmatpush2.bf16.msra.mxu1 %v9796_v48  ;;  %7568 = vmatprep.subr.bf16.mxu0 %v9853_v13  ;;  %v2845_v48 = vld [vmem:[#allocation9 + $0x18e8] sm:$0xff]  ;;  %v9940_v13 = vcombine.low %v2785_v46, %v2789_v5  ;;  %v9263_v46 = vcombine.high %v2106_v47, %v2110_v62 }
 0x38f   : > { %7541 = vmatprep.subr.bf16.mxu1 %v9789_v35  ;;  %v10004_v35 = vcombine.low %v2849_v11, %v2853_v58  ;;  %v9997_v21 = vcombine.high %v2841_v1, %v2845_v48  ;;  %v2098_v11 = vld [vmem:[#allocation9 + $0x190] sm:$0xff] }
 0x390   : > { %v2102_v58 = vld [vmem:[#allocation9 + $0x1b0] sm:$0xff] }
 0x391   : > { %7569 = vmatpush1.bf16.msra.mxu0 %v9852_v0  ;;  %v2833_v0 = vld [vmem:[#allocation9 + $0x1888] sm:$0xff] }
 0x392   : > { %7542 = vmatpush2.bf16.msra.mxu1 %v9788_v19  ;;  %7570 = vmatprep.subr.bf16.mxu0 %v9845_v31  ;;  %v2837_v19 = vld [vmem:[#allocation9 + $0x18a8] sm:$0xff]  ;;  %v9932_v31 = vcombine.low %v2777_v14, %v2781_v37  ;;  %v9255_v14 = vcombine.high %v2098_v11, %v2102_v58  ;;  %v2090_v37 = vld [vmem:[#allocation9 + $0x150] sm:$0xff] }
 0x393   : > { %7543 = vmatprep.subr.bf16.mxu1 %v9781_v8  ;;  %v9996_v8 = vcombine.low %v2841_v1, %v2845_v48  ;;  %v9989_v33 = vcombine.high %v2833_v0, %v2837_v19  ;;  %v2094_v1 = vld [vmem:[#allocation9 + $0x170] sm:$0xff] }
 0x395   : > { %7571 = vmatpush1.bf16.msra.mxu0 %v9844_v3  ;;  %v2825_v3 = vld [vmem:[#allocation9 + $0x1848] sm:$0xff] }
 0x396   : > { %7544 = vmatpush2.bf16.msra.mxu1 %v9780_v25  ;;  %7572 = vmatprep.subr.bf16.mxu0 %v9965_v41  ;;  %v2829_v25 = vld [vmem:[#allocation9 + $0x1868] sm:$0xff]  ;;  %v9924_v41 = vcombine.low %v2769_v2, %v2773_v44  ;;  %v9247_v2 = vcombine.high %v2090_v37, %v2094_v1 }
 0x397   : > { %7599 = vmatprep.subr.bf16.mxu1 %v10029_v55  ;;  %v9988_v55 = vcombine.low %v2833_v0, %v2837_v19  ;;  %v9981_v27 = vcombine.high %v2825_v3, %v2829_v25  ;;  %v2082_v0 = vld [vmem:[#allocation9 + $0x110] sm:$0xff] }
 0x398   : > { %v2086_v19 = vld [vmem:[#allocation9 + $0x130] sm:$0xff] }
 0x399   : > { %7546 = vmatmul.mubr.bf16.vlgmr.msra.gmra.mxu1 %v11169_v17  ;;  %7573 = vmatpush2.bf16.msra.mxu0 %v9964_v51  ;;  %v2817_v51 = vld [vmem:[#allocation9 + $0x1808] sm:$0xff] }
 0x39a   : > { %7600 = vmatpush1.bf16.msra.mxu1 %v10028_v63  ;;  %7574 = vmatprep.subr.bf16.mxu0 %v9957_v22  ;;  %v2821_v63 = vld [vmem:[#allocation9 + $0x1828] sm:$0xff]  ;;  %v9916_v22 = vcombine.low %v2761_v23, %v2765_v59  ;;  %v9239_v23 = vcombine.high %v2082_v0, %v2086_v19 }
 0x39b   : > { %7601 = vmatprep.subr.bf16.mxu1 %v10021_v7  ;;  %7631 = vmatprep.mubr.bf16.mxu1 %v11533_v20  ;;  %v9980_v7 = vcombine.low %v2825_v3, %v2829_v25  ;;  %v9973_v34 = vcombine.high %v2817_v51, %v2821_v63  ;;  %v2074_v3 = vld [vmem:[#allocation9 + $0xd0] sm:$0xff] }
 0x39c   : > { %v2078_v25 = vld [vmem:[#allocation9 + $0xf0] sm:$0xff] }
 0x39d   : > { %7575 = vmatpush2.bf16.msra.mxu0 %v9956_v16  ;;  %v2234_v16 = vld [vmem:[#allocation9 + $0x5d0] sm:$0xff] }
 0x39e   : > { %7602 = vmatpush1.bf16.msra.mxu1 %v10020_v36  ;;  %7576 = vmatprep.subr.bf16.mxu0 %v9949_v39  ;;  %v2238_v36 = vld [vmem:[#allocation9 + $0x5f0] sm:$0xff]  ;;  %v9908_v39 = vcombine.low %v2753_v4, %v2757_v57  ;;  %v9231_v4 = vcombine.high %v2074_v3, %v2078_v25 }
 0x39f   : > { %7603 = vmatprep.subr.bf16.mxu1 %v10013_v50  ;;  %v9972_v50 = vcombine.low %v2817_v51, %v2821_v63  ;;  %v9391_v5 = vcombine.high %v2234_v16, %v2238_v36  ;;  %v2066_v51 = vld [vmem:[#allocation9 + $0x90] sm:$0xff] }
 0x3a0   : > { %v2070_v63 = vld [vmem:[#allocation9 + $0xb0] sm:$0xff] }
 0x3a1   : > { %7577 = vmatpush2.bf16.msra.mxu0 %v9948_v6  ;;  %v9262_v6 = vcombine.low %v2106_v47, %v2110_v62  ;;  %v9223_v47 = vcombine.high %v2066_v51, %v2070_v63 }
 0x3a2   : > { %7604 = vmatpush1.bf16.msra.mxu1 %v10012_v53  ;;  %7578 = vmatprep.subr.bf16.mxu0 %v9941_v26  ;;  %v2226_v53 = vld [vmem:[#allocation9 + $0x590] sm:$0xff] }
 0x3a3   : > { %7605 = vmatprep.subr.bf16.mxu1 %v10005_v30  ;;  %v2230_v26 = vld [vmem:[#allocation9 + $0x5b0] sm:$0xff]  ;;  %v9390_v30 = vcombine.low %v2234_v16, %v2238_v36 }
 0x3a4   : > { %v9383_v48 = vcombine.high %v2226_v53, %v2230_v26  ;;  %v2058_v16 = vld [vmem:[#allocation9 + $0x50] sm:$0xff] }
 0x3a5   : > { %7579 = vmatpush2.bf16.msra.mxu0 %v9940_v13  ;;  %v2218_v13 = vld [vmem:[#allocation9 + $0x550] sm:$0xff] }
 0x3a6   : > { %7606 = vmatpush1.bf16.msra.mxu1 %v10004_v35  ;;  %7580 = vmatprep.subr.bf16.mxu0 %v9933_v29  ;;  %v2222_v35 = vld [vmem:[#allocation9 + $0x570] sm:$0xff]  ;;  %v9254_v29 = vcombine.low %v2098_v11, %v2102_v58 }
 0x3a7   : > { %7607 = vmatprep.subr.bf16.mxu1 %v9997_v21  ;;  %v9382_v21 = vcombine.low %v2226_v53, %v2230_v26  ;;  %v9375_v44 = vcombine.high %v2218_v13, %v2222_v35  ;;  %v2062_v36 = vld [vmem:[#allocation9 + $0x70] sm:$0xff] }
 0x3a8   : > { %v9215_v11 = vcombine.high %v2058_v16, %v2062_v36  ;;  %v2054_v53 = vld [vmem:[#allocation9 + $0x30] sm:$0xff] }
 0x3a9   : > { %7581 = vmatpush2.bf16.msra.mxu0 %v9932_v31  ;;  %v2210_v31 = vld [vmem:[#allocation9 + $0x510] sm:$0xff] }
 0x3aa   : > { %7608 = vmatpush1.bf16.msra.mxu1 %v9996_v8  ;;  %7582 = vmatprep.subr.bf16.mxu0 %v9925_v24  ;;  %v2214_v8 = vld [vmem:[#allocation9 + $0x530] sm:$0xff]  ;;  %v9246_v24 = vcombine.low %v2090_v37, %v2094_v1 }
 0x3ab   : > { %7609 = vmatprep.subr.bf16.mxu1 %v9989_v33  ;;  %v9374_v33 = vcombine.low %v2218_v13, %v2222_v35  ;;  %v9367_v59 = vcombine.high %v2210_v31, %v2214_v8  ;;  %v2178_v26 = vld [vmem:[#allocation9 + $0x410] sm:$0xff] }
 0x3ac   : > { %v2170_v13 = vld [vmem:[#allocation9 + $0x3d0] sm:$0xff] }
 0x3ad   : > { %7583 = vmatpush2.bf16.msra.mxu0 %v9924_v41  ;;  %v2202_v41 = vld [vmem:[#allocation9 + $0x4d0] sm:$0xff] }
 0x3ae   : > { %7610 = vmatpush1.bf16.msra.mxu1 %v9988_v55  ;;  %7584 = vmatprep.subr.bf16.mxu0 %v9917_v61  ;;  %v2206_v55 = vld [vmem:[#allocation9 + $0x4f0] sm:$0xff]  ;;  %v9238_v61 = vcombine.low %v2082_v0, %v2086_v19 }
 0x3af   : > { %7611 = vmatprep.subr.bf16.mxu1 %v9981_v27  ;;  %v9366_v27 = vcombine.low %v2210_v31, %v2214_v8  ;;  %v9359_v57 = vcombine.high %v2202_v41, %v2206_v55  ;;  %v2174_v35 = vld [vmem:[#allocation9 + $0x3f0] sm:$0xff] }
 0x3b0   : > { %v9327_v0 = vcombine.high %v2170_v13, %v2174_v35  ;;  %v2162_v31 = vld [vmem:[#allocation9 + $0x390] sm:$0xff] }
 0x3b1   : > { %7585 = vmatpush2.bf16.msra.mxu0 %v9916_v22  ;;  %v2194_v22 = vld [vmem:[#allocation9 + $0x490] sm:$0xff] }
 0x3b2   : > { %7612 = vmatpush1.bf16.msra.mxu1 %v9980_v7  ;;  %7586 = vmatprep.subr.bf16.mxu0 %v9909_v42  ;;  %v2198_v7 = vld [vmem:[#allocation9 + $0x4b0] sm:$0xff]  ;;  %v9230_v42 = vcombine.low %v2074_v3, %v2078_v25 }
 0x3b3   : > { %7613 = vmatprep.subr.bf16.mxu1 %v9973_v34  ;;  %v9358_v34 = vcombine.low %v2202_v41, %v2206_v55  ;;  %v9351_v62 = vcombine.high %v2194_v22, %v2198_v7  ;;  %v2166_v8 = vld [vmem:[#allocation9 + $0x3b0] sm:$0xff] }
 0x3b4   : > { %v9319_v3 = vcombine.high %v2162_v31, %v2166_v8  ;;  %v2154_v41 = vld [vmem:[#allocation9 + $0x350] sm:$0xff] }
 0x3b5   : > { %7587 = vmatpush2.bf16.msra.mxu0 %v9908_v39  ;;  %v2186_v39 = vld [vmem:[#allocation9 + $0x450] sm:$0xff] }
 0x3b6   : > { %7614 = vmatpush1.bf16.msra.mxu1 %v9972_v50  ;;  %7642 = vmatprep.subr.bf16.mxu0 %v9263_v46  ;;  %v2190_v50 = vld [vmem:[#allocation9 + $0x470] sm:$0xff]  ;;  %v9222_v46 = vcombine.low %v2066_v51, %v2070_v63 }
 0x3b7   : > { %7685 = vmatprep.subr.bf16.mxu1 %v9391_v5  ;;  %v9350_v5 = vcombine.low %v2194_v22, %v2198_v7  ;;  %v9343_v58 = vcombine.high %v2186_v39, %v2190_v50  ;;  %v9342_v37 = vcombine.low %v2186_v39, %v2190_v50  ;;  %v2158_v55 = vld [vmem:[#allocation9 + $0x370] sm:$0xff] }
 0x3b8   : > { %7589 = vmatmul.mubr.bf16.vlgmr.msra.gmra.mxu0 %v11171_v49  ;;  %v9311_v51 = vcombine.high %v2154_v41, %v2158_v55  ;;  %v2146_v22 = vld [vmem:[#allocation9 + $0x310] sm:$0xff] }
 0x3b9   : > { %7632 = vmatmul.mubr.bf16.vlgmr.msra.gmra.mxu1 %v11176_v40  ;;  %7643 = vmatpush1.bf16.msra.mxu0 %v9262_v6  ;;  %v2050_v6 = vld [vmem:[#allocation9 + $0x10] sm:$0xff] }
 0x3ba   : > { %7674 = vmatprep.mubr.bf16.mxu0 %v11119_v56  ;;  %7686 = vmatpush1.bf16.msra.mxu1 %v9390_v30  ;;  %v2182_v30 = vld [vmem:[#allocation9 + $0x430] sm:$0xff]  ;;  %v9207_v1 = vcombine.high %v2050_v6, %v2054_v53 }
 0x3bb   : > { %7717 = vmatprep.mubr.bf16.mxu1 %v11121_v32  ;;  %7644 = vmatprep.subr.bf16.mxu0 %v9255_v14  ;;  %v9214_v14 = vcombine.low %v2058_v16, %v2062_v36  ;;  %v2150_v7 = vld [vmem:[#allocation9 + $0x330] sm:$0xff] }
 0x3bc   : > { %7687 = vmatprep.subr.bf16.mxu1 %v9383_v48  ;;  %v9335_v48 = vcombine.high %v2178_v26, %v2182_v30  ;;  %v9303_v16 = vcombine.high %v2146_v22, %v2150_v7  ;;  %v2138_v39 = vld [vmem:[#allocation9 + $0x2d0] sm:$0xff] }
 0x3bd   : > { %7645 = vmatpush1.bf16.msra.mxu0 %v9254_v29  ;;  %v2298_v29 = vld [vmem:[#allocation9 + $0x7d0] sm:$0xff] }
 0x3be   : > { %7688 = vmatpush1.bf16.msra.mxu1 %v9382_v21  ;;  %7646 = vmatprep.subr.bf16.mxu0 %v9247_v2  ;;  %v2302_v21 = vld [vmem:[#allocation9 + $0x7f0] sm:$0xff]  ;;  %v9206_v2 = vcombine.low %v2050_v6, %v2054_v53 }
 0x3bf   : > { %7689 = vmatprep.subr.bf16.mxu1 %v9375_v44  ;;  %v9334_v44 = vcombine.low %v2178_v26, %v2182_v30  ;;  %v9455_v19 = vcombine.high %v2298_v29, %v2302_v21  ;;  %v2142_v50 = vld [vmem:[#allocation9 + $0x2f0] sm:$0xff] }
 0x3c0   : > { %v9295_v6 = vcombine.high %v2138_v39, %v2142_v50  ;;  %v2130_v26 = vld [vmem:[#allocation9 + $0x290] sm:$0xff] }
 0x3c1   : > { %7647 = vmatpush1.bf16.msra.mxu0 %v9246_v24  ;;  %v2290_v24 = vld [vmem:[#allocation9 + $0x790] sm:$0xff] }
 0x3c2   : > { %7690 = vmatpush1.bf16.msra.mxu1 %v9374_v33  ;;  %7648 = vmatprep.subr.bf16.mxu0 %v9239_v23  ;;  %v2294_v33 = vld [vmem:[#allocation9 + $0x7b0] sm:$0xff]  ;;  %v9326_v23 = vcombine.low %v2170_v13, %v2174_v35 }
 0x3c3   : > { %7691 = vmatprep.subr.bf16.mxu1 %v9367_v59  ;;  %v9454_v59 = vcombine.low %v2298_v29, %v2302_v21  ;;  %v9447_v25 = vcombine.high %v2290_v24, %v2294_v33  ;;  %v2134_v30 = vld [vmem:[#allocation9 + $0x2b0] sm:$0xff] }
 0x3c4   : > { %v9287_v13 = vcombine.high %v2130_v26, %v2134_v30  ;;  %v2122_v29 = vld [vmem:[#allocation9 + $0x250] sm:$0xff] }
 0x3c5   : > { %7649 = vmatpush1.bf16.msra.mxu0 %v9238_v61  ;;  %v2282_v61 = vld [vmem:[#allocation9 + $0x750] sm:$0xff] }
 0x3c6   : > { %7692 = vmatpush1.bf16.msra.mxu1 %v9366_v27  ;;  %7650 = vmatprep.subr.bf16.mxu0 %v9231_v4  ;;  %v2286_v27 = vld [vmem:[#allocation9 + $0x770] sm:$0xff]  ;;  %v9318_v4 = vcombine.low %v2162_v31, %v2166_v8 }
 0x3c7   : > { %7693 = vmatprep.subr.bf16.mxu1 %v9359_v57  ;;  %v9446_v57 = vcombine.low %v2290_v24, %v2294_v33  ;;  %v9439_v63 = vcombine.high %v2282_v61, %v2286_v27  ;;  %v2126_v21 = vld [vmem:[#allocation9 + $0x270] sm:$0xff] }
 0x3c8   : > { %v9279_v31 = vcombine.high %v2122_v29, %v2126_v21  ;;  %v2114_v24 = vld [vmem:[#allocation9 + $0x210] sm:$0xff] }
 0x3c9   : > { %7651 = vmatpush1.bf16.msra.mxu0 %v9230_v42  ;;  %v2274_v42 = vld [vmem:[#allocation9 + $0x710] sm:$0xff] }
 0x3ca   : > { %7694 = vmatpush1.bf16.msra.mxu1 %v9358_v34  ;;  %7652 = vmatprep.subr.bf16.mxu0 %v9223_v47  ;;  %v2278_v34 = vld [vmem:[#allocation9 + $0x730] sm:$0xff]  ;;  %v9310_v47 = vcombine.low %v2154_v41, %v2158_v55 }
 0x3cb   : > { %7695 = vmatprep.subr.bf16.mxu1 %v9351_v62  ;;  %v9438_v62 = vcombine.low %v2282_v61, %v2286_v27  ;;  %v9431_v36 = vcombine.high %v2274_v42, %v2278_v34  ;;  %v2118_v33 = vld [vmem:[#allocation9 + $0x230] sm:$0xff] }
 0x3cc   : > { %v9271_v41 = vcombine.high %v2114_v24, %v2118_v33  ;;  %v2362_v61 = vld [vmem:[#allocation9 + $0x9d0] sm:$0xff] }
 0x3cd   : > { %7653 = vmatpush1.bf16.msra.mxu0 %v9222_v46  ;;  %v2266_v46 = vld [vmem:[#allocation9 + $0x6d0] sm:$0xff] }
 0x3ce   : > { %7696 = vmatpush1.bf16.msra.mxu1 %v9350_v5  ;;  %7654 = vmatprep.subr.bf16.mxu0 %v9215_v11  ;;  %v2270_v5 = vld [vmem:[#allocation9 + $0x6f0] sm:$0xff]  ;;  %v9302_v11 = vcombine.low %v2146_v22, %v2150_v7 }
 0x3cf   : > { %7697 = vmatprep.subr.bf16.mxu1 %v9343_v58  ;;  %v9430_v58 = vcombine.low %v2274_v42, %v2278_v34  ;;  %v9423_v53 = vcombine.high %v2266_v46, %v2270_v5  ;;  %v2366_v27 = vld [vmem:[#allocation9 + $0x9f0] sm:$0xff] }
 0x3d0   : > { %v9519_v22 = vcombine.high %v2362_v61, %v2366_v27  ;;  %v2354_v42 = vld [vmem:[#allocation9 + $0x990] sm:$0xff] }
 0x3d1   : > { %7655 = vmatpush1.bf16.msra.mxu0 %v9214_v14  ;;  %v2258_v14 = vld [vmem:[#allocation9 + $0x690] sm:$0xff] }
 0x3d2   : > { %7698 = vmatpush1.bf16.msra.mxu1 %v9342_v37  ;;  %7656 = vmatprep.subr.bf16.mxu0 %v9207_v1  ;;  %v2262_v37 = vld [vmem:[#allocation9 + $0x6b0] sm:$0xff]  ;;  %v9294_v1 = vcombine.low %v2138_v39, %v2142_v50 }
 0x3d3   : > { %7699 = vmatprep.subr.bf16.mxu1 %v9335_v48  ;;  %v9422_v48 = vcombine.low %v2266_v46, %v2270_v5  ;;  %v9415_v35 = vcombine.high %v2258_v14, %v2262_v37  ;;  %v2358_v34 = vld [vmem:[#allocation9 + $0x9b0] sm:$0xff] }
 0x3d4   : > { %v9511_v39 = vcombine.high %v2354_v42, %v2358_v34  ;;  %v2346_v50 = vld [vmem:[#allocation9 + $0x950] sm:$0xff] }
 0x3d5   : > { %7657 = vmatpush1.bf16.msra.mxu0 %v9206_v2  ;;  %v2250_v2 = vld [vmem:[#allocation9 + $0x650] sm:$0xff] }
 0x3d6   : > { %7700 = vmatpush1.bf16.msra.mxu1 %v9334_v44  ;;  %7658 = vmatprep.subr.bf16.mxu0 %v9327_v0  ;;  %v2254_v44 = vld [vmem:[#allocation9 + $0x670] sm:$0xff]  ;;  %v9286_v0 = vcombine.low %v2130_v26, %v2134_v30 }
 0x3d7   : > { %7701 = vmatprep.subr.bf16.mxu1 %v9455_v19  ;;  %v9414_v19 = vcombine.low %v2258_v14, %v2262_v37  ;;  %v9407_v8 = vcombine.high %v2250_v2, %v2254_v44  ;;  %v2350_v46 = vld [vmem:[#allocation9 + $0x970] sm:$0xff] }
 0x3d8   : > { %v9503_v26 = vcombine.high %v2346_v50, %v2350_v46  ;;  %v2338_v14 = vld [vmem:[#allocation9 + $0x910] sm:$0xff] }
 0x3d9   : > { %7659 = vmatpush2.bf16.msra.mxu0 %v9326_v23  ;;  %v2242_v23 = vld [vmem:[#allocation9 + $0x610] sm:$0xff] }
 0x3da   : > { %7702 = vmatpush2.bf16.msra.mxu1 %v9454_v59  ;;  %7660 = vmatprep.subr.bf16.mxu0 %v9319_v3  ;;  %v2246_v59 = vld [vmem:[#allocation9 + $0x630] sm:$0xff]  ;;  %v9278_v3 = vcombine.low %v2122_v29, %v2126_v21 }
 0x3db   : > { %7703 = vmatprep.subr.bf16.mxu1 %v9447_v25  ;;  %v9406_v25 = vcombine.low %v2250_v2, %v2254_v44  ;;  %v9399_v55 = vcombine.high %v2242_v23, %v2246_v59  ;;  %v2342_v37 = vld [vmem:[#allocation9 + $0x930] sm:$0xff] }
 0x3dc   : > { %v9495_v29 = vcombine.high %v2338_v14, %v2342_v37  ;;  %v2330_v2 = vld [vmem:[#allocation9 + $0x8d0] sm:$0xff] }
 0x3dd   : > { %7661 = vmatpush2.bf16.msra.mxu0 %v9318_v4  ;;  %v2490_v4 = vld [vmem:[#allocation9 + $0xdd0] sm:$0xff] }
 0x3de   : > { %7704 = vmatpush2.bf16.msra.mxu1 %v9446_v57  ;;  %7662 = vmatprep.subr.bf16.mxu0 %v9311_v51  ;;  %v2494_v57 = vld [vmem:[#allocation9 + $0xdf0] sm:$0xff]  ;;  %v9270_v51 = vcombine.low %v2114_v24, %v2118_v33 }
 0x3df   : > { %7705 = vmatprep.subr.bf16.mxu1 %v9439_v63  ;;  %v9398_v63 = vcombine.low %v2242_v23, %v2246_v59  ;;  %v9647_v7 = vcombine.high %v2490_v4, %v2494_v57  ;;  %v2334_v44 = vld [vmem:[#allocation9 + $0x8f0] sm:$0xff] }
 0x3e0   : > { %v9487_v24 = vcombine.high %v2330_v2, %v2334_v44  ;;  %v2322_v23 = vld [vmem:[#allocation9 + $0x890] sm:$0xff] }
 0x3e1   : > { %7663 = vmatpush2.bf16.msra.mxu0 %v9310_v47  ;;  %v9518_v47 = vcombine.low %v2362_v61, %v2366_v27  ;;  %v2326_v59 = vld [vmem:[#allocation9 + $0x8b0] sm:$0xff] }
 0x3e2   : > { %7706 = vmatpush2.bf16.msra.mxu1 %v9438_v62  ;;  %7664 = vmatprep.subr.bf16.mxu0 %v9303_v16  ;;  %v2482_v62 = vld [vmem:[#allocation9 + $0xd90] sm:$0xff]  ;;  %v9479_v61 = vcombine.high %v2322_v23, %v2326_v59 }
 0x3e3   : > { %7707 = vmatprep.subr.bf16.mxu1 %v9431_v36  ;;  %v2486_v16 = vld [vmem:[#allocation9 + $0xdb0] sm:$0xff]  ;;  %v9646_v36 = vcombine.low %v2490_v4, %v2494_v57 }
 0x3e4   : > { %v9639_v5 = vcombine.high %v2482_v62, %v2486_v16  ;;  %v2314_v4 = vld [vmem:[#allocation9 + $0x850] sm:$0xff] }
 0x3e5   : > { %7665 = vmatpush2.bf16.msra.mxu0 %v9302_v11  ;;  %v2474_v11 = vld [vmem:[#allocation9 + $0xd50] sm:$0xff] }
 0x3e6   : > { %7708 = vmatpush2.bf16.msra.mxu1 %v9430_v58  ;;  %7666 = vmatprep.subr.bf16.mxu0 %v9295_v6  ;;  %v2478_v58 = vld [vmem:[#allocation9 + $0xd70] sm:$0xff]  ;;  %v9510_v6 = vcombine.low %v2354_v42, %v2358_v34 }
 0x3e7   : > { %7709 = vmatprep.subr.bf16.mxu1 %v9423_v53  ;;  %v9638_v53 = vcombine.low %v2482_v62, %v2486_v16  ;;  %v9631_v30 = vcombine.high %v2474_v11, %v2478_v58  ;;  %v2318_v57 = vld [vmem:[#allocation9 + $0x870] sm:$0xff] }
 0x3e8   : > { %v9471_v42 = vcombine.high %v2314_v4, %v2318_v57  ;;  %v2310_v62 = vld [vmem:[#allocation9 + $0x830] sm:$0xff] }
 0x3e9   : > { %7667 = vmatpush2.bf16.msra.mxu0 %v9294_v1  ;;  %v2466_v1 = vld [vmem:[#allocation9 + $0xd10] sm:$0xff] }
 0x3ea   : > { %7710 = vmatpush2.bf16.msra.mxu1 %v9422_v48  ;;  %7668 = vmatprep.subr.bf16.mxu0 %v9287_v13  ;;  %v2470_v48 = vld [vmem:[#allocation9 + $0xd30] sm:$0xff]  ;;  %v9502_v13 = vcombine.low %v2346_v50, %v2350_v46 }
 0x3eb   : > { %7711 = vmatprep.subr.bf16.mxu1 %v9415_v35  ;;  %v9630_v35 = vcombine.low %v2474_v11, %v2478_v58  ;;  %v9623_v21 = vcombine.high %v2466_v1, %v2470_v48  ;;  %v2434_v16 = vld [vmem:[#allocation9 + $0xc10] sm:$0xff] }
 0x3ec   : > { %v2426_v11 = vld [vmem:[#allocation9 + $0xbd0] sm:$0xff] }
 0x3ed   : > { %7669 = vmatpush2.bf16.msra.mxu0 %v9286_v0  ;;  %v2458_v0 = vld [vmem:[#allocation9 + $0xcd0] sm:$0xff] }
 0x3ee   : > { %7712 = vmatpush2.bf16.msra.mxu1 %v9414_v19  ;;  %7670 = vmatprep.subr.bf16.mxu0 %v9279_v31  ;;  %v2462_v19 = vld [vmem:[#allocation9 + $0xcf0] sm:$0xff]  ;;  %v9494_v31 = vcombine.low %v2338_v14, %v2342_v37 }
 0x3ef   : > { %7713 = vmatprep.subr.bf16.mxu1 %v9407_v8  ;;  %v9622_v8 = vcombine.low %v2466_v1, %v2470_v48  ;;  %v9615_v33 = vcombine.high %v2458_v0, %v2462_v19  ;;  %v2430_v58 = vld [vmem:[#allocation9 + $0xbf0] sm:$0xff] }
 0x3f0   : > { %v9583_v14 = vcombine.high %v2426_v11, %v2430_v58  ;;  %v2418_v1 = vld [vmem:[#allocation9 + $0xb90] sm:$0xff] }
 0x3f1   : > { %7671 = vmatpush2.bf16.msra.mxu0 %v9278_v3  ;;  %v2450_v3 = vld [vmem:[#allocation9 + $0xc90] sm:$0xff] }
 0x3f2   : > { %7714 = vmatpush2.bf16.msra.mxu1 %v9406_v25  ;;  %7672 = vmatprep.subr.bf16.mxu0 %v9271_v41  ;;  %v2454_v25 = vld [vmem:[#allocation9 + $0xcb0] sm:$0xff]  ;;  %v9486_v41 = vcombine.low %v2330_v2, %v2334_v44 }
 0x3f3   : > { %7715 = vmatprep.subr.bf16.mxu1 %v9399_v55  ;;  %v9614_v55 = vcombine.low %v2458_v0, %v2462_v19  ;;  %v9607_v27 = vcombine.high %v2450_v3, %v2454_v25  ;;  %v2422_v48 = vld [vmem:[#allocation9 + $0xbb0] sm:$0xff] }
 0x3f4   : > { %v9575_v2 = vcombine.high %v2418_v1, %v2422_v48  ;;  %v2410_v0 = vld [vmem:[#allocation9 + $0xb50] sm:$0xff] }
 0x3f5   : > { %7673 = vmatpush2.bf16.msra.mxu0 %v9270_v51  ;;  %v2442_v51 = vld [vmem:[#allocation9 + $0xc50] sm:$0xff] }
 0x3f6   : > { %7716 = vmatpush2.bf16.msra.mxu1 %v9398_v63  ;;  %7728 = vmatprep.subr.bf16.mxu0 %v9519_v22  ;;  %v2446_v63 = vld [vmem:[#allocation9 + $0xc70] sm:$0xff]  ;;  %v9478_v22 = vcombine.low %v2322_v23, %v2326_v59 }
 0x3f7   : > { %7771 = vmatprep.subr.bf16.mxu1 %v9647_v7  ;;  %v9606_v7 = vcombine.low %v2450_v3, %v2454_v25  ;;  %v9599_v34 = vcombine.high %v2442_v51, %v2446_v63  ;;  %v9598_v50 = vcombine.low %v2442_v51, %v2446_v63  ;;  %v2414_v19 = vld [vmem:[#allocation9 + $0xb70] sm:$0xff] }
 0x3f8   : > { %7675 = vmatmul.mubr.bf16.vlgmr.msra.gmra.mxu0 %v11125_v38  ;;  %v9567_v23 = vcombine.high %v2410_v0, %v2414_v19  ;;  %v2402_v3 = vld [vmem:[#allocation9 + $0xb10] sm:$0xff] }
 0x3f9   : > { %7718 = vmatmul.mubr.bf16.vlgmr.msra.gmra.mxu1 %v11127_v43  ;;  %7729 = vmatpush1.bf16.msra.mxu0 %v9518_v47  ;;  %v2306_v47 = vld [vmem:[#allocation9 + $0x810] sm:$0xff] }
 0x3fa   : > { %7760 = vmatprep.mubr.bf16.mxu0 %v11158_v52  ;;  %7772 = vmatpush1.bf16.msra.mxu1 %v9646_v36  ;;  %v2438_v36 = vld [vmem:[#allocation9 + $0xc30] sm:$0xff]  ;;  %v9463_v46 = vcombine.high %v2306_v47, %v2310_v62 }
 0x3fb   : > { %7803 = vmatprep.mubr.bf16.mxu1 %v11160_v28  ;;  %7730 = vmatprep.subr.bf16.mxu0 %v9511_v39  ;;  %v9470_v39 = vcombine.low %v2314_v4, %v2318_v57  ;;  %v2406_v25 = vld [vmem:[#allocation9 + $0xb30] sm:$0xff] }
 0x3fc   : > { %7773 = vmatprep.subr.bf16.mxu1 %v9639_v5  ;;  %v9591_v5 = vcombine.high %v2434_v16, %v2438_v36  ;;  %v9559_v4 = vcombine.high %v2402_v3, %v2406_v25  ;;  %v2394_v51 = vld [vmem:[#allocation9 + $0xad0] sm:$0xff] }
 0x3fd   : > { %7731 = vmatpush1.bf16.msra.mxu0 %v9510_v6  ;;  %v2554_v6 = vld [vmem:[#allocation9 + $0xfd0] sm:$0xff] }
 0x3fe   : > { %7774 = vmatpush1.bf16.msra.mxu1 %v9638_v53  ;;  %7732 = vmatprep.subr.bf16.mxu0 %v9503_v26  ;;  %v2558_v53 = vld [vmem:[#allocation9 + $0xff0] sm:$0xff]  ;;  %v9462_v26 = vcombine.low %v2306_v47, %v2310_v62 }
 0x3ff   : > { %7775 = vmatprep.subr.bf16.mxu1 %v9631_v30  ;;  %v9590_v30 = vcombine.low %v2434_v16, %v2438_v36  ;;  %v9711_v37 = vcombine.high %v2554_v6, %v2558_v53  ;;  %v2398_v63 = vld [vmem:[#allocation9 + $0xaf0] sm:$0xff] }
 0x400   : > { %v9551_v47 = vcombine.high %v2394_v51, %v2398_v63  ;;  %v2386_v16 = vld [vmem:[#allocation9 + $0xa90] sm:$0xff] }
 0x401   : > { %7733 = vmatpush1.bf16.msra.mxu0 %v9502_v13  ;;  %v2546_v13 = vld [vmem:[#allocation9 + $0xf90] sm:$0xff] }
 0x402   : > { %7776 = vmatpush1.bf16.msra.mxu1 %v9630_v35  ;;  %7734 = vmatprep.subr.bf16.mxu0 %v9495_v29  ;;  %v2550_v35 = vld [vmem:[#allocation9 + $0xfb0] sm:$0xff]  ;;  %v9582_v29 = vcombine.low %v2426_v11, %v2430_v58 }
 0x403   : > { %7777 = vmatprep.subr.bf16.mxu1 %v9623_v21  ;;  %v9710_v21 = vcombine.low %v2554_v6, %v2558_v53  ;;  %v9703_v44 = vcombine.high %v2546_v13, %v2550_v35  ;;  %v2390_v36 = vld [vmem:[#allocation9 + $0xab0] sm:$0xff] }
 0x404   : > { %v9543_v11 = vcombine.high %v2386_v16, %v2390_v36  ;;  %v2378_v6 = vld [vmem:[#allocation9 + $0xa50] sm:$0xff] }
 0x405   : > { %7735 = vmatpush1.bf16.msra.mxu0 %v9494_v31  ;;  %v2538_v31 = vld [vmem:[#allocation9 + $0xf50] sm:$0xff] }
 0x406   : > { %7778 = vmatpush1.bf16.msra.mxu1 %v9622_v8  ;;  %7736 = vmatprep.subr.bf16.mxu0 %v9487_v24  ;;  %v2542_v8 = vld [vmem:[#allocation9 + $0xf70] sm:$0xff]  ;;  %v9574_v24 = vcombine.low %v2418_v1, %v2422_v48 }
 0x407   : > { %7779 = vmatprep.subr.bf16.mxu1 %v9615_v33  ;;  %v9702_v33 = vcombine.low %v2546_v13, %v2550_v35  ;;  %v9695_v59 = vcombine.high %v2538_v31, %v2542_v8  ;;  %v2382_v53 = vld [vmem:[#allocation9 + $0xa70] sm:$0xff] }
 0x408   : > { %v9535_v1 = vcombine.high %v2378_v6, %v2382_v53  ;;  %v2370_v13 = vld [vmem:[#allocation9 + $0xa10] sm:$0xff] }
 0x409   : > { %7737 = vmatpush1.bf16.msra.mxu0 %v9486_v41  ;;  %v2530_v41 = vld [vmem:[#allocation9 + $0xf10] sm:$0xff] }
 0x40a   : > { %7780 = vmatpush1.bf16.msra.mxu1 %v9614_v55  ;;  %7738 = vmatprep.subr.bf16.mxu0 %v9479_v61  ;;  %v2534_v55 = vld [vmem:[#allocation9 + $0xf30] sm:$0xff]  ;;  %v9566_v61 = vcombine.low %v2410_v0, %v2414_v19 }
 0x40b   : > { %7781 = vmatprep.subr.bf16.mxu1 %v9607_v27  ;;  %v9694_v27 = vcombine.low %v2538_v31, %v2542_v8  ;;  %v9687_v57 = vcombine.high %v2530_v41, %v2534_v55  ;;  %v2374_v35 = vld [vmem:[#allocation9 + $0xa30] sm:$0xff] }
 0x40c   : > { %v9527_v0 = vcombine.high %v2370_v13, %v2374_v35  ;;  %v2618_v31 = vld [vmem:[#allocation9 + $0x11d0] sm:$0xff] }
 0x40d   : > { %7739 = vmatpush1.bf16.msra.mxu0 %v9478_v22  ;;  %v2522_v22 = vld [vmem:[#allocation9 + $0xed0] sm:$0xff] }
 0x40e   : > { %7782 = vmatpush1.bf16.msra.mxu1 %v9606_v7  ;;  %7740 = vmatprep.subr.bf16.mxu0 %v9471_v42  ;;  %v2526_v7 = vld [vmem:[#allocation9 + $0xef0] sm:$0xff]  ;;  %v9558_v42 = vcombine.low %v2402_v3, %v2406_v25 }
 0x40f   : > { %7783 = vmatprep.subr.bf16.mxu1 %v9599_v34  ;;  %v9686_v34 = vcombine.low %v2530_v41, %v2534_v55  ;;  %v9679_v62 = vcombine.high %v2522_v22, %v2526_v7  ;;  %v2622_v8 = vld [vmem:[#allocation9 + $0x11f0] sm:$0xff] }
 0x410   : > { %v9775_v3 = vcombine.high %v2618_v31, %v2622_v8  ;;  %v2610_v41 = vld [vmem:[#allocation9 + $0x1190] sm:$0xff] }
 0x411   : > { %7741 = vmatpush1.bf16.msra.mxu0 %v9470_v39  ;;  %v2514_v39 = vld [vmem:[#allocation9 + $0xe90] sm:$0xff] }
 0x412   : > { %7784 = vmatpush1.bf16.msra.mxu1 %v9598_v50  ;;  %7742 = vmatprep.subr.bf16.mxu0 %v9463_v46  ;;  %v2518_v50 = vld [vmem:[#allocation9 + $0xeb0] sm:$0xff]  ;;  %v9550_v46 = vcombine.low %v2394_v51, %v2398_v63 }
 0x413   : > { %7785 = vmatprep.subr.bf16.mxu1 %v9591_v5  ;;  %v9678_v5 = vcombine.low %v2522_v22, %v2526_v7  ;;  %v9671_v58 = vcombine.high %v2514_v39, %v2518_v50  ;;  %v2614_v55 = vld [vmem:[#allocation9 + $0x11b0] sm:$0xff] }
 0x414   : > { %v9767_v51 = vcombine.high %v2610_v41, %v2614_v55  ;;  %v2602_v63 = vld [vmem:[#allocation9 + $0x1150] sm:$0xff] }
 0x415   : > { %7743 = vmatpush1.bf16.msra.mxu0 %v9462_v26  ;;  %v2506_v26 = vld [vmem:[#allocation9 + $0xe50] sm:$0xff] }
 0x416   : > { %7786 = vmatpush1.bf16.msra.mxu1 %v9590_v30  ;;  %7744 = vmatprep.subr.bf16.mxu0 %v9583_v14  ;;  %v2510_v30 = vld [vmem:[#allocation9 + $0xe70] sm:$0xff]  ;;  %v9542_v14 = vcombine.low %v2386_v16, %v2390_v36 }
 0x417   : > { %7787 = vmatprep.subr.bf16.mxu1 %v9711_v37  ;;  %v9670_v37 = vcombine.low %v2514_v39, %v2518_v50  ;;  %v9663_v48 = vcombine.high %v2506_v26, %v2510_v30  ;;  %v2606_v22 = vld [vmem:[#allocation9 + $0x1170] sm:$0xff] }
 0x418   : > { %v9759_v16 = vcombine.high %v2602_v63, %v2606_v22  ;;  %v2594_v39 = vld [vmem:[#allocation9 + $0x1110] sm:$0xff] }
 0x419   : > { %7745 = vmatpush2.bf16.msra.mxu0 %v9582_v29  ;;  %v2498_v29 = vld [vmem:[#allocation9 + $0xe10] sm:$0xff] }
 0x41a   : > { %7788 = vmatpush2.bf16.msra.mxu1 %v9710_v21  ;;  %7746 = vmatprep.subr.bf16.mxu0 %v9575_v2  ;;  %v2502_v21 = vld [vmem:[#allocation9 + $0xe30] sm:$0xff]  ;;  %v9534_v2 = vcombine.low %v2378_v6, %v2382_v53 }
 0x41b   : > { %7789 = vmatprep.subr.bf16.mxu1 %v9703_v44  ;;  %v9662_v44 = vcombine.low %v2506_v26, %v2510_v30  ;;  %v9655_v19 = vcombine.high %v2498_v29, %v2502_v21  ;;  %v2598_v50 = vld [vmem:[#allocation9 + $0x1130] sm:$0xff] }
 0x41c   : > { %v9751_v6 = vcombine.high %v2594_v39, %v2598_v50  ;;  %v2586_v26 = vld [vmem:[#allocation9 + $0x10d0] sm:$0xff] }
 0x41d   : > { %7747 = vmatpush2.bf16.msra.mxu0 %v9574_v24  ;;  %v2746_v24 = vld [vmem:[#allocation9 + $0x15d0] sm:$0xff] }
 0x41e   : > { %7790 = vmatpush2.bf16.msra.mxu1 %v9702_v33  ;;  %7748 = vmatprep.subr.bf16.mxu0 %v9567_v23  ;;  %v2750_v33 = vld [vmem:[#allocation9 + $0x15f0] sm:$0xff]  ;;  %v9526_v23 = vcombine.low %v2370_v13, %v2374_v35 }
 0x41f   : > { %7791 = vmatprep.subr.bf16.mxu1 %v9695_v59  ;;  %v9654_v59 = vcombine.low %v2498_v29, %v2502_v21  ;;  %v9903_v25 = vcombine.high %v2746_v24, %v2750_v33  ;;  %v2590_v30 = vld [vmem:[#allocation9 + $0x10f0] sm:$0xff] }
 0x420   : > { %v9743_v13 = vcombine.high %v2586_v26, %v2590_v30  ;;  %v2578_v29 = vld [vmem:[#allocation9 + $0x1090] sm:$0xff] }
 0x421   : > { %7749 = vmatpush2.bf16.msra.mxu0 %v9566_v61  ;;  %v9774_v61 = vcombine.low %v2618_v31, %v2622_v8  ;;  %v2582_v21 = vld [vmem:[#allocation9 + $0x10b0] sm:$0xff] }
 0x422   : > { %7792 = vmatpush2.bf16.msra.mxu1 %v9694_v27  ;;  %7750 = vmatprep.subr.bf16.mxu0 %v9559_v4  ;;  %v2738_v27 = vld [vmem:[#allocation9 + $0x1590] sm:$0xff]  ;;  %v9735_v31 = vcombine.high %v2578_v29, %v2582_v21 }
 0x423   : > { %7793 = vmatprep.subr.bf16.mxu1 %v9687_v57  ;;  %v2742_v4 = vld [vmem:[#allocation9 + $0x15b0] sm:$0xff]  ;;  %v9902_v57 = vcombine.low %v2746_v24, %v2750_v33 }
 0x424   : > { %v9895_v7 = vcombine.high %v2738_v27, %v2742_v4  ;;  %v2570_v24 = vld [vmem:[#allocation9 + $0x1050] sm:$0xff] }
 0x425   : > { %7751 = vmatpush2.bf16.msra.mxu0 %v9558_v42  ;;  %v2730_v42 = vld [vmem:[#allocation9 + $0x1550] sm:$0xff] }
 0x426   : > { %7794 = vmatpush2.bf16.msra.mxu1 %v9686_v34  ;;  %7752 = vmatprep.subr.bf16.mxu0 %v9551_v47  ;;  %v2734_v34 = vld [vmem:[#allocation9 + $0x1570] sm:$0xff]  ;;  %v9766_v47 = vcombine.low %v2610_v41, %v2614_v55 }
 0x427   : > { %7795 = vmatprep.subr.bf16.mxu1 %v9679_v62  ;;  %v9894_v62 = vcombine.low %v2738_v27, %v2742_v4  ;;  %v9887_v36 = vcombine.high %v2730_v42, %v2734_v34  ;;  %v2574_v33 = vld [vmem:[#allocation9 + $0x1070] sm:$0xff] }
 0x428   : > { %v9727_v41 = vcombine.high %v2570_v24, %v2574_v33  ;;  %v2566_v27 = vld [vmem:[#allocation9 + $0x1030] sm:$0xff] }
 0x429   : > { %7753 = vmatpush2.bf16.msra.mxu0 %v9550_v46  ;;  %v2722_v46 = vld [vmem:[#allocation9 + $0x1510] sm:$0xff] }
 0x42a   : > { %7796 = vmatpush2.bf16.msra.mxu1 %v9678_v5  ;;  %7754 = vmatprep.subr.bf16.mxu0 %v9543_v11  ;;  %v2726_v5 = vld [vmem:[#allocation9 + $0x1530] sm:$0xff]  ;;  %v9758_v11 = vcombine.low %v2602_v63, %v2606_v22 }
 0x42b   : > { %7797 = vmatprep.subr.bf16.mxu1 %v9671_v58  ;;  %v9886_v58 = vcombine.low %v2730_v42, %v2734_v34  ;;  %v9879_v53 = vcombine.high %v2722_v46, %v2726_v5  ;;  %v2690_v4 = vld [vmem:[#allocation9 + $0x1410] sm:$0xff] }
 0x42c   : > { %v2682_v42 = vld [vmem:[#allocation9 + $0x13d0] sm:$0xff] }
 0x42d   : > { %7755 = vmatpush2.bf16.msra.mxu0 %v9542_v14  ;;  %v2714_v14 = vld [vmem:[#allocation9 + $0x14d0] sm:$0xff] }
 0x42e   : > { %7798 = vmatpush2.bf16.msra.mxu1 %v9670_v37  ;;  %7756 = vmatprep.subr.bf16.mxu0 %v9535_v1  ;;  %v2718_v37 = vld [vmem:[#allocation9 + $0x14f0] sm:$0xff]  ;;  %v9750_v1 = vcombine.low %v2594_v39, %v2598_v50 }
 0x42f   : > { %7799 = vmatprep.subr.bf16.mxu1 %v9663_v48  ;;  %v9878_v48 = vcombine.low %v2722_v46, %v2726_v5  ;;  %v9871_v35 = vcombine.high %v2714_v14, %v2718_v37  ;;  %v2686_v34 = vld [vmem:[#allocation9 + $0x13f0] sm:$0xff] }
 0x430   : > { %v9839_v39 = vcombine.high %v2682_v42, %v2686_v34  ;;  %v2674_v46 = vld [vmem:[#allocation9 + $0x1390] sm:$0xff] }
 0x431   : > { %7757 = vmatpush2.bf16.msra.mxu0 %v9534_v2  ;;  %v2706_v2 = vld [vmem:[#allocation9 + $0x1490] sm:$0xff] }
 0x432   : > { %7800 = vmatpush2.bf16.msra.mxu1 %v9662_v44  ;;  %7758 = vmatprep.subr.bf16.mxu0 %v9527_v0  ;;  %v2710_v44 = vld [vmem:[#allocation9 + $0x14b0] sm:$0xff]  ;;  %v9742_v0 = vcombine.low %v2586_v26, %v2590_v30 }
 0x433   : > { %7801 = vmatprep.subr.bf16.mxu1 %v9655_v19  ;;  %v9870_v19 = vcombine.low %v2714_v14, %v2718_v37  ;;  %v9863_v8 = vcombine.high %v2706_v2, %v2710_v44  ;;  %v2678_v5 = vld [vmem:[#allocation9 + $0x13b0] sm:$0xff] }
 0x434   : > { %v9831_v26 = vcombine.high %v2674_v46, %v2678_v5  ;;  %v2666_v14 = vld [vmem:[#allocation9 + $0x1350] sm:$0xff] }
 0x435   : > { %7759 = vmatpush2.bf16.msra.mxu0 %v9526_v23  ;;  %v2698_v23 = vld [vmem:[#allocation9 + $0x1450] sm:$0xff] }
 0x436   : > { %7802 = vmatpush2.bf16.msra.mxu1 %v9654_v59  ;;  %7814 = vmatprep.subr.bf16.mxu0 %v9775_v3  ;;  %v2702_v59 = vld [vmem:[#allocation9 + $0x1470] sm:$0xff]  ;;  %v9734_v3 = vcombine.low %v2578_v29, %v2582_v21 }
 0x437   : > { %7857 = vmatprep.subr.bf16.mxu1 %v9903_v25  ;;  %v9862_v25 = vcombine.low %v2706_v2, %v2710_v44  ;;  %v9855_v55 = vcombine.high %v2698_v23, %v2702_v59  ;;  %v9854_v63 = vcombine.low %v2698_v23, %v2702_v59  ;;  %v2670_v37 = vld [vmem:[#allocation9 + $0x1370] sm:$0xff] }
 0x438   : > { %7761 = vmatmul.mubr.bf16.vlgmr.msra.gmra.mxu0 %v11201_v18  ;;  %v9823_v29 = vcombine.high %v2666_v14, %v2670_v37  ;;  %v2658_v2 = vld [vmem:[#allocation9 + $0x1310] sm:$0xff] }
 0x439   : > { %7804 = vmatmul.mubr.bf16.vlgmr.msra.gmra.mxu1 %v11203_v60  ;;  %7815 = vmatpush1.bf16.msra.mxu0 %v9774_v61  ;;  %v2562_v61 = vld [vmem:[#allocation9 + $0x1010] sm:$0xff] }
 0x43a   : > { %7846 = vmatprep.mubr.bf16.mxu0 %v11205_v45  ;;  %7858 = vmatpush1.bf16.msra.mxu1 %v9902_v57  ;;  %v2694_v57 = vld [vmem:[#allocation9 + $0x1430] sm:$0xff]  ;;  %v9719_v22 = vcombine.high %v2562_v61, %v2566_v27 }
 0x43b   : > { %7889 = vmatprep.mubr.bf16.mxu1 %v11208_v54  ;;  %7816 = vmatprep.subr.bf16.mxu0 %v9767_v51  ;;  %v9726_v51 = vcombine.low %v2570_v24, %v2574_v33  ;;  %v2662_v44 = vld [vmem:[#allocation9 + $0x1330] sm:$0xff] }
 0x43c   : > { %7859 = vmatprep.subr.bf16.mxu1 %v9895_v7  ;;  %v9847_v7 = vcombine.high %v2690_v4, %v2694_v57  ;;  %v9815_v24 = vcombine.high %v2658_v2, %v2662_v44  ;;  %v2650_v23 = vld [vmem:[#allocation9 + $0x12d0] sm:$0xff] }
 0x43d   : > { %7817 = vmatpush1.bf16.msra.mxu0 %v9766_v47  ;;  %v2810_v47 = vld [vmem:[#allocation9 + $0x17d0] sm:$0xff] }
 0x43e   : > { %7860 = vmatpush1.bf16.msra.mxu1 %v9894_v62  ;;  %7818 = vmatprep.subr.bf16.mxu0 %v9759_v16  ;;  %v2814_v62 = vld [vmem:[#allocation9 + $0x17f0] sm:$0xff]  ;;  %v9718_v16 = vcombine.low %v2562_v61, %v2566_v27 }
 0x43f   : > { %7861 = vmatprep.subr.bf16.mxu1 %v9887_v36  ;;  %v9846_v36 = vcombine.low %v2690_v4, %v2694_v57  ;;  %v9967_v50 = vcombine.high %v2810_v47, %v2814_v62  ;;  %v2654_v59 = vld [vmem:[#allocation9 + $0x12f0] sm:$0xff] }
 0x440   : > { %v9807_v61 = vcombine.high %v2650_v23, %v2654_v59  ;;  %v2642_v4 = vld [vmem:[#allocation9 + $0x1290] sm:$0xff] }
 0x441   : > { %7819 = vmatpush1.bf16.msra.mxu0 %v9758_v11  ;;  %v2802_v11 = vld [vmem:[#allocation9 + $0x1790] sm:$0xff] }
 0x442   : > { %7862 = vmatpush1.bf16.msra.mxu1 %v9886_v58  ;;  %7820 = vmatprep.subr.bf16.mxu0 %v9751_v6  ;;  %v2806_v58 = vld [vmem:[#allocation9 + $0x17b0] sm:$0xff]  ;;  %v9838_v6 = vcombine.low %v2682_v42, %v2686_v34 }
 0x443   : > { %7863 = vmatprep.subr.bf16.mxu1 %v9879_v53  ;;  %v9966_v53 = vcombine.low %v2810_v47, %v2814_v62  ;;  %v9959_v30 = vcombine.high %v2802_v11, %v2806_v58  ;;  %v2646_v57 = vld [vmem:[#allocation9 + $0x12b0] sm:$0xff] }
 0x444   : > { %v9799_v42 = vcombine.high %v2642_v4, %v2646_v57  ;;  %v2634_v47 = vld [vmem:[#allocation9 + $0x1250] sm:$0xff] }
 0x445   : > { %7821 = vmatpush1.bf16.msra.mxu0 %v9750_v1  ;;  %v2794_v1 = vld [vmem:[#allocation9 + $0x1750] sm:$0xff] }
 0x446   : > { %7864 = vmatpush1.bf16.msra.mxu1 %v9878_v48  ;;  %7822 = vmatprep.subr.bf16.mxu0 %v9743_v13  ;;  %v2798_v48 = vld [vmem:[#allocation9 + $0x1770] sm:$0xff]  ;;  %v9830_v13 = vcombine.low %v2674_v46, %v2678_v5 }
 0x447   : > { %7865 = vmatprep.subr.bf16.mxu1 %v9871_v35  ;;  %v9958_v35 = vcombine.low %v2802_v11, %v2806_v58  ;;  %v9951_v21 = vcombine.high %v2794_v1, %v2798_v48  ;;  %v2638_v62 = vld [vmem:[#allocation9 + $0x1270] sm:$0xff] }
 0x448   : > { %v9791_v46 = vcombine.high %v2634_v47, %v2638_v62  ;;  %v2626_v11 = vld [vmem:[#allocation9 + $0x1210] sm:$0xff] }
 0x449   : > { %7823 = vmatpush1.bf16.msra.mxu0 %v9742_v0  ;;  %v2786_v0 = vld [vmem:[#allocation9 + $0x1710] sm:$0xff] }
 0x44a   : > { %7866 = vmatpush1.bf16.msra.mxu1 %v9870_v19  ;;  %7824 = vmatprep.subr.bf16.mxu0 %v9735_v31  ;;  %v2790_v19 = vld [vmem:[#allocation9 + $0x1730] sm:$0xff]  ;;  %v9822_v31 = vcombine.low %v2666_v14, %v2670_v37 }
 0x44b   : > { %7867 = vmatprep.subr.bf16.mxu1 %v9863_v8  ;;  %v9950_v8 = vcombine.low %v2794_v1, %v2798_v48  ;;  %v9943_v33 = vcombine.high %v2786_v0, %v2790_v19  ;;  %v2630_v58 = vld [vmem:[#allocation9 + $0x1230] sm:$0xff] }
 0x44c   : > { %v9783_v14 = vcombine.high %v2626_v11, %v2630_v58  ;;  %v2874_v1 = vld [vmem:[#allocation9 + $0x19d0] sm:$0xff] }
 0x44d   : > { %7825 = vmatpush1.bf16.msra.mxu0 %v9734_v3  ;;  %v2778_v3 = vld [vmem:[#allocation9 + $0x16d0] sm:$0xff] }
 0x44e   : > { %7868 = vmatpush1.bf16.msra.mxu1 %v9862_v25  ;;  %7826 = vmatprep.subr.bf16.mxu0 %v9727_v41  ;;  %v2782_v25 = vld [vmem:[#allocation9 + $0x16f0] sm:$0xff]  ;;  %v9814_v41 = vcombine.low %v2658_v2, %v2662_v44 }
 0x44f   : > { %7869 = vmatprep.subr.bf16.mxu1 %v9855_v55  ;;  %v9942_v55 = vcombine.low %v2786_v0, %v2790_v19  ;;  %v9935_v27 = vcombine.high %v2778_v3, %v2782_v25  ;;  %v2878_v48 = vld [vmem:[#allocation9 + $0x19f0] sm:$0xff] }
 0x450   : > { %v10031_v2 = vcombine.high %v2874_v1, %v2878_v48  ;;  %v2866_v0 = vld [vmem:[#allocation9 + $0x1990] sm:$0xff] }
 0x451   : > { %7827 = vmatpush1.bf16.msra.mxu0 %v9726_v51  ;;  %v2770_v51 = vld [vmem:[#allocation9 + $0x1690] sm:$0xff] }
 0x452   : > { %7870 = vmatpush1.bf16.msra.mxu1 %v9854_v63  ;;  %7828 = vmatprep.subr.bf16.mxu0 %v9719_v22  ;;  %v2774_v63 = vld [vmem:[#allocation9 + $0x16b0] sm:$0xff]  ;;  %v9806_v22 = vcombine.low %v2650_v23, %v2654_v59 }
 0x453   : > { %7871 = vmatprep.subr.bf16.mxu1 %v9847_v7  ;;  %v9934_v7 = vcombine.low %v2778_v3, %v2782_v25  ;;  %v9927_v34 = vcombine.high %v2770_v51, %v2774_v63  ;;  %v2870_v19 = vld [vmem:[#allocation9 + $0x19b0] sm:$0xff] }
 0x454   : > { %v10023_v23 = vcombine.high %v2866_v0, %v2870_v19  ;;  %v2858_v3 = vld [vmem:[#allocation9 + $0x1950] sm:$0xff] }
 0x455   : > { %7829 = vmatpush1.bf16.msra.mxu0 %v9718_v16  ;;  %v2762_v16 = vld [vmem:[#allocation9 + $0x1650] sm:$0xff] }
 0x456   : > { %7872 = vmatpush1.bf16.msra.mxu1 %v9846_v36  ;;  %7830 = vmatprep.subr.bf16.mxu0 %v9839_v39  ;;  %v2766_v36 = vld [vmem:[#allocation9 + $0x1670] sm:$0xff]  ;;  %v9798_v39 = vcombine.low %v2642_v4, %v2646_v57 }
 0x457   : > { %7873 = vmatprep.subr.bf16.mxu1 %v9967_v50  ;;  %v9926_v50 = vcombine.low %v2770_v51, %v2774_v63  ;;  %v9919_v5 = vcombine.high %v2762_v16, %v2766_v36  ;;  %v2862_v25 = vld [vmem:[#allocation9 + $0x1970] sm:$0xff] }
 0x458   : > { %v10015_v4 = vcombine.high %v2858_v3, %v2862_v25  ;;  %v2850_v51 = vld [vmem:[#allocation9 + $0x1910] sm:$0xff] }
 0x459   : > { %7831 = vmatpush2.bf16.msra.mxu0 %v9838_v6  ;;  %v2754_v6 = vld [vmem:[#allocation9 + $0x1610] sm:$0xff] }
 0x45a   : > { %7874 = vmatpush2.bf16.msra.mxu1 %v9966_v53  ;;  %7832 = vmatprep.subr.bf16.mxu0 %v9831_v26  ;;  %v2758_v53 = vld [vmem:[#allocation9 + $0x1630] sm:$0xff]  ;;  %v9790_v26 = vcombine.low %v2634_v47, %v2638_v62 }
 0x45b   : > { %7875 = vmatprep.subr.bf16.mxu1 %v9959_v30  ;;  %v9918_v30 = vcombine.low %v2762_v16, %v2766_v36  ;;  %v9911_v37 = vcombine.high %v2754_v6, %v2758_v53  ;;  %v2854_v63 = vld [vmem:[#allocation9 + $0x1930] sm:$0xff]  ;;  %v2075_v36 = vld [vmem:[#allocation9 + $0xd8] sm:$0xff] }
 0x45c   : > { %v10007_v47 = vcombine.high %v2850_v51, %v2854_v63  ;;  %v2846_v16 = vld [vmem:[#allocation9 + $0x18f0] sm:$0xff] }
 0x45d   : > { %7833 = vmatpush2.bf16.msra.mxu0 %v9830_v13  ;;  %v2107_v13 = vld [vmem:[#allocation9 + $0x1d8] sm:$0xff] }
 0x45e   : > { %7876 = vmatpush2.bf16.msra.mxu1 %v9958_v35  ;;  %7834 = vmatprep.subr.bf16.mxu0 %v9823_v29  ;;  %v2111_v35 = vld [vmem:[#allocation9 + $0x1f8] sm:$0xff]  ;;  %v9782_v29 = vcombine.low %v2626_v11, %v2630_v58  ;;  %v2834_v58 = vld [vmem:[#allocation9 + $0x1890] sm:$0xff] }
 0x45f   : > { %7877 = vmatprep.subr.bf16.mxu1 %v9951_v21  ;;  %v9910_v21 = vcombine.low %v2754_v6, %v2758_v53  ;;  %v9265_v44 = vcombine.high %v2107_v13, %v2111_v35  ;;  %v2838_v6 = vld [vmem:[#allocation9 + $0x18b0] sm:$0xff]  ;;  %v2067_v53 = vld [vmem:[#allocation9 + $0x98] sm:$0xff] }
 0x461   : > { %7835 = vmatpush2.bf16.msra.mxu0 %v9822_v31  ;;  %v2099_v31 = vld [vmem:[#allocation9 + $0x198] sm:$0xff] }
 0x462   : > { %7878 = vmatpush2.bf16.msra.mxu1 %v9950_v8  ;;  %7836 = vmatprep.subr.bf16.mxu0 %v9815_v24  ;;  %v2103_v8 = vld [vmem:[#allocation9 + $0x1b8] sm:$0xff]  ;;  %v10030_v24 = vcombine.low %v2874_v1, %v2878_v48  ;;  %v2826_v48 = vld [vmem:[#allocation9 + $0x1850] sm:$0xff] }
 0x463   : > { %7879 = vmatprep.subr.bf16.mxu1 %v9943_v33  ;;  %v9264_v33 = vcombine.low %v2107_v13, %v2111_v35  ;;  %v9257_v59 = vcombine.high %v2099_v31, %v2103_v8  ;;  %v2830_v13 = vld [vmem:[#allocation9 + $0x1870] sm:$0xff]  ;;  %v2059_v35 = vld [vmem:[#allocation9 + $0x58] sm:$0xff] }
 0x465   : > { %7837 = vmatpush2.bf16.msra.mxu0 %v9814_v41  ;;  %v2091_v41 = vld [vmem:[#allocation9 + $0x158] sm:$0xff] }
 0x466   : > { %7880 = vmatpush2.bf16.msra.mxu1 %v9942_v55  ;;  %7838 = vmatprep.subr.bf16.mxu0 %v9807_v61  ;;  %v2095_v55 = vld [vmem:[#allocation9 + $0x178] sm:$0xff]  ;;  %v10022_v61 = vcombine.low %v2866_v0, %v2870_v19  ;;  %v2818_v19 = vld [vmem:[#allocation9 + $0x1810] sm:$0xff] }
 0x467   : > { %7881 = vmatprep.subr.bf16.mxu1 %v9935_v27  ;;  %v9256_v27 = vcombine.low %v2099_v31, %v2103_v8  ;;  %v9249_v57 = vcombine.high %v2091_v41, %v2095_v55  ;;  %v2822_v31 = vld [vmem:[#allocation9 + $0x1830] sm:$0xff]  ;;  %v2051_v8 = vld [vmem:[#allocation9 + $0x18] sm:$0xff] }
 0x469   : > { %7839 = vmatpush2.bf16.msra.mxu0 %v9806_v22  ;;  %v2083_v22 = vld [vmem:[#allocation9 + $0x118] sm:$0xff] }
 0x46a   : > { %7882 = vmatpush2.bf16.msra.mxu1 %v9934_v7  ;;  %7840 = vmatprep.subr.bf16.mxu0 %v9799_v42  ;;  %v2087_v7 = vld [vmem:[#allocation9 + $0x138] sm:$0xff]  ;;  %v10014_v42 = vcombine.low %v2858_v3, %v2862_v25 }
 0x46b   : > { %7883 = vmatprep.subr.bf16.mxu1 %v9927_v34  ;;  %v9248_v34 = vcombine.low %v2091_v41, %v2095_v55  ;;  %v9241_v62 = vcombine.high %v2083_v22, %v2087_v7  ;;  %v2235_v25 = vld [vmem:[#allocation9 + $0x5d8] sm:$0xff] }
 0x46c   : > { %v2239_v41 = vld [vmem:[#allocation9 + $0x5f8] sm:$0xff] }
 0x46d   : > { %7841 = vmatpush2.bf16.msra.mxu0 %v9798_v39  ;;  %v2079_v39 = vld [vmem:[#allocation9 + $0xf8] sm:$0xff] }
 0x46e   : > { %7884 = vmatpush2.bf16.msra.mxu1 %v9926_v50  ;;  %7842 = vmatprep.subr.bf16.mxu0 %v9791_v46  ;;  %v10006_v50 = vcombine.low %v2850_v51, %v2854_v63  ;;  %v9240_v46 = vcombine.low %v2083_v22, %v2087_v7  ;;  %v9233_v11 = vcombine.high %v2075_v36, %v2079_v39  ;;  %v2171_v55 = vld [vmem:[#allocation9 + $0x3d8] sm:$0xff] }
 0x46f   : > { %7885 = vmatprep.subr.bf16.mxu1 %v9919_v5  ;;  %v2227_v63 = vld [vmem:[#allocation9 + $0x598] sm:$0xff] }
 0x470   : > { %v2231_v22 = vld [vmem:[#allocation9 + $0x5b8] sm:$0xff] }
 0x471   : > { %7843 = vmatpush2.bf16.msra.mxu0 %v9790_v26  ;;  %v2071_v26 = vld [vmem:[#allocation9 + $0xb8] sm:$0xff] }
 0x472   : > { %7886 = vmatpush2.bf16.msra.mxu1 %v9918_v30  ;;  %7844 = vmatprep.subr.bf16.mxu0 %v9783_v14  ;;  %v9232_v14 = vcombine.low %v2075_v36, %v2079_v39  ;;  %v9225_v1 = vcombine.high %v2067_v53, %v2071_v26  ;;  %v2163_v7 = vld [vmem:[#allocation9 + $0x398] sm:$0xff] }
 0x473   : > { %7887 = vmatprep.subr.bf16.mxu1 %v9911_v37  ;;  %v9991_v37 = vcombine.high %v2834_v58, %v2838_v6  ;;  %v2223_v36 = vld [vmem:[#allocation9 + $0x578] sm:$0xff] }
 0x474   : > { %v2155_v39 = vld [vmem:[#allocation9 + $0x358] sm:$0xff] }
 0x475   : > { %7845 = vmatpush2.bf16.msra.mxu0 %v9782_v29  ;;  %v2063_v29 = vld [vmem:[#allocation9 + $0x78] sm:$0xff] }
 0x476   : > { %7888 = vmatpush2.bf16.msra.mxu1 %v9910_v21  ;;  %7900 = vmatprep.subr.bf16.mxu0 %v10031_v2  ;;  %v9990_v21 = vcombine.low %v2834_v58, %v2838_v6  ;;  %v9224_v2 = vcombine.low %v2067_v53, %v2071_v26  ;;  %v9217_v0 = vcombine.high %v2059_v35, %v2063_v29  ;;  %v2211_v6 = vld [vmem:[#allocation9 + $0x518] sm:$0xff] }
 0x477   : > { %7943 = vmatprep.subr.bf16.mxu1 %v9265_v44  ;;  %v9983_v44 = vcombine.high %v2826_v48, %v2830_v13  ;;  %v2215_v53 = vld [vmem:[#allocation9 + $0x538] sm:$0xff] }
 0x478   : > { %7847 = vmatmul.mubr.bf16.vlgmr.msra.gmra.mxu0 %v11169_v17  ;;  %v2147_v26 = vld [vmem:[#allocation9 + $0x318] sm:$0xff] }
 0x479   : > { %7890 = vmatmul.mubr.bf16.vlgmr.msra.gmra.mxu1 %v11171_v49  ;;  %7901 = vmatpush1.bf16.msra.mxu0 %v10030_v24  ;;  %v2055_v24 = vld [vmem:[#allocation9 + $0x38] sm:$0xff] }
 0x47a   : > { %7944 = vmatpush1.bf16.msra.mxu1 %v9264_v33  ;;  %7975 = vmatprep.mubr.bf16.mxu1 %v11119_v56  ;;  %v2842_v56 = vld [vmem:[#allocation9 + $0x18d0] sm:$0xff]  ;;  %v9982_v33 = vcombine.low %v2826_v48, %v2830_v13  ;;  %v9209_v3 = vcombine.high %v2051_v8, %v2055_v24  ;;  %v2207_v13 = vld [vmem:[#allocation9 + $0x4f8] sm:$0xff] }
 0x47b   : > { %7902 = vmatprep.subr.bf16.mxu0 %v10023_v23  ;;  %7945 = vmatprep.subr.bf16.mxu1 %v9257_v59  ;;  %v9999_v5 = vcombine.high %v2842_v56, %v2846_v16  ;;  %v9998_v30 = vcombine.low %v2842_v56, %v2846_v16  ;;  %v9216_v23 = vcombine.low %v2059_v35, %v2063_v29  ;;  %v2219_v16 = vld [vmem:[#allocation9 + $0x558] sm:$0xff] }
 0x47c   : > { %7932 = vmatprep.mubr.bf16.mxu0 %v11533_v20  ;;  %v9975_v59 = vcombine.high %v2818_v19, %v2822_v31  ;;  %v2139_v35 = vld [vmem:[#allocation9 + $0x2d8] sm:$0xff] }
 0x47d   : > { %7903 = vmatpush1.bf16.msra.mxu0 %v10022_v61  ;;  %v2175_v61 = vld [vmem:[#allocation9 + $0x3f8] sm:$0xff] }
 0x47e   : > { %7946 = vmatpush1.bf16.msra.mxu1 %v9256_v27  ;;  %7904 = vmatprep.subr.bf16.mxu0 %v10015_v4  ;;  %v9974_v27 = vcombine.low %v2818_v19, %v2822_v31  ;;  %v9208_v4 = vcombine.low %v2051_v8, %v2055_v24  ;;  %v9329_v51 = vcombine.high %v2171_v55, %v2175_v61  ;;  %v2143_v29 = vld [vmem:[#allocation9 + $0x2f8] sm:$0xff] }
 0x47f   : > { %7947 = vmatprep.subr.bf16.mxu1 %v9249_v57  ;;  %v9393_v57 = vcombine.high %v2235_v25, %v2239_v41  ;;  %v2195_v19 = vld [vmem:[#allocation9 + $0x498] sm:$0xff] }
 0x480   : > { %v2199_v31 = vld [vmem:[#allocation9 + $0x4b8] sm:$0xff] }
 0x481   : > { %7905 = vmatpush1.bf16.msra.mxu0 %v10014_v42  ;;  %v2167_v42 = vld [vmem:[#allocation9 + $0x3b8] sm:$0xff] }
 0x482   : > { %7948 = vmatpush1.bf16.msra.mxu1 %v9248_v34  ;;  %7906 = vmatprep.subr.bf16.mxu0 %v10007_v47  ;;  %v9392_v34 = vcombine.low %v2235_v25, %v2239_v41  ;;  %v9328_v47 = vcombine.low %v2171_v55, %v2175_v61  ;;  %v9321_v56 = vcombine.high %v2163_v7, %v2167_v42  ;;  %v2131_v8 = vld [vmem:[#allocation9 + $0x298] sm:$0xff] }
 0x483   : > { %7949 = vmatprep.subr.bf16.mxu1 %v9241_v62  ;;  %v9385_v62 = vcombine.high %v2227_v63, %v2231_v22  ;;  %v2135_v24 = vld [vmem:[#allocation9 + $0x2b8] sm:$0xff] }
 0x484   : > { %v2187_v25 = vld [vmem:[#allocation9 + $0x458] sm:$0xff] }
 0x485   : > { %7907 = vmatpush1.bf16.msra.mxu0 %v10006_v50  ;;  %v2159_v50 = vld [vmem:[#allocation9 + $0x378] sm:$0xff] }
 0x486   : > { %7950 = vmatpush1.bf16.msra.mxu1 %v9240_v46  ;;  %7908 = vmatprep.subr.bf16.mxu0 %v9999_v5  ;;  %v9384_v46 = vcombine.low %v2227_v63, %v2231_v22  ;;  %v9320_v5 = vcombine.low %v2163_v7, %v2167_v42  ;;  %v9313_v58 = vcombine.high %v2155_v39, %v2159_v50  ;;  %v2191_v41 = vld [vmem:[#allocation9 + $0x478] sm:$0xff] }
 0x487   : > { %7951 = vmatprep.subr.bf16.mxu1 %v9233_v11  ;;  %v9377_v11 = vcombine.high %v2219_v16, %v2223_v36  ;;  %v2123_v55 = vld [vmem:[#allocation9 + $0x258] sm:$0xff] }
 0x488   : > { %v2127_v61 = vld [vmem:[#allocation9 + $0x278] sm:$0xff] }
 0x489   : > { %7909 = vmatpush1.bf16.msra.mxu0 %v9998_v30  ;;  %v2151_v30 = vld [vmem:[#allocation9 + $0x338] sm:$0xff] }
 0x48a   : > { %7952 = vmatpush1.bf16.msra.mxu1 %v9232_v14  ;;  %7910 = vmatprep.subr.bf16.mxu0 %v9991_v37  ;;  %v9376_v14 = vcombine.low %v2219_v16, %v2223_v36  ;;  %v9312_v37 = vcombine.low %v2155_v39, %v2159_v50  ;;  %v9305_v48 = vcombine.high %v2147_v26, %v2151_v30  ;;  %v2179_v63 = vld [vmem:[#allocation9 + $0x418] sm:$0xff] }
 0x48b   : > { %7953 = vmatprep.subr.bf16.mxu1 %v9225_v1  ;;  %v9369_v1 = vcombine.high %v2211_v6, %v2215_v53  ;;  %v2183_v22 = vld [vmem:[#allocation9 + $0x438] sm:$0xff] }
 0x48c   : > { %v2115_v7 = vld [vmem:[#allocation9 + $0x218] sm:$0xff] }
 0x48d   : > { %7911 = vmatpush1.bf16.msra.mxu0 %v9990_v21  ;;  %v9368_v21 = vcombine.low %v2211_v6, %v2215_v53  ;;  %v2119_v42 = vld [vmem:[#allocation9 + $0x238] sm:$0xff] }
 0x48e   : > { %7954 = vmatpush1.bf16.msra.mxu1 %v9224_v2  ;;  %7912 = vmatprep.subr.bf16.mxu0 %v9983_v44  ;;  %v9304_v2 = vcombine.low %v2147_v26, %v2151_v30  ;;  %v2299_v16 = vld [vmem:[#allocation9 + $0x7d8] sm:$0xff] }
 0x48f   : > { %7955 = vmatprep.subr.bf16.mxu1 %v9217_v0  ;;  %v9297_v0 = vcombine.high %v2139_v35, %v2143_v29  ;;  %v2303_v36 = vld [vmem:[#allocation9 + $0x7f8] sm:$0xff] }
 0x490   : > { %v2363_v39 = vld [vmem:[#allocation9 + $0x9d8] sm:$0xff] }
 0x491   : > { %7913 = vmatpush1.bf16.msra.mxu0 %v9982_v33  ;;  %v2367_v50 = vld [vmem:[#allocation9 + $0x9f8] sm:$0xff] }
 0x492   : > { %7956 = vmatpush1.bf16.msra.mxu1 %v9216_v23  ;;  %7914 = vmatprep.subr.bf16.mxu0 %v9975_v59  ;;  %v9296_v23 = vcombine.low %v2139_v35, %v2143_v29  ;;  %v9353_v59 = vcombine.high %v2195_v19, %v2199_v31  ;;  %v2291_v6 = vld [vmem:[#allocation9 + $0x798] sm:$0xff] }
 0x493   : > { %7957 = vmatprep.subr.bf16.mxu1 %v9209_v3  ;;  %v9289_v3 = vcombine.high %v2131_v8, %v2135_v24  ;;  %v2295_v53 = vld [vmem:[#allocation9 + $0x7b8] sm:$0xff] }
 0x494   : > { %v2355_v26 = vld [vmem:[#allocation9 + $0x998] sm:$0xff] }
 0x495   : > { %7915 = vmatpush1.bf16.msra.mxu0 %v9974_v27  ;;  %v9352_v27 = vcombine.low %v2195_v19, %v2199_v31  ;;  %v2359_v30 = vld [vmem:[#allocation9 + $0x9b8] sm:$0xff] }
 0x496   : > { %7958 = vmatpush1.bf16.msra.mxu1 %v9208_v4  ;;  %7986 = vmatprep.subr.bf16.mxu0 %v9393_v57  ;;  %v9288_v4 = vcombine.low %v2131_v8, %v2135_v24  ;;  %v9345_v57 = vcombine.high %v2187_v25, %v2191_v41  ;;  %v2347_v35 = vld [vmem:[#allocation9 + $0x958] sm:$0xff] }
 0x497   : > { %7959 = vmatprep.subr.bf16.mxu1 %v9329_v51  ;;  %v9281_v51 = vcombine.high %v2123_v55, %v2127_v61  ;;  %v2351_v29 = vld [vmem:[#allocation9 + $0x978] sm:$0xff] }
 0x498   : > { %7933 = vmatmul.mubr.bf16.vlgmr.msra.gmra.mxu0 %v11176_v40  ;;  %v2275_v19 = vld [vmem:[#allocation9 + $0x718] sm:$0xff] }
 0x499   : > { %7987 = vmatpush1.bf16.msra.mxu0 %v9392_v34  ;;  %8018 = vmatprep.mubr.bf16.mxu0 %v11121_v32  ;;  %v2203_v32 = vld [vmem:[#allocation9 + $0x4d8] sm:$0xff]  ;;  %v9344_v34 = vcombine.low %v2187_v25, %v2191_v41 }
 0x49a   : > { %7960 = vmatpush2.bf16.msra.mxu1 %v9328_v47  ;;  %7988 = vmatprep.subr.bf16.mxu0 %v9385_v62  ;;  %v9361_v44 = vcombine.high %v2203_v32, %v2207_v13  ;;  %v9360_v33 = vcombine.low %v2203_v32, %v2207_v13  ;;  %v9280_v47 = vcombine.low %v2123_v55, %v2127_v61  ;;  %v2283_v32 = vld [vmem:[#allocation9 + $0x758] sm:$0xff] }
 0x49b   : > { %7961 = vmatprep.subr.bf16.mxu1 %v9321_v56  ;;  %v9337_v62 = vcombine.high %v2179_v63, %v2183_v22  ;;  %v9273_v56 = vcombine.high %v2115_v7, %v2119_v42  ;;  %v2287_v13 = vld [vmem:[#allocation9 + $0x778] sm:$0xff] }
 0x49c   : > { %v2279_v31 = vld [vmem:[#allocation9 + $0x738] sm:$0xff] }
 0x49d   : > { %7989 = vmatpush1.bf16.msra.mxu0 %v9384_v46  ;;  %v9336_v46 = vcombine.low %v2179_v63, %v2183_v22  ;;  %v2339_v8 = vld [vmem:[#allocation9 + $0x918] sm:$0xff]  ;;  %v9432_v55 = vcombine.low %v2275_v19, %v2279_v31 }
 0x49e   : > { %7962 = vmatpush2.bf16.msra.mxu1 %v9320_v5  ;;  %7990 = vmatprep.subr.bf16.mxu0 %v9377_v11  ;;  %v9272_v5 = vcombine.low %v2115_v7, %v2119_v42  ;;  %v9457_v11 = vcombine.high %v2299_v16, %v2303_v36  ;;  %v2343_v24 = vld [vmem:[#allocation9 + $0x938] sm:$0xff] }
 0x49f   : > { %7963 = vmatprep.subr.bf16.mxu1 %v9313_v58  ;;  %v9521_v58 = vcombine.high %v2363_v39, %v2367_v50  ;;  %v2271_v25 = vld [vmem:[#allocation9 + $0x6f8] sm:$0xff]  ;;  %v9496_v61 = vcombine.low %v2339_v8, %v2343_v24 }
 0x4a0   : > { %v2335_v41 = vld [vmem:[#allocation9 + $0x8f8] sm:$0xff] }
 0x4a1   : > { %7991 = vmatpush1.bf16.msra.mxu0 %v9376_v14  ;;  %v9456_v14 = vcombine.low %v2299_v16, %v2303_v36  ;;  %v2323_v63 = vld [vmem:[#allocation9 + $0x898] sm:$0xff] }
 0x4a2   : > { %7964 = vmatpush2.bf16.msra.mxu1 %v9312_v37  ;;  %7992 = vmatprep.subr.bf16.mxu0 %v9369_v1  ;;  %v9520_v37 = vcombine.low %v2363_v39, %v2367_v50  ;;  %v9449_v1 = vcombine.high %v2291_v6, %v2295_v53  ;;  %v2327_v22 = vld [vmem:[#allocation9 + $0x8b8] sm:$0xff] }
 0x4a3   : > { %7965 = vmatprep.subr.bf16.mxu1 %v9305_v48  ;;  %v9513_v48 = vcombine.high %v2355_v26, %v2359_v30  ;;  %v2315_v16 = vld [vmem:[#allocation9 + $0x858] sm:$0xff]  ;;  %v9480_v50 = vcombine.low %v2323_v63, %v2327_v22 }
 0x4a4   : > { %v2319_v36 = vld [vmem:[#allocation9 + $0x878] sm:$0xff] }
 0x4a5   : > { %7993 = vmatpush1.bf16.msra.mxu0 %v9368_v21  ;;  %v9448_v21 = vcombine.low %v2291_v6, %v2295_v53  ;;  %v2307_v6 = vld [vmem:[#allocation9 + $0x818] sm:$0xff] }
 0x4a6   : > { %7966 = vmatpush2.bf16.msra.mxu1 %v9304_v2  ;;  %7994 = vmatprep.subr.bf16.mxu0 %v9361_v44  ;;  %v9512_v2 = vcombine.low %v2355_v26, %v2359_v30  ;;  %v9441_v44 = vcombine.high %v2283_v32, %v2287_v13  ;;  %v2311_v53 = vld [vmem:[#allocation9 + $0x838] sm:$0xff]  ;;  %v9472_v30 = vcombine.low %v2315_v16, %v2319_v36 }
 0x4a7   : > { %7967 = vmatprep.subr.bf16.mxu1 %v9297_v0  ;;  %v9505_v0 = vcombine.high %v2347_v35, %v2351_v29 }
 0x4a9   : > { %7995 = vmatpush1.bf16.msra.mxu0 %v9360_v33  ;;  %v9440_v33 = vcombine.low %v2283_v32, %v2287_v13  ;;  %v2427_v32 = vld [vmem:[#allocation9 + $0xbd8] sm:$0xff] }
 0x4aa   : > { %7968 = vmatpush2.bf16.msra.mxu1 %v9296_v23  ;;  %7996 = vmatprep.subr.bf16.mxu0 %v9353_v59  ;;  %v9504_v23 = vcombine.low %v2347_v35, %v2351_v29  ;;  %v9497_v59 = vcombine.high %v2339_v8, %v2343_v24  ;;  %v2431_v13 = vld [vmem:[#allocation9 + $0xbf8] sm:$0xff]  ;;  %v9464_v29 = vcombine.low %v2307_v6, %v2311_v53 }
 0x4ab   : > { %7969 = vmatprep.subr.bf16.mxu1 %v9289_v3  ;;  %v2267_v3 = vld [vmem:[#allocation9 + $0x6d8] sm:$0xff]  ;;  %v9584_v24 = vcombine.low %v2427_v32, %v2431_v13 }
 0x4ac   : > { %v9424_v7 = vcombine.low %v2267_v3, %v2271_v25 }
 0x4ad   : > { %7997 = vmatpush1.bf16.msra.mxu0 %v9352_v27  ;;  %v9425_v27 = vcombine.high %v2267_v3, %v2271_v25  ;;  %v2411_v3 = vld [vmem:[#allocation9 + $0xb58] sm:$0xff] }
 0x4ae   : > { %7970 = vmatpush2.bf16.msra.mxu1 %v9288_v4  ;;  %7998 = vmatprep.subr.bf16.mxu0 %v9345_v57  ;;  %v2259_v57 = vld [vmem:[#allocation9 + $0x698] sm:$0xff] }
 0x4af   : > { %7971 = vmatprep.subr.bf16.mxu1 %v9281_v51  ;;  %v2263_v51 = vld [vmem:[#allocation9 + $0x6b8] sm:$0xff] }
 0x4b0   : > { %v9416_v39 = vcombine.low %v2259_v57, %v2263_v51  ;;  %v2415_v25 = vld [vmem:[#allocation9 + $0xb78] sm:$0xff] }
 0x4b1   : > { %7999 = vmatpush1.bf16.msra.mxu0 %v9344_v34  ;;  %v9417_v34 = vcombine.high %v2259_v57, %v2263_v51  ;;  %v2403_v57 = vld [vmem:[#allocation9 + $0xb18] sm:$0xff] }
 0x4b2   : > { %7972 = vmatpush2.bf16.msra.mxu1 %v9280_v47  ;;  %8000 = vmatprep.subr.bf16.mxu0 %v9337_v62  ;;  %v9481_v47 = vcombine.high %v2323_v63, %v2327_v22  ;;  %v2251_v62 = vld [vmem:[#allocation9 + $0x658] sm:$0xff] }
 0x4b3   : > { %7973 = vmatprep.subr.bf16.mxu1 %v9273_v56  ;;  %v2255_v56 = vld [vmem:[#allocation9 + $0x678] sm:$0xff] }
 0x4b4   : > { %v9408_v26 = vcombine.low %v2251_v62, %v2255_v56  ;;  %v2407_v51 = vld [vmem:[#allocation9 + $0xb38] sm:$0xff] }
 0x4b5   : > { %8001 = vmatpush1.bf16.msra.mxu0 %v9336_v46  ;;  %v9409_v46 = vcombine.high %v2251_v62, %v2255_v56  ;;  %v9560_v56 = vcombine.low %v2403_v57, %v2407_v51 }
 0x4b6   : > { %7974 = vmatpush2.bf16.msra.mxu1 %v9272_v5  ;;  %8002 = vmatprep.subr.bf16.mxu0 %v9457_v11  ;;  %v9473_v5 = vcombine.high %v2315_v16, %v2319_v36  ;;  %v2243_v11 = vld [vmem:[#allocation9 + $0x618] sm:$0xff] }
 0x4b7   : > { %8029 = vmatprep.subr.bf16.mxu1 %v9521_v58  ;;  %v2247_v58 = vld [vmem:[#allocation9 + $0x638] sm:$0xff] }
 0x4b8   : > { %v9400_v35 = vcombine.low %v2243_v11, %v2247_v58 }
 0x4b9   : > { %7976 = vmatmul.mubr.bf16.vlgmr.msra.gmra.mxu1 %v11125_v38  ;;  %8003 = vmatpush2.bf16.msra.mxu0 %v9456_v14  ;;  %v9433_v38 = vcombine.high %v2275_v19, %v2279_v31  ;;  %v9401_v14 = vcombine.high %v2243_v11, %v2247_v58  ;;  %v2419_v19 = vld [vmem:[#allocation9 + $0xb98] sm:$0xff] }
 0x4ba   : > { %8030 = vmatpush1.bf16.msra.mxu1 %v9520_v37  ;;  %8061 = vmatprep.mubr.bf16.mxu1 %v11158_v52  ;;  %v2331_v52 = vld [vmem:[#allocation9 + $0x8d8] sm:$0xff]  ;;  %v9465_v37 = vcombine.high %v2307_v6, %v2311_v53 }
 0x4bb   : > { %8004 = vmatprep.subr.bf16.mxu0 %v9449_v1  ;;  %8031 = vmatprep.subr.bf16.mxu1 %v9513_v48  ;;  %v9489_v4 = vcombine.high %v2331_v52, %v2335_v41  ;;  %v9488_v42 = vcombine.low %v2331_v52, %v2335_v41  ;;  %v2491_v1 = vld [vmem:[#allocation9 + $0xdd8] sm:$0xff] }
 0x4bc   : > { %v2495_v48 = vld [vmem:[#allocation9 + $0xdf8] sm:$0xff] }
 0x4bd   : > { %8005 = vmatpush2.bf16.msra.mxu0 %v9448_v21  ;;  %v9649_v21 = vcombine.high %v2491_v1, %v2495_v48  ;;  %v2423_v31 = vld [vmem:[#allocation9 + $0xbb8] sm:$0xff]  ;;  %v9648_v8 = vcombine.low %v2491_v1, %v2495_v48 }
 0x4be   : > { %8032 = vmatpush1.bf16.msra.mxu1 %v9512_v2  ;;  %8006 = vmatprep.subr.bf16.mxu0 %v9441_v44  ;;  %v9585_v2 = vcombine.high %v2427_v32, %v2431_v13  ;;  %v2483_v44 = vld [vmem:[#allocation9 + $0xd98] sm:$0xff]  ;;  %v9576_v41 = vcombine.low %v2419_v19, %v2423_v31 }
 0x4bf   : > { %8033 = vmatprep.subr.bf16.mxu1 %v9505_v0  ;;  %v2487_v0 = vld [vmem:[#allocation9 + $0xdb8] sm:$0xff] }
 0x4c0   : > { %v9640_v52 = vcombine.low %v2483_v44, %v2487_v0 }
 0x4c1   : > { %8007 = vmatpush2.bf16.msra.mxu0 %v9440_v33  ;;  %v9641_v33 = vcombine.high %v2483_v44, %v2487_v0  ;;  %v11251_v0 = vpop.f32.mrf.mxu0 }
 0x4c2   : > { %8034 = vmatpush1.bf16.msra.mxu1 %v9504_v23  ;;  %8008 = vmatprep.subr.bf16.mxu0 %v9433_v38  ;;  %v9577_v23 = vcombine.high %v2419_v19, %v2423_v31  ;;  %v2475_v38 = vld [vmem:[#allocation9 + $0xd58] sm:$0xff] }
 0x4c3   : > { %8035 = vmatprep.subr.bf16.mxu1 %v9497_v59  ;;  %v2479_v59 = vld [vmem:[#allocation9 + $0xd78] sm:$0xff] }
 0x4c4   : > { %v9632_v63 = vcombine.low %v2475_v38, %v2479_v59 }
 0x4c5   : > { %8009 = vmatpush2.bf16.msra.mxu0 %v9432_v55  ;;  %v9633_v55 = vcombine.high %v2475_v38, %v2479_v59  ;;  %v2623_v38 = vld [vmem:[#allocation9 + $0x11f8] sm:$0xff] }
 0x4c6   : > { %8036 = vmatpush1.bf16.msra.mxu1 %v9496_v61  ;;  %8010 = vmatprep.subr.bf16.mxu0 %v9425_v27  ;;  %v9569_v61 = vcombine.high %v2411_v3, %v2415_v25  ;;  %v2467_v27 = vld [vmem:[#allocation9 + $0xd18] sm:$0xff] }
 0x4c7   : > { %8037 = vmatprep.subr.bf16.mxu1 %v9489_v4  ;;  %v2471_v4 = vld [vmem:[#allocation9 + $0xd38] sm:$0xff] }
 0x4c8   : > { %v9625_v22 = vcombine.high %v2467_v27, %v2471_v4  ;;  %v9624_v62 = vcombine.low %v2467_v27, %v2471_v4  ;;  %v2551_v27 = vld [vmem:[#allocation9 + $0xfb8] sm:$0xff] }
 0x4c9   : > { %8011 = vmatpush2.bf16.msra.mxu0 %v9424_v7  ;;  %v9561_v7 = vcombine.high %v2403_v57, %v2407_v51  ;;  %v2611_v4 = vld [vmem:[#allocation9 + $0x1198] sm:$0xff] }
 0x4ca   : > { %8038 = vmatpush1.bf16.msra.mxu1 %v9488_v42  ;;  %8012 = vmatprep.subr.bf16.mxu0 %v9417_v34  ;;  %v2463_v42 = vld [vmem:[#allocation9 + $0xcf8] sm:$0xff] }
 0x4cb   : > { %8039 = vmatprep.subr.bf16.mxu1 %v9481_v47  ;;  %v2395_v34 = vld [vmem:[#allocation9 + $0xad8] sm:$0xff] }
 0x4cc   : > { %v2399_v47 = vld [vmem:[#allocation9 + $0xaf8] sm:$0xff] }
 0x4cd   : > { %8013 = vmatpush2.bf16.msra.mxu0 %v9416_v39  ;;  %v9553_v36 = vcombine.high %v2395_v34, %v2399_v47  ;;  %v2451_v39 = vld [vmem:[#allocation9 + $0xc98] sm:$0xff]  ;;  %v9552_v58 = vcombine.low %v2395_v34, %v2399_v47 }
 0x4ce   : > { %8040 = vmatpush1.bf16.msra.mxu1 %v9480_v50  ;;  %8014 = vmatprep.subr.bf16.mxu0 %v9409_v46  ;;  %v2455_v50 = vld [vmem:[#allocation9 + $0xcb8] sm:$0xff] }
 0x4cf   : > { %8041 = vmatprep.subr.bf16.mxu1 %v9473_v5  ;;  %v2387_v46 = vld [vmem:[#allocation9 + $0xa98] sm:$0xff]  ;;  %v9609_v6 = vcombine.high %v2451_v39, %v2455_v50  ;;  %v9608_v1 = vcombine.low %v2451_v39, %v2455_v50 }
 0x4d0   : > { %v2391_v5 = vld [vmem:[#allocation9 + $0xab8] sm:$0xff] }
 0x4d1   : > { %8015 = vmatpush2.bf16.msra.mxu0 %v9408_v26  ;;  %v9545_v53 = vcombine.high %v2387_v46, %v2391_v5  ;;  %v2443_v26 = vld [vmem:[#allocation9 + $0xc58] sm:$0xff]  ;;  %v9544_v48 = vcombine.low %v2387_v46, %v2391_v5 }
 0x4d2   : > { %8042 = vmatpush1.bf16.msra.mxu1 %v9472_v30  ;;  %8016 = vmatprep.subr.bf16.mxu0 %v9401_v14  ;;  %v2447_v30 = vld [vmem:[#allocation9 + $0xc78] sm:$0xff] }
 0x4d3   : > { %8043 = vmatprep.subr.bf16.mxu1 %v9465_v37  ;;  %v2379_v14 = vld [vmem:[#allocation9 + $0xa58] sm:$0xff]  ;;  %v9601_v32 = vcombine.high %v2443_v26, %v2447_v30  ;;  %v9600_v44 = vcombine.low %v2443_v26, %v2447_v30 }
 0x4d4   : > { %v2383_v37 = vld [vmem:[#allocation9 + $0xa78] sm:$0xff] }
 0x4d5   : > { %8017 = vmatpush2.bf16.msra.mxu0 %v9400_v35  ;;  %v9537_v13 = vcombine.high %v2379_v14, %v2383_v37  ;;  %v2435_v35 = vld [vmem:[#allocation9 + $0xc18] sm:$0xff]  ;;  %v9536_v19 = vcombine.low %v2379_v14, %v2383_v37 }
 0x4d6   : > { %8044 = vmatpush1.bf16.msra.mxu1 %v9464_v29  ;;  %8072 = vmatprep.subr.bf16.mxu0 %v9649_v21  ;;  %v2439_v29 = vld [vmem:[#allocation9 + $0xc38] sm:$0xff] }
 0x4d7   : > { %8045 = vmatprep.subr.bf16.mxu1 %v9585_v2  ;;  %v2371_v21 = vld [vmem:[#allocation9 + $0xa18] sm:$0xff]  ;;  %v9593_v31 = vcombine.high %v2435_v35, %v2439_v29  ;;  %v9592_v59 = vcombine.low %v2435_v35, %v2439_v29 }
 0x4d8   : > { %8019 = vmatmul.mubr.bf16.vlgmr.msra.gmra.mxu0 %v11127_v43  ;;  %v9568_v43 = vcombine.low %v2411_v3, %v2415_v25  ;;  %v2375_v2 = vld [vmem:[#allocation9 + $0xa38] sm:$0xff]  ;;  %v11253_v3 = vpop.f32.mrf.mxu0 }
 0x4d9   : > { %8073 = vmatpush1.bf16.msra.mxu0 %v9648_v8  ;;  %8104 = vmatprep.mubr.bf16.mxu0 %v11160_v28  ;;  %v2459_v28 = vld [vmem:[#allocation9 + $0xcd8] sm:$0xff]  ;;  %v9529_v8 = vcombine.high %v2371_v21, %v2375_v2  ;;  %v9528_v25 = vcombine.low %v2371_v21, %v2375_v2 }
 0x4da   : > { %8046 = vmatpush2.bf16.msra.mxu1 %v9584_v24  ;;  %8074 = vmatprep.subr.bf16.mxu0 %v9641_v33  ;;  %v9617_v16 = vcombine.high %v2459_v28, %v2463_v42  ;;  %v9616_v11 = vcombine.low %v2459_v28, %v2463_v42  ;;  %v2555_v24 = vld [vmem:[#allocation9 + $0xfd8] sm:$0xff] }
 0x4db   : > { %8047 = vmatprep.subr.bf16.mxu1 %v9577_v23  ;;  %v2559_v33 = vld [vmem:[#allocation9 + $0xff8] sm:$0xff] }
 0x4dc   : > { %v2619_v23 = vld [vmem:[#allocation9 + $0x11d8] sm:$0xff]  ;;  %v9712_v51 = vcombine.low %v2555_v24, %v2559_v33 }
 0x4dd   : > { %8075 = vmatpush1.bf16.msra.mxu0 %v9640_v52  ;;  %v9713_v52 = vcombine.high %v2555_v24, %v2559_v33  ;;  %v2615_v57 = vld [vmem:[#allocation9 + $0x11b8] sm:$0xff] }
 0x4de   : > { %8048 = vmatpush2.bf16.msra.mxu1 %v9576_v41  ;;  %8076 = vmatprep.subr.bf16.mxu0 %v9633_v55  ;;  %v9777_v41 = vcombine.high %v2619_v23, %v2623_v38  ;;  %v2547_v55 = vld [vmem:[#allocation9 + $0xf98] sm:$0xff] }
 0x4df   : > { %8049 = vmatprep.subr.bf16.mxu1 %v9569_v61  ;;  %v11255_v61 = vpop.f32.mrf.mxu1  ;;  %v2539_v28 = vld [vmem:[#allocation9 + $0xf58] sm:$0xff] }
 0x4e0   : > { %v2543_v42 = vld [vmem:[#allocation9 + $0xf78] sm:$0xff] }
 0x4e1   : > { %8077 = vmatpush1.bf16.msra.mxu0 %v9632_v63  ;;  %v11257_v63 = vpop.f32.mrf.mxu0  ;;  %v11259_v34 = vpop.f32.mrf.mxu1  ;;  %v2603_v47 = vld [vmem:[#allocation9 + $0x1158] sm:$0xff]  ;;  %v9697_v39 = vcombine.high %v2539_v28, %v2543_v42 }
 0x4e2   : > { %8050 = vmatpush2.bf16.msra.mxu1 %v9568_v43  ;;  %8078 = vmatprep.subr.bf16.mxu0 %v9625_v22  ;;  %v9776_v43 = vcombine.low %v2619_v23, %v2623_v38  ;;  %v9705_v22 = vcombine.high %v2547_v55, %v2551_v27  ;;  %v2531_v46 = vld [vmem:[#allocation9 + $0xf18] sm:$0xff] }
 0x4e3   : > { %8051 = vmatprep.subr.bf16.mxu1 %v9561_v7  ;;  %v9769_v7 = vcombine.high %v2611_v4, %v2615_v57  ;;  %v2535_v5 = vld [vmem:[#allocation9 + $0xf38] sm:$0xff] }
 0x4e4   : > { %v9689_v30 = vcombine.high %v2531_v46, %v2535_v5  ;;  %v2523_v14 = vld [vmem:[#allocation9 + $0xed8] sm:$0xff]  ;;  %v9688_v35 = vcombine.low %v2531_v46, %v2535_v5 }
 0x4e5   : > { %8079 = vmatpush1.bf16.msra.mxu0 %v9624_v62  ;;  %v2607_v62 = vld [vmem:[#allocation9 + $0x1178] sm:$0xff] }
 0x4e6   : > { %8052 = vmatpush2.bf16.msra.mxu1 %v9560_v56  ;;  %8080 = vmatprep.subr.bf16.mxu0 %v9617_v16  ;;  %v9704_v56 = vcombine.low %v2547_v55, %v2551_v27  ;;  %v11262_v16 = vpop.f32.mrf.mxu0  ;;  %v9761_v50 = vcombine.high %v2603_v47, %v2607_v62  ;;  %v9760_v26 = vcombine.low %v2603_v47, %v2607_v62  ;;  %v2527_v37 = vld [vmem:[#allocation9 + $0xef8] sm:$0xff] }
 0x4e7   : > { %8053 = vmatprep.subr.bf16.mxu1 %v9553_v36  ;;  %v9768_v36 = vcombine.low %v2611_v4, %v2615_v57  ;;  %v9681_v2 = vcombine.high %v2523_v14, %v2527_v37  ;;  %v2579_v24 = vld [vmem:[#allocation9 + $0x1098] sm:$0xff]  ;;  %v9680_v23 = vcombine.low %v2523_v14, %v2527_v37 }
 0x4e8   : > { %v2583_v33 = vld [vmem:[#allocation9 + $0x10b8] sm:$0xff] }
 0x4e9   : > { %8081 = vmatpush1.bf16.msra.mxu0 %v9616_v11  ;;  %v11265_v11 = vpop.f32.mrf.mxu1  ;;  %v2511_v55 = vld [vmem:[#allocation9 + $0xe78] sm:$0xff] }
 0x4ea   : > { %8054 = vmatpush2.bf16.msra.mxu1 %v9552_v58  ;;  %8082 = vmatprep.subr.bf16.mxu0 %v9609_v6  ;;  %v11267_v58 = vpop.f32.mrf.mxu0  ;;  %v2595_v6 = vld [vmem:[#allocation9 + $0x1118] sm:$0xff] }
 0x4eb   : > { %8055 = vmatprep.subr.bf16.mxu1 %v9545_v53  ;;  %v9696_v53 = vcombine.low %v2539_v28, %v2543_v42  ;;  %v2571_v4 = vld [vmem:[#allocation9 + $0x1058] sm:$0xff] }
 0x4ec   : > { %v2575_v57 = vld [vmem:[#allocation9 + $0x1078] sm:$0xff] }
 0x4ed   : > { %8083 = vmatpush1.bf16.msra.mxu0 %v9608_v1  ;;  %v11269_v1 = vpop.f32.mrf.mxu1  ;;  %v9729_v42 = vcombine.high %v2571_v4, %v2575_v57  ;;  %v2499_v47 = vld [vmem:[#allocation9 + $0xe18] sm:$0xff]  ;;  %v9728_v5 = vcombine.low %v2571_v4, %v2575_v57 }
 0x4ee   : > { %8056 = vmatpush2.bf16.msra.mxu1 %v9544_v48  ;;  %8084 = vmatprep.subr.bf16.mxu0 %v9601_v32  ;;  %v11271_v48 = vpop.f32.mrf.mxu0  ;;  %v2587_v32 = vld [vmem:[#allocation9 + $0x10d8] sm:$0xff] }
 0x4ef   : > { %8057 = vmatprep.subr.bf16.mxu1 %v9537_v13  ;;  %v2591_v13 = vld [vmem:[#allocation9 + $0x10f8] sm:$0xff]  ;;  %v11273_v29 = vpop.f32.mrf.mxu1 }
 0x4f0   : > { %v2503_v62 = vld [vmem:[#allocation9 + $0xe38] sm:$0xff] }
 0x4f1   : > { %8085 = vmatpush1.bf16.msra.mxu0 %v9600_v44  ;;  %v9745_v44 = vcombine.high %v2587_v32, %v2591_v13  ;;  %v11277_v38 = vpop.f32.mrf.mxu1  ;;  %v2687_v14 = vld [vmem:[#allocation9 + $0x13f8] sm:$0xff]  ;;  %v9656_v37 = vcombine.low %v2499_v47, %v2503_v62 }
 0x4f2   : > { %8058 = vmatpush2.bf16.msra.mxu1 %v9536_v19  ;;  %8086 = vmatprep.subr.bf16.mxu0 %v9593_v31  ;;  %v2515_v19 = vld [vmem:[#allocation9 + $0xe98] sm:$0xff] }
 0x4f3   : > { %8059 = vmatprep.subr.bf16.mxu1 %v9529_v8  ;;  %v2519_v31 = vld [vmem:[#allocation9 + $0xeb8] sm:$0xff]  ;;  %v11275_v8 = vpop.f32.mrf.mxu0 }
 0x4f5   : > { %8087 = vmatpush1.bf16.msra.mxu0 %v9592_v59  ;;  %v9744_v59 = vcombine.low %v2587_v32, %v2591_v13  ;;  %v11279_v27 = vpop.f32.mrf.mxu0 }
 0x4f6   : > { %8060 = vmatpush2.bf16.msra.mxu1 %v9528_v25  ;;  %8088 = vmatprep.subr.bf16.mxu0 %v9713_v52  ;;  %v9673_v25 = vcombine.high %v2515_v19, %v2519_v31  ;;  %v9737_v52 = vcombine.high %v2579_v24, %v2583_v33 }
 0x4f7   : > { %8115 = vmatprep.subr.bf16.mxu1 %v9777_v41  ;;  %v2507_v41 = vld [vmem:[#allocation9 + $0xe58] sm:$0xff] }
 0x4f8   : > { %v9665_v28 = vcombine.high %v2507_v41, %v2511_v55 }
 0x4f9   : > { %8062 = vmatmul.mubr.bf16.vlgmr.msra.gmra.mxu1 %v11201_v18  ;;  %8089 = vmatpush2.bf16.msra.mxu0 %v9712_v51  ;;  %v2599_v18 = vld [vmem:[#allocation9 + $0x1138] sm:$0xff]  ;;  %v9672_v51 = vcombine.low %v2515_v19, %v2519_v31 }
 0x4fa   : > { %8116 = vmatpush1.bf16.msra.mxu1 %v9776_v43  ;;  %8147 = vmatprep.mubr.bf16.mxu1 %v11205_v45  ;;  %v9753_v45 = vcombine.high %v2595_v6, %v2599_v18  ;;  %v9752_v21 = vcombine.low %v2595_v6, %v2599_v18  ;;  %v11281_v43 = vpop.f32.mrf.mxu1  ;;  %v9657_v6 = vcombine.high %v2499_v47, %v2503_v62  ;;  %v2675_v31 = vld [vmem:[#allocation9 + $0x1398] sm:$0xff] }
 0x4fb   : > { %8090 = vmatprep.subr.bf16.mxu0 %v9705_v22  ;;  %8117 = vmatprep.subr.bf16.mxu1 %v9769_v7  ;;  %v11283_v22 = vpop.f32.mrf.mxu0  ;;  %v9736_v7 = vcombine.low %v2579_v24, %v2583_v33  ;;  %v2679_v24 = vld [vmem:[#allocation9 + $0x13b8] sm:$0xff] }
 0x4fd   : > { %8091 = vmatpush2.bf16.msra.mxu0 %v9704_v56  ;;  %v2563_v56 = vld [vmem:[#allocation9 + $0x1018] sm:$0xff]  ;;  %v11287_v46 = vpop.f32.mrf.mxu0 }
 0x4fe   : > { %8118 = vmatpush1.bf16.msra.mxu1 %v9768_v36  ;;  %8092 = vmatprep.subr.bf16.mxu0 %v9697_v39  ;;  %v2567_v36 = vld [vmem:[#allocation9 + $0x1038] sm:$0xff]  ;;  %v9664_v39 = vcombine.low %v2507_v41, %v2511_v55 }
 0x4ff   : > { %8119 = vmatprep.subr.bf16.mxu1 %v9761_v50  ;;  %v11285_v50 = vpop.f32.mrf.mxu1  ;;  %v9721_v18 = vcombine.high %v2563_v56, %v2567_v36  ;;  %v11291_v32 = vpop.f32.mrf.mxu0  ;;  %v9720_v13 = vcombine.low %v2563_v56, %v2567_v36  ;;  %v2731_v41 = vld [vmem:[#allocation9 + $0x1558] sm:$0xff] }
 0x500   : > { %v2735_v55 = vld [vmem:[#allocation9 + $0x1578] sm:$0xff] }
 0x501   : > { %8093 = vmatpush2.bf16.msra.mxu0 %v9696_v53  ;;  %v2747_v53 = vld [vmem:[#allocation9 + $0x15d8] sm:$0xff]  ;;  %v9889_v47 = vcombine.high %v2731_v41, %v2735_v55 }
 0x502   : > { %8120 = vmatpush1.bf16.msra.mxu1 %v9760_v26  ;;  %8094 = vmatprep.subr.bf16.mxu0 %v9689_v30  ;;  %v2751_v26 = vld [vmem:[#allocation9 + $0x15f8] sm:$0xff]  ;;  %v11289_v30 = vpop.f32.mrf.mxu1 }
 0x503   : > { %8121 = vmatprep.subr.bf16.mxu1 %v9753_v45  ;;  %11534 = vst [vmem:[#allocation27_spill] sm:$0xff] %v11289_v30  ;;  %v2683_v45 = vld [vmem:[#allocation9 + $0x13d8] sm:$0xff]  ;;  %v9904_v33 = vcombine.low %v2747_v53, %v2751_v26 }
 0x504   : > { %v11293_v19 = vpop.f32.mrf.mxu1  ;;  %v2723_v56 = vld [vmem:[#allocation9 + $0x1518] sm:$0xff] }
 0x505   : > { %8095 = vmatpush2.bf16.msra.mxu0 %v9688_v35  ;;  %v9905_v35 = vcombine.high %v2747_v53, %v2751_v26  ;;  %11535 = vst [vmem:[#allocation28_spill] sm:$0xff] %v11293_v19  ;;  %v2727_v36 = vld [vmem:[#allocation9 + $0x1538] sm:$0xff] }
 0x506   : > { %8122 = vmatpush1.bf16.msra.mxu1 %v9752_v21  ;;  %8096 = vmatprep.subr.bf16.mxu0 %v9681_v2  ;;  %v9841_v21 = vcombine.high %v2683_v45, %v2687_v14  ;;  %v2739_v2 = vld [vmem:[#allocation9 + $0x1598] sm:$0xff]  ;;  %v11297_v4 = vpop.f32.mrf.mxu1  ;;  %v9881_v26 = vcombine.high %v2723_v56, %v2727_v36 }
 0x507   : > { %8123 = vmatprep.subr.bf16.mxu1 %v9745_v44  ;;  %v2743_v44 = vld [vmem:[#allocation9 + $0x15b8] sm:$0xff] }
 0x508   : > { %v2839_v19 = vld [vmem:[#allocation9 + $0x18b8] sm:$0xff] }
 0x509   : > { %8097 = vmatpush2.bf16.msra.mxu0 %v9680_v23  ;;  %v11295_v23 = vpop.f32.mrf.mxu0 }
 0x50a   : > { %8124 = vmatpush1.bf16.msra.mxu1 %v9744_v59  ;;  %8098 = vmatprep.subr.bf16.mxu0 %v9673_v25  ;;  %v9840_v59 = vcombine.low %v2683_v45, %v2687_v14  ;;  %v9897_v25 = vcombine.high %v2739_v2, %v2743_v44  ;;  %v2715_v14 = vld [vmem:[#allocation9 + $0x14d8] sm:$0xff] }
 0x50b   : > { %8125 = vmatprep.subr.bf16.mxu1 %v9737_v52  ;;  %v9833_v52 = vcombine.high %v2675_v31, %v2679_v24  ;;  %v11299_v57 = vpop.f32.mrf.mxu0 }
 0x50c   : > { %11536 = vst [vmem:[#allocation29_spill] sm:$0xff] %v11299_v57  ;;  %v2863_v57 = vld [vmem:[#allocation9 + $0x1978] sm:$0xff] }
 0x50d   : > { %8099 = vmatpush2.bf16.msra.mxu0 %v9672_v51  ;;  %v2667_v51 = vld [vmem:[#allocation9 + $0x1358] sm:$0xff] }
 0x50e   : > { %8126 = vmatpush1.bf16.msra.mxu1 %v9736_v7  ;;  %8100 = vmatprep.subr.bf16.mxu0 %v9665_v28  ;;  %v2671_v7 = vld [vmem:[#allocation9 + $0x1378] sm:$0xff]  ;;  %v9896_v28 = vcombine.low %v2739_v2, %v2743_v44  ;;  %v9880_v2 = vcombine.low %v2723_v56, %v2727_v36 }
 0x50f   : > { %8127 = vmatprep.subr.bf16.mxu1 %v9729_v42  ;;  %v9832_v42 = vcombine.low %v2675_v31, %v2679_v24  ;;  %v9825_v62 = vcombine.high %v2667_v51, %v2671_v7  ;;  %v2699_v56 = vld [vmem:[#allocation9 + $0x1458] sm:$0xff] }
 0x510   : > { %v2703_v36 = vld [vmem:[#allocation9 + $0x1478] sm:$0xff] }
 0x511   : > { %8101 = vmatpush2.bf16.msra.mxu0 %v9664_v39  ;;  %v11303_v39 = vpop.f32.mrf.mxu1 }
 0x512   : > { %8128 = vmatpush1.bf16.msra.mxu1 %v9728_v5  ;;  %8102 = vmatprep.subr.bf16.mxu0 %v9657_v6  ;;  %v11305_v5 = vpop.f32.mrf.mxu0  ;;  %v2659_v6 = vld [vmem:[#allocation9 + $0x1318] sm:$0xff] }
 0x513   : > { %8129 = vmatprep.subr.bf16.mxu1 %v9721_v18  ;;  %11537 = vst [vmem:[#allocation30_spill] sm:$0xff] %v11305_v5  ;;  %v9888_v18 = vcombine.low %v2731_v41, %v2735_v55  ;;  %v11307_v53 = vpop.f32.mrf.mxu1  ;;  %v2643_v41 = vld [vmem:[#allocation9 + $0x1298] sm:$0xff] }
 0x514   : > { %v2647_v55 = vld [vmem:[#allocation9 + $0x12b8] sm:$0xff] }
 0x515   : > { %8103 = vmatpush2.bf16.msra.mxu0 %v9656_v37  ;;  %v2719_v37 = vld [vmem:[#allocation9 + $0x14f8] sm:$0xff]  ;;  %v11311_v44 = vpop.f32.mrf.mxu1 }
 0x516   : > { %8130 = vmatpush1.bf16.msra.mxu1 %v9720_v13  ;;  %8158 = vmatprep.subr.bf16.mxu0 %v9905_v35  ;;  %v11309_v13 = vpop.f32.mrf.mxu0  ;;  %v2651_v35 = vld [vmem:[#allocation9 + $0x12d8] sm:$0xff]  ;;  %v9873_v24 = vcombine.high %v2715_v14, %v2719_v37 }
 0x517   : > { %8131 = vmatprep.subr.bf16.mxu1 %v9841_v21  ;;  %11538 = vst [vmem:[#allocation31_spill] sm:$0xff] %v11309_v13  ;;  %v2655_v21 = vld [vmem:[#allocation9 + $0x12f8] sm:$0xff] }
 0x518   : > { %8105 = vmatmul.mubr.bf16.vlgmr.msra.gmra.mxu0 %v11203_v60  ;;  %v2663_v60 = vld [vmem:[#allocation9 + $0x1338] sm:$0xff] }
 0x519   : > { %8159 = vmatpush1.bf16.msra.mxu0 %v9904_v33  ;;  %8190 = vmatprep.mubr.bf16.mxu0 %v11208_v54  ;;  %v9824_v54 = vcombine.low %v2667_v51, %v2671_v7  ;;  %v9817_v45 = vcombine.high %v2659_v6, %v2663_v60  ;;  %v9816_v31 = vcombine.low %v2659_v6, %v2663_v60  ;;  %v11315_v7 = vpop.f32.mrf.mxu1  ;;  %v2635_v6 = vld [vmem:[#allocation9 + $0x1258] sm:$0xff] }
 0x51a   : > { %8132 = vmatpush2.bf16.msra.mxu1 %v9840_v59  ;;  %8160 = vmatprep.subr.bf16.mxu0 %v9897_v25  ;;  %v9809_v33 = vcombine.high %v2651_v35, %v2655_v21  ;;  %v2707_v59 = vld [vmem:[#allocation9 + $0x1498] sm:$0xff]  ;;  %v9872_v51 = vcombine.low %v2715_v14, %v2719_v37  ;;  %v9857_v14 = vcombine.high %v2699_v56, %v2703_v36 }
 0x51b   : > { %8133 = vmatprep.subr.bf16.mxu1 %v9833_v52  ;;  %v2711_v25 = vld [vmem:[#allocation9 + $0x14b8] sm:$0xff]  ;;  %v11313_v52 = vpop.f32.mrf.mxu0 }
 0x51c   : > { %v2639_v60 = vld [vmem:[#allocation9 + $0x1278] sm:$0xff] }
 0x51d   : > { %8161 = vmatpush1.bf16.msra.mxu0 %v9896_v28  ;;  %v11317_v28 = vpop.f32.mrf.mxu0  ;;  %v9793_v37 = vcombine.high %v2635_v6, %v2639_v60  ;;  %v2855_v5 = vld [vmem:[#allocation9 + $0x1938] sm:$0xff] }
 0x51e   : > { %8134 = vmatpush2.bf16.msra.mxu1 %v9832_v42  ;;  %8162 = vmatprep.subr.bf16.mxu0 %v9889_v47  ;;  %v9808_v42 = vcombine.low %v2651_v35, %v2655_v21  ;;  %v9865_v47 = vcombine.high %v2707_v59, %v2711_v25  ;;  %v2691_v35 = vld [vmem:[#allocation9 + $0x1418] sm:$0xff] }
 0x51f   : > { %8135 = vmatprep.subr.bf16.mxu1 %v9825_v62  ;;  %v9801_v62 = vcombine.high %v2643_v41, %v2647_v55  ;;  %v2695_v21 = vld [vmem:[#allocation9 + $0x1438] sm:$0xff] }
 0x520   : > { %v9848_v10 = vcombine.low %v2691_v35, %v2695_v21 }
 0x521   : > { %8163 = vmatpush1.bf16.msra.mxu0 %v9888_v18  ;;  %v9864_v18 = vcombine.low %v2707_v59, %v2711_v25  ;;  %v9792_v59 = vcombine.low %v2635_v6, %v2639_v60  ;;  %v9849_v25 = vcombine.high %v2691_v35, %v2695_v21  ;;  %v2803_v60 = vld [vmem:[#allocation9 + $0x1798] sm:$0xff] }
 0x522   : > { %8136 = vmatpush2.bf16.msra.mxu1 %v9824_v54  ;;  %8164 = vmatprep.subr.bf16.mxu0 %v9881_v26  ;;  %v11319_v54 = vpop.f32.mrf.mxu1  ;;  %v11321_v26 = vpop.f32.mrf.mxu0 }
 0x523   : > { %8137 = vmatprep.subr.bf16.mxu1 %v9817_v45  ;;  %v9800_v45 = vcombine.low %v2643_v41, %v2647_v55  ;;  %v2811_v55 = vld [vmem:[#allocation9 + $0x17d8] sm:$0xff] }
 0x525   : > { %8165 = vmatpush1.bf16.msra.mxu0 %v9880_v2  ;;  %v11323_v2 = vpop.f32.mrf.mxu1 }
 0x526   : > { %8138 = vmatpush2.bf16.msra.mxu1 %v9816_v31  ;;  %8166 = vmatprep.subr.bf16.mxu0 %v9873_v24  ;;  %v2627_v31 = vld [vmem:[#allocation9 + $0x1218] sm:$0xff] }
 0x527   : > { %8139 = vmatprep.subr.bf16.mxu1 %v9809_v33  ;;  %v2631_v24 = vld [vmem:[#allocation9 + $0x1238] sm:$0xff]  ;;  %v9856_v33 = vcombine.low %v2699_v56, %v2703_v36 }
 0x528   : > { %v9785_v41 = vcombine.high %v2627_v31, %v2631_v24  ;;  %v9784_v56 = vcombine.low %v2627_v31, %v2631_v24  ;;  %v2795_v24 = vld [vmem:[#allocation9 + $0x1758] sm:$0xff] }
 0x529   : > { %8167 = vmatpush1.bf16.msra.mxu0 %v9872_v51  ;;  %v11325_v51 = vpop.f32.mrf.mxu0 }
 0x52a   : > { %8140 = vmatpush2.bf16.msra.mxu1 %v9808_v42  ;;  %8168 = vmatprep.subr.bf16.mxu0 %v9865_v47  ;;  %v2815_v42 = vld [vmem:[#allocation9 + $0x17f8] sm:$0xff]  ;;  %v11327_v47 = vpop.f32.mrf.mxu1 }
 0x52b   : > { %8141 = vmatprep.subr.bf16.mxu1 %v9801_v62  ;;  %v2875_v62 = vld [vmem:[#allocation9 + $0x19d8] sm:$0xff]  ;;  %v11329_v9 = vpop.f32.mrf.mxu0  ;;  %v9969_v36 = vcombine.high %v2811_v55, %v2815_v42  ;;  %v9968_v40 = vcombine.low %v2811_v55, %v2815_v42 }
 0x52c   : > { %v10033_v6 = vcombine.high %v2875_v62, %v2879_v15  ;;  %v10032_v35 = vcombine.low %v2875_v62, %v2879_v15  ;;  %v2787_v62 = vld [vmem:[#allocation9 + $0x1718] sm:$0xff] }
 0x52d   : > { %8169 = vmatpush1.bf16.msra.mxu0 %v9864_v18  ;;  %v2807_v18 = vld [vmem:[#allocation9 + $0x17b8] sm:$0xff] }
 0x52e   : > { %8142 = vmatpush2.bf16.msra.mxu1 %v9800_v45  ;;  %8170 = vmatprep.subr.bf16.mxu0 %v9857_v14  ;;  %v11331_v45 = vpop.f32.mrf.mxu1  ;;  %v11333_v14 = vpop.f32.mrf.mxu0  ;;  %v9961_v21 = vcombine.high %v2803_v60, %v2807_v18  ;;  %v9960_v49 = vcombine.low %v2803_v60, %v2807_v18 }
 0x52f   : > { %8143 = vmatprep.subr.bf16.mxu1 %v9793_v37  ;;  %v2867_v37 = vld [vmem:[#allocation9 + $0x1998] sm:$0xff] }
 0x530   : > { %v10025_v31 = vcombine.high %v2867_v37, %v2871_v12  ;;  %v10024_v15 = vcombine.low %v2867_v37, %v2871_v12  ;;  %v2779_v37 = vld [vmem:[#allocation9 + $0x16d8] sm:$0xff] }
 0x531   : > { %8171 = vmatpush1.bf16.msra.mxu0 %v9856_v33  ;;  %v2799_v33 = vld [vmem:[#allocation9 + $0x1778] sm:$0xff] }
 0x532   : > { %8144 = vmatpush2.bf16.msra.mxu1 %v9792_v59  ;;  %8172 = vmatprep.subr.bf16.mxu0 %v9849_v25  ;;  %v11335_v59 = vpop.f32.mrf.mxu1  ;;  %v11337_v25 = vpop.f32.mrf.mxu0  ;;  %v9953_v55 = vcombine.high %v2795_v24, %v2799_v33 }
 0x533   : > { %8145 = vmatprep.subr.bf16.mxu1 %v9785_v41  ;;  %v2859_v41 = vld [vmem:[#allocation9 + $0x1958] sm:$0xff] }
 0x534   : > { %v10017_v42 = vcombine.high %v2859_v41, %v2863_v57  ;;  %v10016_v60 = vcombine.low %v2859_v41, %v2863_v57  ;;  %v2771_v41 = vld [vmem:[#allocation9 + $0x1698] sm:$0xff] }
 0x535   : > { %8173 = vmatpush1.bf16.msra.mxu0 %v9848_v10  ;;  %v11340_v10 = vpop.f32.mrf.mxu1 }
 0x536   : > { %8146 = vmatpush2.bf16.msra.mxu1 %v9784_v56  ;;  %8174 = vmatprep.subr.bf16.mxu0 %v9969_v36  ;;  %v2791_v56 = vld [vmem:[#allocation9 + $0x1738] sm:$0xff]  ;;  %v11343_v36 = vpop.f32.mrf.mxu0 }
 0x537   : > { %8201 = vmatprep.subr.bf16.mxu1 %v10033_v6  ;;  %v2851_v6 = vld [vmem:[#allocation9 + $0x1918] sm:$0xff]  ;;  %v9945_v18 = vcombine.high %v2787_v62, %v2791_v56  ;;  %v9944_v13 = vcombine.low %v2787_v62, %v2791_v56  ;;  %v7120_v62 = vadd.f32 %v11259_v34, %v11253_v3  ;;  %v7122_v56 = vadd.f32 %v11265_v11, %v11257_v63 }
 0x538   : > { %v10009_v12 = vcombine.high %v2851_v6, %v2855_v5  ;;  %v2827_v11 = vld [vmem:[#allocation9 + $0x1858] sm:$0xff] }
 0x539   : > { %8148 = vmatmul.mubr.bf16.vlgmr.msra.gmra.mxu1 %v11169_v17  ;;  %8175 = vmatpush2.bf16.msra.mxu0 %v9968_v40  ;;  %v9952_v17 = vcombine.low %v2795_v24, %v2799_v33  ;;  %v11345_v40 = vpop.f32.mrf.mxu1  ;;  %v10008_v24 = vcombine.low %v2851_v6, %v2855_v5  ;;  %v7163_v3 = vadd.f32 %v11271_v48, %v7120_v62 }
 0x53a   : > { %8202 = vmatpush1.bf16.msra.mxu1 %v10032_v35  ;;  %8176 = vmatprep.subr.bf16.mxu0 %v9961_v21  ;;  %v2783_v35 = vld [vmem:[#allocation9 + $0x16f8] sm:$0xff]  ;;  %v11347_v21 = vpop.f32.mrf.mxu0  ;;  %v7165_v34 = vadd.f32 %v11275_v8, %v7122_v56 }
 0x53b   : > { %8203 = vmatprep.subr.bf16.mxu1 %v10025_v31  ;;  %8233 = vmatprep.mubr.bf16.mxu1 %v11533_v20  ;;  %v2843_v31 = vld [vmem:[#allocation9 + $0x18d8] sm:$0xff]  ;;  %v11349_v30 = vpop.f32.mrf.mxu1  ;;  %v9937_v33 = vcombine.high %v2779_v37, %v2783_v35 }
 0x53c   : > { %v2847_v20 = vld [vmem:[#allocation9 + $0x18f8] sm:$0xff] }
 0x53d   : > { %8177 = vmatpush2.bf16.msra.mxu0 %v9960_v49  ;;  %v11351_v49 = vpop.f32.mrf.mxu0  ;;  %v10001_v57 = vcombine.high %v2843_v31, %v2847_v20  ;;  %v7553_v6 = vpop.f32.mrf.mxu1 }
 0x53e   : > { %8204 = vmatpush1.bf16.msra.mxu1 %v10024_v15  ;;  %8178 = vmatprep.subr.bf16.mxu0 %v9953_v55  ;;  %11539 = vst [vmem:[#allocation32_spill] sm:$0xff] %v11351_v49  ;;  %v2775_v15 = vld [vmem:[#allocation9 + $0x16b8] sm:$0xff]  ;;  %v7124_v55 = vadd.f32 %v11269_v1, %v11262_v16 }
 0x53f   : > { %8205 = vmatprep.subr.bf16.mxu1 %v10017_v42  ;;  %v2835_v42 = vld [vmem:[#allocation9 + $0x1898] sm:$0xff]  ;;  %v11364_v63 = vpop.f32.mrf.mxu1 }
 0x540   : > { %v7167_v5 = vadd.f32 %v11279_v27, %v7124_v55  ;;  %v9993_v16 = vcombine.high %v2835_v42, %v2839_v19  ;;  %v2763_v1 = vld [vmem:[#allocation9 + $0x1658] sm:$0xff]  ;;  %v7118_v27 = vadd.f32 %v11255_v61, %v11251_v0  ;;  %v9992_v48 = vcombine.low %v2835_v42, %v2839_v19 }
 0x541   : > { %8179 = vmatpush2.bf16.msra.mxu0 %v9952_v17  ;;  %v9936_v17 = vcombine.low %v2779_v37, %v2783_v35  ;;  %v2767_v49 = vld [vmem:[#allocation9 + $0x1678] sm:$0xff]  ;;  %v7425_v37 = vadd.f32 %v11329_v9, %v11319_v54  ;;  %v9928_v35 = vcombine.low %v2771_v41, %v2775_v15  ;;  %v7206_v61 = vadd.f32 %v11277_v38, %v7163_v3 }
 0x542   : > { %8206 = vmatpush1.bf16.msra.mxu1 %v10016_v60  ;;  %8180 = vmatprep.subr.bf16.mxu0 %v9945_v18  ;;  %v11360_v60 = vpop.f32.mrf.mxu0  ;;  %v10000_v18 = vcombine.low %v2843_v31, %v2847_v20  ;;  %v7210_v31 = vadd.f32 %v11285_v50, %v7167_v5  ;;  %v7161_v8 = vadd.f32 %v11267_v58, %v7118_v27  ;;  %v2755_v55 = vld [vmem:[#allocation9 + $0x1618] sm:$0xff] }
 0x543   : > { %8207 = vmatprep.subr.bf16.mxu1 %v10009_v12  ;;  %v9929_v12 = vcombine.high %v2771_v41, %v2775_v15  ;;  %v2759_v0 = vld [vmem:[#allocation9 + $0x1638] sm:$0xff]  ;;  %v7208_v9 = vadd.f32 %v11281_v43, %v7165_v34  ;;  %v7423_v50 = vadd.f32 %v11325_v51, %v11315_v7  ;;  %v7635_v41 = vpop.f32.mrf.mxu1  ;;  %v7419_v58 = vadd.f32 %v11317_v28, %v11307_v53 }
 0x544   : > { %v7594_v20 = vpop.f32.mrf.mxu0  ;;  %v7253_v54 = vadd.f32 %v11295_v23, %v7210_v31  ;;  %v2819_v19 = vld [vmem:[#allocation9 + $0x1818] sm:$0xff]  ;;  %v9920_v38 = vcombine.low %v2763_v1, %v2767_v49  ;;  %v9913_v7 = vcombine.high %v2755_v55, %v2759_v0  ;;  %v7204_v51 = vadd.f32 %v11273_v29, %v7161_v8 }
 0x545   : > { %8181 = vmatpush2.bf16.msra.mxu0 %v9944_v13  ;;  %v2831_v13 = vld [vmem:[#allocation9 + $0x1878] sm:$0xff]  ;;  %v7466_v43 = vadd.f32 %v11331_v45, %v7423_v50  ;;  %v7251_v28 = vadd.f32 %v11291_v32, %v7208_v9  ;;  %v9912_v29 = vcombine.low %v2755_v55, %v2759_v0 }
 0x546   : > { %8208 = vmatpush1.bf16.msra.mxu1 %v10008_v24  ;;  %8182 = vmatprep.subr.bf16.mxu0 %v9937_v33  ;;  %v9921_v24 = vcombine.high %v2763_v1, %v2767_v49  ;;  %v7468_v33 = vadd.f32 %v11335_v59, %v7425_v37  ;;  %v2823_v15 = vld [vmem:[#allocation9 + $0x1838] sm:$0xff]  ;;  %v7421_v59 = vadd.f32 %v11321_v26, %v11311_v44  ;;  %v7596_v62 = vpop.f32.mrf.mxu0 }
 0x547   : > { %8209 = vmatprep.subr.bf16.mxu1 %v10001_v57  ;;  %v9985_v57 = vcombine.high %v2827_v11, %v2831_v13  ;;  %v9984_v23 = vcombine.low %v2827_v11, %v2831_v13  ;;  %v9977_v53 = vcombine.high %v2819_v19, %v2823_v15  ;;  %v7249_v44 = vadd.f32 %v11287_v46, %v7206_v61  ;;  %v11541_v34 = vld [vmem:[#allocation32_spill] sm:$0xff]  ;;  %v11543_v13 = vld [vmem:[#allocation31_spill] sm:$0xff] }
 0x548   : > { %v7511_v42 = vadd.f32 %v11347_v21, %v7468_v33  ;;  %v7464_v56 = vadd.f32 %v11327_v47, %v7421_v59  ;;  %v7462_v26 = vadd.f32 %v11323_v2, %v7419_v58  ;;  %v7509_v45 = vadd.f32 %v11343_v36, %v7466_v43  ;;  %v7637_v21 = vpop.f32.mrf.mxu1  ;;  %v10361_v8 = vld [vmem:[%s10903_s26] sm:$0xff]  ;;  %v10362_v33 = vld [vmem:[%s10903_s26 + $0x8] sm:$0xff] }
 0x549   : > { %8183 = vmatpush2.bf16.msra.mxu0 %v9936_v17  ;;  %v7296_v49 = vadd.f32 %v11303_v39, %v7253_v54  ;;  %v9976_v46 = vcombine.low %v2819_v19, %v2823_v15  ;;  %v7247_v32 = vadd.f32 %v11283_v22, %v7204_v51  ;;  %v11542_v22 = vld [vmem:[#allocation27_spill] sm:$0xff] }
 0x54a   : > { %8210 = vmatpush1.bf16.msra.mxu1 %v10000_v18  ;;  %8184 = vmatprep.subr.bf16.mxu0 %v9929_v12  ;;  %v7554_v17 = vadd.f32 %v7553_v6, %v7511_v42  ;;  %v7507_v5 = vadd.f32 %v11337_v25, %v7464_v56  ;;  %v7505_v47 = vadd.f32 %v11333_v14, %v7462_v26  ;;  %v7639_v12 = vpop.f32.mrf.mxu1 }
 0x54b   : > { %8211 = vmatprep.subr.bf16.mxu1 %v9993_v16  ;;  %v7552_v6 = vadd.f32 %v11349_v30, %v7509_v45  ;;  %v7339_v36 = vadd.f32 %v11313_v52, %v7296_v49  ;;  %v7294_v16 = vadd.f32 %v11297_v4, %v7251_v28  ;;  %v11540_v30 = vld [vmem:[#allocation28_spill] sm:$0xff]  ;;  %v11545_v4 = vld [vmem:[#allocation25_spill] sm:$0xff] }
 0x54c   : > { %v7597_v18 = vadd.f32 %v7596_v62, %v7554_v17  ;;  %v7550_v2 = vadd.f32 %v11345_v40, %v7507_v5  ;;  %v7548_v39 = vadd.f32 %v11340_v10, %v7505_v47  ;;  %v7292_v3 = vadd.f32 %v11540_v30, %v7249_v44  ;;  %v11544_v10 = vld [vmem:[#allocation30_spill] sm:$0xff] }
 0x54d   : > { %8185 = vmatpush2.bf16.msra.mxu0 %v9928_v35  ;;  %v7595_v25 = vadd.f32 %v7594_v20, %v7552_v6  ;;  %v7290_v40 = vadd.f32 %v11542_v22, %v7247_v32  ;;  %v7337_v52 = vadd.f32 %v11543_v13, %v7294_v16  ;;  %v11547_v20 = vld [vmem:[#allocation26_spill] sm:$0xff] }
 0x54e   : > { %8212 = vmatpush1.bf16.msra.mxu1 %v9992_v48  ;;  %8186 = vmatprep.subr.bf16.mxu0 %v9921_v24  ;;  %v7593_v14 = vadd.f32 %v11360_v60, %v7550_v2  ;;  %v7640_v1 = vadd.f32 %v7639_v12, %v7597_v18  ;;  %v7591_v11 = vadd.f32 %v11541_v34, %v7548_v39  ;;  %v11546_v60 = vld [vmem:[#allocation29_spill] sm:$0xff]  ;;  %v11548_v24 = vmov 0.0  }
 0x54f   : > { %8213 = vmatprep.subr.bf16.mxu1 %v9985_v57  ;;  %v7335_v27 = vadd.f32 %v11544_v10, %v7292_v3  ;;  %v7638_v37 = vadd.f32 %v7637_v21, %v7595_v25  ;;  %v7333_v35 = vadd.f32 %v11546_v60, %v7290_v40  ;;  %v7719_v57 = vpop.f32.mrf.mxu1 }
 0x550   : > { %v7636_v31 = vadd.f32 %v7635_v41, %v7593_v14  ;;  %v7634_v48 = vadd.f32 %v11364_v63, %v7591_v11  ;;  %v7676_v63 = vpop.f32.mrf.mxu0 }
 0x551   : > { %8187 = vmatpush2.bf16.msra.mxu0 %v9920_v38  ;;  %v7721_v0 = vpop.f32.mrf.mxu1  ;;  %v7720_v34 = vadd.f32 %v7719_v57, %v7676_v63 }
 0x552   : > { %8214 = vmatpush1.bf16.msra.mxu1 %v9984_v23  ;;  %8188 = vmatprep.subr.bf16.mxu0 %v9913_v7  ;;  %v7678_v55 = vpop.f32.mrf.mxu0 }
 0x553   : > { %8215 = vmatprep.subr.bf16.mxu1 %v9977_v53  ;;  %v7723_v9 = vpop.f32.mrf.mxu1  ;;  %v7722_v11 = vadd.f32 %v7721_v0, %v7678_v55 }
 0x554   : > { %v7680_v61 = vpop.f32.mrf.mxu0 }
 0x555   : > { %8189 = vmatpush2.bf16.msra.mxu0 %v9912_v29  ;;  %v7725_v50 = vpop.f32.mrf.mxu1  ;;  %v7724_v22 = vadd.f32 %v7723_v9, %v7680_v61 }
 0x556   : > { %8216 = vmatpush1.bf16.msra.mxu1 %v9976_v46  ;;  %8272 = vmatprep.subr.mxu0 %v7339_v36  ;;  %v7682_v54 = vpop.f32.mrf.mxu0 }
 0x557   : > { %8349 = vmatprep.subr.mxu1 %v7640_v1  ;;  %v7805_v19 = vpop.f32.mrf.mxu1  ;;  %v7726_v40 = vadd.f32 %v7725_v50, %v7682_v54 }
 0x558   : > { %8191 = vmatmul.mubr.bf16.vlgmr.msra.gmra.mxu0 %v11545_v4  ;;  %v7762_v41 = vpop.f32.mrf.mxu0 }
 0x559   : > { %8234 = vmatmul.mubr.bf16.vlgmr.msra.gmra.mxu1 %v11547_v20  ;;  %8273 = vmatpush1.msra.mxu0 %v7337_v52  ;;  %v7807_v58 = vpop.f32.mrf.mxu1  ;;  %v7763_v13 = vadd.f32 %v7762_v41, %v7720_v34  ;;  %v11553_v34 = vld [vmem:[#allocation23_spill] sm:$0xff] }
 0x55a   : > { %8350 = vmatpush1.msra.mxu1 %v7638_v37  ;;  %8274 = vmatprep.subr.mxu0 %v7335_v27  ;;  %v7764_v15 = vpop.f32.mrf.mxu0 }
 0x55b   : > { %8351 = vmatprep.subr.mxu1 %v7636_v31  ;;  %8275 = vmatpush1.msra.mxu0 %v7333_v35  ;;  %v7809_v42 = vpop.f32.mrf.mxu1  ;;  %v7765_v10 = vadd.f32 %v7764_v15, %v7722_v11  ;;  %v11554_v11 = vld [vmem:[#allocation21_spill] sm:$0xff] }
 0x55c   : > { %8352 = vmatpush1.msra.mxu1 %v7634_v48  ;;  %8308 = vmatprep.mubr.f32.mxu0 %v11548_v24  ;;  %v7766_v59 = vpop.f32.mrf.mxu0 }
 0x55d   : > { %8385 = vmatprep.mubr.f32.mxu1 %v11548_v24  ;;  %v7811_v43 = vpop.f32.mrf.mxu1  ;;  %v7767_v27 = vadd.f32 %v7766_v59, %v7724_v22  ;;  %v7808_v63 = vadd.f32 %v7807_v58, %v7765_v10 }
 0x55e   : > { %v7768_v38 = vpop.f32.mrf.mxu0 }
 0x55f   : > { %v11421_v23 = vpop.f32.mrf.mxu1  ;;  %v7769_v37 = vadd.f32 %v7768_v38, %v7726_v40  ;;  %v7810_v57 = vadd.f32 %v7809_v42, %v7767_v27 }
 0x560   : > { %10034 = vmatmul.mubr.msk.f32.vlgmr.msra.gmra.mxu0 %vm1370_vm1, %v10361_v8  ;;  %v7848_v62 = vpop.f32.mrf.mxu0 }
 0x561   : > { %10036 = vmatmul.mubr.msk.f32.vlgmr.msra.gmra.mxu1 %vm1370_vm1, %v10361_v8  ;;  %8314 = vmatprep.mubr.f32.mxu0 %v11548_v24  ;;  %v11423_v51 = vpop.f32.mrf.mxu1  ;;  %v7812_v55 = vadd.f32 %v7811_v43, %v7769_v37 }
 0x562   : > { %8391 = vmatprep.mubr.f32.mxu1 %v11548_v24  ;;  %v7850_v7 = vpop.f32.mrf.mxu0 }
 0x563   : > { %v11425_v17 = vpop.f32.mrf.mxu1  ;;  %v7851_v59 = vadd.f32 %v7850_v7, %v7808_v63 }
 0x564   : > { %10035 = vmatmul.mubr.msk.f32.gmra.mxu0 %vm1370_vm1, %v10362_v33  ;;  %v7852_v56 = vpop.f32.mrf.mxu0 }
 0x565   : > { %10037 = vmatmul.mubr.msk.f32.gmra.mxu1 %vm1370_vm1, %v10362_v33  ;;  %8504 = vmatprep.mubr.f32.mxu0 %v11548_v24  ;;  %v11427_v44 = vpop.f32.mrf.mxu1  ;;  %v7853_v38 = vadd.f32 %v7852_v56, %v7810_v57  ;;  %v7894_v7 = vadd.f32 %v11423_v51, %v7851_v59 }
 0x566   : > { %8575 = vmatprep.mubr.f32.mxu1 %v11548_v24  ;;  %v7854_v53 = vpop.f32.mrf.mxu0  ;;  %v7806_v24 = vadd.f32 %v7805_v19, %v7763_v13 }
 0x567   : > { %v7896_v56 = vadd.f32 %v11425_v17, %v7853_v38 }
 0x568   : > { %v11429_v28 = vpop.f32.mrf.mxu0  ;;  %v7849_v9 = vadd.f32 %v7848_v62, %v7806_v24  ;;  %v11556_v24 = vld [vmem:[#allocation24_spill] sm:$0xff] }
 0x56a   : > { %v11431_v45 = vpop.f32.mrf.mxu0  ;;  %v7892_v43 = vadd.f32 %v11421_v23, %v7849_v9 }
 0x56c   : > { %v11433_v49 = vpop.f32.mrf.mxu0  ;;  %v7935_v23 = vadd.f32 %v11429_v28, %v7892_v43  ;;  %v10328_v43 = vld [vmem:[#allocation12 + $0xb8] sm:$0xff]  }
 0x56d   : > { %11549 = vst [vmem:[#allocation28_spill] sm:$0xff] %v11433_v49 }
 0x56e   : > { %v11435_v18 = vpop.f32.mrf.mxu0 }
 0x56f   : > { %11550 = vst [vmem:[#allocation32_spill] sm:$0xff] %v11435_v18 }
 0x579   : > { %v7977_v26 = vpop.f32.mrf.mxu1 }
 0x57b   : > { %v7979_v21 = vpop.f32.mrf.mxu1 }
 0x57d   : > { %v7981_v5 = vpop.f32.mrf.mxu1 }
 0x57f   : > { %v7983_v29 = vpop.f32.mrf.mxu1 }
 0x598   : > { %v8020_v47 = vpop.f32.mrf.mxu0 }
 0x599   : > { %v8021_v20 = vadd.f32 %v8020_v47, %v7977_v26  ;;  %v7855_v26 = vadd.f32 %v7854_v53, %v7812_v55 }
 0x59a   : > { %v8022_v46 = vpop.f32.mrf.mxu0 }
 0x59b   : > { %v8023_v60 = vadd.f32 %v8022_v46, %v7979_v21  ;;  %v7898_v53 = vadd.f32 %v11427_v44, %v7855_v26 }
 0x59c   : > { %v8024_v2 = vpop.f32.mrf.mxu0 }
 0x59d   : > { %v8025_v35 = vadd.f32 %v8024_v2, %v7981_v5 }
 0x59e   : > { %v8026_v39 = vpop.f32.mrf.mxu0 }
 0x59f   : > { %v8027_v8 = vadd.f32 %v8026_v39, %v7983_v29 }
 0x5b9   : > { %v8063_v6 = vpop.f32.mrf.mxu1 }
 0x5ba   : > { %v8064_v0 = vadd.f32 %v8063_v6, %v8021_v20 }
 0x5bb   : > { %v8065_v32 = vpop.f32.mrf.mxu1 }
 0x5bc   : > { %v8066_v33 = vadd.f32 %v8065_v32, %v8023_v60 }
 0x5bd   : > { %v8067_v36 = vpop.f32.mrf.mxu1 }
 0x5be   : > { %v8068_v18 = vadd.f32 %v8067_v36, %v8025_v35  ;;  %v8398_v36 = vld [vmem:[#allocation10] sm:$0xf] }
 0x5bf   : > { %v8069_v25 = vpop.f32.mrf.mxu1  ;;  %v8403_v44 = vrot.slane %v8398_v36, %v11553_v34  ;;  %v8407_v22 = vrot.slane %v8398_v36, %v11554_v11  ;;  %v10350_v34 = vld [vmem:[#allocation12 + $0xc8] sm:$0xff]  }
 0x5c0   : > { %v8070_v54 = vadd.f32 %v8069_v25, %v8027_v8  ;;  %v8411_v8 = vrot.slane %v8398_v36, %v11556_v24  ;;  %v10352_v11 = vld [vmem:[#allocation12 + $0x88] sm:$0xff]   ;;  %v10040_v24 = vld [vmem:[#allocation13] ss:$0 sm:$0xff] }
 0x5d8   : > { %v8106_v12 = vpop.f32.mrf.mxu0 }
 0x5d9   : > { %v8107_v21 = vadd.f32 %v8106_v12, %v8064_v0 }
 0x5da   : > { %v8108_v14 = vpop.f32.mrf.mxu0 }
 0x5db   : > { %v8109_v50 = vadd.f32 %v8108_v14, %v8066_v33 }
 0x5dc   : > { %v8110_v30 = vpop.f32.mrf.mxu0 }
 0x5dd   : > { %v8111_v41 = vadd.f32 %v8110_v30, %v8068_v18 }
 0x5de   : > { %v8112_v52 = vpop.f32.mrf.mxu0 }
 0x5df   : > { %v8113_v5 = vadd.f32 %v8112_v52, %v8070_v54  ;;  %v11555_v52 = vld [vmem:[#allocation22_spill] sm:$0xff] }
 0x5f9   : > { %v8149_v16 = vpop.f32.mrf.mxu1 }
 0x5fa   : > { %v8150_v58 = vadd.f32 %v8149_v16, %v8107_v21  ;;  %v11551_v16 = vld [vmem:[#allocation28_spill] sm:$0xff] }
 0x5fb   : > { %v8151_v1 = vpop.f32.mrf.mxu1  ;;  %v7939_v14 = vadd.f32 %v11551_v16, %v7896_v56  ;;  %v10334_v56 = vld [vmem:[#allocation12 + $0xe8] sm:$0xff]   ;;  %v10343_v16 = vld [vmem:[#allocation12 + $0x18] sm:$0xff]  }
 0x5fc   : > { %v8152_v29 = vadd.f32 %v8151_v1, %v8109_v50  ;;  %v11552_v1 = vld [vmem:[#allocation32_spill] sm:$0xff] }
 0x5fd   : > { %v8153_v3 = vpop.f32.mrf.mxu1  ;;  %v7941_v30 = vadd.f32 %v11552_v1, %v7898_v53  ;;  %v10335_v53 = vld [vmem:[#allocation12 + $0x28] sm:$0xff]   ;;  %v10345_v1 = vld [vmem:[#allocation12 + $0x50] sm:$0xff]  }
 0x5fe   : > { %v8154_v47 = vadd.f32 %v8153_v3, %v8111_v41 }
 0x5ff   : > { %v8155_v4 = vpop.f32.mrf.mxu1 }
 0x600   : > { %v8156_v6 = vadd.f32 %v8155_v4, %v8113_v5 }
 0x618   : > { %v8192_v31 = vpop.f32.mrf.mxu0 }
 0x619   : > { %v8235_v48 = vpop.f32.mrf.mxu1  ;;  %v8193_v18 = vadd.f32 %v8192_v31, %v8150_v58  ;;  %v10326_v58 = vld [vmem:[#allocation12 + $0xf8] sm:$0xff]  }
 0x61a   : > { %v8194_v49 = vpop.f32.mrf.mxu0 }
 0x61b   : > { %v8237_v61 = vpop.f32.mrf.mxu1  ;;  %v8195_v62 = vadd.f32 %v8194_v49, %v8152_v29  ;;  %v7937_v49 = vadd.f32 %v11431_v45, %v7894_v7  ;;  %v8236_v13 = vadd.f32 %v8235_v48, %v8193_v18  ;;  %v8415_v45 = vrot.slane %v8398_v36, %v11555_v52  ;;  %v8436_v29 = vld [vmem:[%s484_s14] sm:$0xff]  ;;  %v10337_v36 = vld [vmem:[#allocation12 + $0x60] sm:$0xff]  }
 0x61c   : > { %v8196_v15 = vpop.f32.mrf.mxu0  ;;  %v10333_v7 = vld [vmem:[#allocation12 + $0x68] sm:$0xff]  }
 0x61d   : > { %v8239_v19 = vpop.f32.mrf.mxu1  ;;  %v8197_v32 = vadd.f32 %v8196_v15, %v8154_v47  ;;  %v8238_v3 = vadd.f32 %v8237_v61, %v8195_v62  ;;  %v10325_v47 = vld [vmem:[#allocation12 + $0x78] sm:$0xff]   ;;  %v10330_v62 = vld [vmem:[#allocation12 + $0xf0] sm:$0xff]   ;;  %v10336_v18 = vld [vmem:[#allocation12 + $0xa8] sm:$0xff]  }
 0x61e   : > { %v8198_v46 = vpop.f32.mrf.mxu0 }
 0x61f   : > { %v8241_v42 = vpop.f32.mrf.mxu1  ;;  %v8199_v25 = vadd.f32 %v8198_v46, %v8156_v6  ;;  %v8240_v17 = vadd.f32 %v8239_v19, %v8197_v32  ;;  %v10329_v6 = vld [vmem:[#allocation12 + $0x70] sm:$0xff]  }
 0x620   : > { %v8310_v2 = vpop.f32.mrf.mxu0  ;;  %v10331_v32 = vld [vmem:[#allocation12 + $0x30] sm:$0xff]  }
 0x621   : > { %v8387_v39 = vpop.f32.mrf.mxu1  ;;  %v8242_v37 = vadd.f32 %v8241_v42, %v8199_v25  ;;  %v8311_v4 = vadd.f32 %v8310_v2, %v7935_v23  ;;  %v10327_v42 = vld [vmem:[#allocation12 + $0x38] sm:$0xff]   ;;  %v10332_v2 = vld [vmem:[#allocation12 + $0xb0] sm:$0xff]   ;;  %v10339_v25 = vld [vmem:[#allocation12 + $0x20] sm:$0xff]  }
 0x622   : > { %v8312_v12 = vpop.f32.mrf.mxu0  ;;  %v8388_v20 = vadd.f32 %v8387_v39, %v8236_v13  ;;  %v10338_v39 = vld [vmem:[#allocation12 + $0xe0] sm:$0xff]   ;;  %v10341_v23 = vld [vmem:[#allocation12 + $0x58] sm:$0xff]  }
 0x623   : > { %v8389_v51 = vpop.f32.mrf.mxu1  ;;  %v8313_v28 = vadd.f32 %v8312_v12, %v7937_v49  ;;  %v8420_v9 = vadd.f32 %v8403_v44, %v8311_v4  ;;  %v10340_v12 = vld [vmem:[#allocation12 + $0xa0] sm:$0xff]   ;;  %v10342_v49 = vld [vmem:[#allocation12 + $0xd8] sm:$0xff]  }
 0x624   : > { %v8316_v40 = vpop.f32.mrf.mxu0  ;;  %v8390_v60 = vadd.f32 %v8389_v51, %v8238_v3  ;;  %v8422_v41 = vadd.f32 %v8411_v8, %v8388_v20  ;;  %v10347_v51 = vld [vmem:[#allocation12 + $0x10] sm:$0xff]   ;;  %v10355_v13 = vld [vmem:[#allocation12] sm:$0xff]  }
 0x625   : > { %v8317_v10 = vadd.f32 %v8316_v40, %v7939_v14  ;;  %v8393_v27 = vpop.f32.mrf.mxu1  ;;  %v8421_v48 = vadd.f32 %v8407_v22, %v8313_v28  ;;  %v8428_v19 = vmax.f32 %v8420_v9, 0.0  ;;  %v10344_v14 = vld [vmem:[#allocation12 + $0x98] sm:$0xff]   ;;  %v10348_v3 = vld [vmem:[#allocation12 + $0x90] sm:$0xff]   ;;  %v10354_v40 = vld [vmem:[#allocation12 + $0xc0] sm:$0xff]  }
 0x626   : > { %v8394_v35 = vadd.f32 %v8393_v27, %v8240_v17  ;;  %v8318_v31 = vpop.f32.mrf.mxu0  ;;  %v8423_v54 = vadd.f32 %v8415_v45, %v8390_v60  ;;  %v8430_v46 = vmax.f32 %v8422_v41, 0.0  ;;  %v10349_v17 = vld [vmem:[#allocation12 + $0x48] sm:$0xff]   ;;  %v10356_v28 = vld [vmem:[#allocation12 + $0x80] sm:$0xff]  }
 0x627   : > { %v8319_v33 = vadd.f32 %v8318_v31, %v7941_v30  ;;  %v8395_v63 = vpop.f32.mrf.mxu1  ;;  %v8424_v57 = vadd.f32 %v8403_v44, %v8317_v10  ;;  %v8429_v26 = vmax.f32 %v8421_v48, 0.0  ;;  %v10346_v30 = vld [vmem:[#allocation12 + $0xd0] sm:$0xff]   ;;  %v10351_v44 = vld [vmem:[#allocation12 + $0x8] sm:$0xff]  }
 0x628   : > { %v8396_v55 = vadd.f32 %v8395_v63, %v8242_v37  ;;  %v8426_v0 = vadd.f32 %v8411_v8, %v8394_v35  ;;  %v8431_v5 = vmax.f32 %v8423_v54, 0.0 }
 0x629   : > { %v8425_v61 = vadd.f32 %v8407_v22, %v8319_v33  ;;  %v8432_v59 = vmax.f32 %v8424_v57, 0.0  ;;  %v10353_v22 = vld [vmem:[#allocation12 + $0x40] sm:$0xff]  }
 0x62a   : > { %v8427_v50 = vadd.f32 %v8415_v45, %v8396_v55  ;;  %v8434_v21 = vmax.f32 %v8426_v0, 0.0 }
 0x62b   : > { %v8433_v15 = vmax.f32 %v8425_v61, 0.0 }
 0x62c   : > { %v8435_v38 = vmax.f32 %v8427_v50, 0.0 }
 0x62d   : > { %8468 = vmatprep.subr.mxu0 %v8433_v15 }
 0x62e   : > { %8539 = vmatprep.subr.mxu1 %v8435_v38  ;;  %8469 = vmatpush1.msra.mxu0 %v8432_v59 }
 0x62f   : > { %8540 = vmatpush1.msra.mxu1 %v8434_v21  ;;  %8470 = vmatprep.subr.mxu0 %v8429_v26 }
 0x630   : > { %8541 = vmatprep.subr.mxu1 %v8431_v5  ;;  %8471 = vmatpush1.msra.mxu0 %v8428_v19 }
 0x631   : > { %8542 = vmatpush1.msra.mxu1 %v8430_v46  ;;  %10038 = vmatmul.mubr.msk.f32.vlgmr.msra.gmra.mxu0 %vm1370_vm1, %v8436_v29 }
 0x632   : > { %10039 = vmatmul.mubr.msk.f32.vlgmr.msra.gmra.mxu1 %vm1370_vm1, %v8436_v29  ;;  %10081 = vmatprep.subr.bf16.mxu0 %v10325_v47 }
 0x633   : > { %10103 = vmatprep.subr.bf16.mxu1 %v10326_v58  ;;  %10082 = vmatpush3.bf16.msra.mxu0 %v10327_v42 }
 0x634   : > { %10104 = vmatpush3.bf16.msra.mxu1 %v10328_v43  ;;  %10083 = vmatprep.subr.bf16.mxu0 %v10329_v6 }
 0x635   : > { %10105 = vmatprep.subr.bf16.mxu1 %v10330_v62 }
 0x637   : > { %10084 = vmatpush3.bf16.msra.mxu0 %v10331_v32 }
 0x638   : > { %10106 = vmatpush3.bf16.msra.mxu1 %v10332_v2  ;;  %10085 = vmatprep.subr.bf16.mxu0 %v10333_v7 }
 0x639   : > { %10107 = vmatprep.subr.bf16.mxu1 %v10334_v56 }
 0x63b   : > { %10086 = vmatpush3.bf16.msra.mxu0 %v10335_v53 }
 0x63c   : > { %10108 = vmatpush3.bf16.msra.mxu1 %v10336_v18  ;;  %10087 = vmatprep.subr.bf16.mxu0 %v10337_v36 }
 0x63d   : > { %10109 = vmatprep.subr.bf16.mxu1 %v10338_v39 }
 0x63f   : > { %10088 = vmatpush3.bf16.msra.mxu0 %v10339_v25 }
 0x640   : > { %10110 = vmatpush3.bf16.msra.mxu1 %v10340_v12  ;;  %10089 = vmatprep.subr.bf16.mxu0 %v10341_v23 }
 0x641   : > { %10111 = vmatprep.subr.bf16.mxu1 %v10342_v49 }
 0x643   : > { %10090 = vmatpush3.bf16.msra.mxu0 %v10343_v16 }
 0x644   : > { %10112 = vmatpush3.bf16.msra.mxu1 %v10344_v14  ;;  %10091 = vmatprep.subr.bf16.mxu0 %v10345_v1 }
 0x645   : > { %10113 = vmatprep.subr.bf16.mxu1 %v10346_v30 }
 0x647   : > { %10092 = vmatpush3.bf16.msra.mxu0 %v10347_v51 }
 0x648   : > { %10114 = vmatpush3.bf16.msra.mxu1 %v10348_v3  ;;  %10093 = vmatprep.subr.bf16.mxu0 %v10349_v17 }
 0x649   : > { %10115 = vmatprep.subr.bf16.mxu1 %v10350_v34 }
 0x64b   : > { %10094 = vmatpush3.bf16.msra.mxu0 %v10351_v44 }
 0x64c   : > { %10116 = vmatpush3.bf16.msra.mxu1 %v10352_v11  ;;  %10095 = vmatprep.subr.bf16.mxu0 %v10353_v22 }
 0x64d   : > { %10117 = vmatprep.subr.bf16.mxu1 %v10354_v40 }
 0x64f   : > { %10096 = vmatpush3.bf16.msra.mxu0 %v10355_v13 }
 0x650   : > { %10118 = vmatpush3.bf16.msra.mxu1 %v10356_v28 }
 0x6f1   : > { %v8506_v52 = vpop.f32.mrf.mxu0 }
 0x6f2   : > { %v8577_v45 = vpop.f32.mrf.mxu1  ;;  %v8582_v60 = vpack.c.bf16 %v8506_v52, %v8506_v52 }
 0x6f3   : > { %v8508_v10 = vpop.f32.mrf.mxu0  ;;  %v8584_v27 = vpack.c.bf16 %v8577_v45, %v8577_v45 }
 0x6f4   : > { %v8583_v37 = vpack.c.bf16 %v8508_v10, %v8508_v10  ;;  %v8579_v4 = vpop.f32.mrf.mxu1 }
 0x6f5   : > { %v8585_v35 = vpack.c.bf16 %v8579_v4, %v8579_v4 }
 0x6f6   : > { %8881 = vmatprep.mubr.bf16.mxu0 %v8583_v37 }
 0x6f7   : > { %8921 = vmatprep.mubr.bf16.mxu1 %v8585_v35  ;;  %8882 = vmatmul.mubr.bf16.vlgmr.msra.gmra.mxu0 %v8582_v60 }
 0x6f8   : > { %8922 = vmatmul.mubr.bf16.vlgmr.msra.gmra.mxu1 %v8584_v27 }
 0x7b7   : > { %v10097_v31 = vpop.f32.mrf.mxu0 }
 0x7b8   : > { %v10119_v20 = vpop.f32.mrf.mxu1 }
 0x7b9   : > { %v10098_v8 = vpop.f32.mrf.mxu0 }
 0x7ba   : > { %v10099_v33 = vadd.f32 %v10098_v8, %v10097_v31  ;;  %v10120_v63 = vpop.f32.mrf.mxu1 }
 0x7bb   : > { %v10100_v57 = vpop.f32.mrf.mxu0  ;;  %v10121_v48 = vadd.f32 %v10120_v63, %v10119_v20 }
 0x7bc   : > { %v8884_v55 = vadd.f32 %v10099_v33, %v10040_v24  ;;  %v10122_v0 = vpop.f32.mrf.mxu1 }
 0x7bd   : > { %v10101_v61 = vpop.f32.mrf.mxu0 }
 0x7be   : > { %v10123_v9 = vpop.f32.mrf.mxu1  ;;  %v8924_v54 = vadd.f32 %v10121_v48, %v8884_v55 }
 0x7c0   : > { %8929 = vmax.xlane.f32.xlu0 %v8924_v54 }
 0x849   : > { %v8930_v50 = vpop.xlane.xlu0 %8929 }
 0x84a   : > { %v8931_v41 = vsub.f32 %v8924_v54, %v8930_v50 }
 0x84c   : > { %v8932_v15 = vmul.f32 1.442695, %v8931_v41 }
 0x84e   : > { %10357 = vpow2.f32 %v8932_v15 }
 0x85b   : > { %v10358_v59 = vpop.eup %10357 }
 0x85c   : > { %8934 = vadd.xlane.f32.xlu0 %v10358_v59 }
 0x8e5   : > { %v8935_v38 = vpop.xlane.xlu0 %8934 }
 0x8e6   : > { %10359 = vlog2.f32 %v8935_v38 }
 0x8f3   : > { %v10360_v26 = vpop.eup %10359 }
 0x8f4   : > { %v8937_v21 = vmul.f32 0.6931472, %v10360_v26 }
 0x8f6   : > { %v8938_v19 = vsub.f32 %v8931_v41, %v8937_v21 }
 0x8f8   : > { %8939 = vst [vmem:[%s488_s24] sm:$0xff] %v8938_v19 }
 0x8f9 PF: > { %p25_p6 = scmp.ge.s32.totalorder %s10793_s22, 4   ;;  %s11557_s30 = smov %s10621_s10 }
 0x8fa   : > { %s11558_s10 = smov %s10625_s11  ;;  %s11559_s11 = smov %s10805_s13 }
 0x8fb   : > { %s11560_s12 = smov %s10793_s22  ;;  %27 = sbr.rel (!%p25_p6) target bundleno = 12 (0xc), region = 136 }
 0x900   :  { %8959 = vsyncpa [#allocation3], 1 }
 0x901   :  { %8961 = vsyncpa [#allocation3 + $0x1], 1 }
 0x902   :  { %8962 = vsyncpa [#allocation5], 1 }
 0x903   :  { %8964 = vsyncpa [#allocation5 + $0x1], 1 }
 0x904   :  { %8965 = vsyncpa [#allocation8], 1 }
 0x905   :  { %8966 = vsyncpa [#allocation11], 1 }
 0x906   :  { %8967 = vsyncpa [#allocation14], 1 }

</bundles_post_ra>
